<compile_context>
chip_gen: v7x
topology: tpu7x:2x2x1
jax: 0.10.0
libtpu: 0.0.40
codegen_flags: <defaults>
</compile_context>

<pallas_src>
import jax
import jax.numpy as jnp
from jax import lax
from jax.experimental import pallas as pl
from jax.experimental.pallas import tpu as pltpu


def _round_up(x, m):
    return (x + m - 1) // m * m


def _layer_hidden_sizes(num_layers, hidden_dim, num_keywords):
    # Mirrors LSTMKeywordSpotter: lstm1 -> hidden_dim, lstm2 -> hidden_dim,
    # lstm3 (only if num_layers > 2) -> num_keywords.
    assert 1 <= num_layers <= 3, "module supports 1, 2 or 3 LSTM layers"
    sizes = [hidden_dim]
    if num_layers > 1:
        sizes.append(hidden_dim)
    if num_layers > 2:
        sizes.append(num_keywords)
    return sizes


def make_lstm_forward(num_layers, T, BP, in0_dim, HP, KP, num_keywords, mxu_dtype):
    """Builds the pallas_call.

    Kernel inputs (order):
      x2d (T*BP, in0_dim)                               VMEM, mxu_dtype
      layer 0:   w_ih_T (in0_dim, NG), w_hh_T (HP, NG)  VMEM, mxu_dtype
                 bias   (1, NG)                         VMEM, f32
      layer l>=1: w_ih_T (HP, NG), w_hh_T (HP, NG)      ANY (HBM, manual DMA)
                 bias   (1, NG)                         VMEM, f32
      w_lin_T (HP, KP)                                  ANY (HBM, manual DMA)
      b_lin   (1, KP)                                   VMEM, f32
    Output: (BP, KP) f32 (padded; wrapper slices [:B, :num_keywords]).
    """
    NG = 4 * HP
    n_extra = num_layers - 1          # layers whose weights are DMA'd manually
    n_dma = 2 * n_extra + 1           # (w_ih, w_hh) per extra layer + w_lin

    def kernel(*args):
        idx = 0
        x_ref = args[idx]; idx += 1
        wih0_ref, whh0_ref, b0_ref = args[idx], args[idx + 1], args[idx + 2]
        idx += 3
        later = []                    # (w_ih HBM, w_hh HBM, bias VMEM) per layer >= 1
        for _ in range(n_extra):
            later.append((args[idx], args[idx + 1], args[idx + 2]))
            idx += 3
        wlin_hbm, blin_ref = args[idx], args[idx + 1]; idx += 2
        out_ref = args[idx]; idx += 1
        gates_pre, seq_a, seq_b = args[idx], args[idx + 1], args[idx + 2]; idx += 3
        wbufs = []
        for _ in range(n_extra):
            wbufs.append((args[idx], args[idx + 1]))
            idx += 2
        wlin_buf, sems = args[idx], args[idx + 1]

        # ---- start weight prefetch DMAs; they overlap the layer-0 recurrence ----
        si = 0
        layer_copies = []
        for (wih_hbm, whh_hbm, _), (wih_buf, whh_buf) in zip(later, wbufs):
            c_ih = pltpu.make_async_copy(wih_hbm, wih_buf, sems.at[si]); si += 1
            c_hh = pltpu.make_async_copy(whh_hbm, whh_buf, sems.at[si]); si += 1
            c_ih.start()
            c_hh.start()
            layer_copies.append((c_ih, c_hh))
        c_lin = pltpu.make_async_copy(wlin_hbm, wlin_buf, sems.at[si])
        c_lin.start()

        seq_bufs = (seq_a, seq_b)
        # Loop-invariant lane mask: 3rd packed gate block ("g") uses tanh,
        # the other three (i, f, o) use sigmoid.  (PyTorch gate order i,f,g,o.)
        lane = lax.broadcasted_iota(jnp.int32, (BP, NG), 1)
        g_block = (lane >= 2 * HP) & (lane < 3 * HP)

        def run_layer(layer_idx, in_2d, wih, whh, bias):
            out_seq = seq_bufs[layer_idx % 2]
            # Input-to-hidden part of ALL timestep gates in one MXU call; bias
            # broadcast hoisted out of the recurrent loop.
            gates_pre[...] = jnp.dot(in_2d.astype(mxu_dtype), wih,
                                     preferred_element_type=jnp.float32) + bias

            def step(t, carry):
                h, c = carry
                off = pl.multiple_of(t * BP, BP)
                g = gates_pre[pl.ds(off, BP), :] + jnp.dot(
                    h.astype(mxu_dtype), whh, preferred_element_type=jnp.float32)
                # One tanh pass gives the candidate gate; one more gives all
                # three sigmoids (sigmoid(x) = 0.5*tanh(0.5*x) + 0.5).
                t_all = jnp.tanh(g)
                s_all = 0.5 * jnp.tanh(0.5 * g) + 0.5
                act = jnp.where(g_block, t_all, s_all)
                i_g = act[:, 0:HP]
                f_g = act[:, HP:2 * HP]        # lane-offset slices -> XLU rotations
                g_g = act[:, 2 * HP:3 * HP]
                o_g = act[:, 3 * HP:4 * HP]
                c = f_g * c + i_g * g_g        # f32 elementwise state update
                h = o_g * jnp.tanh(c)
                out_seq[pl.ds(off, BP), :] = h
                return (h, c)

            z = jnp.zeros((BP, HP), jnp.float32)   # init_hidden(): zeros
            lax.fori_loop(0, T, step, (z, z), unroll=True)
            return out_seq

        # Layer 0: weights arrive via the normal VMEM pipeline (already resident).
        cur = run_layer(0, x_ref[...], wih0_ref[...], whh0_ref[...], b0_ref[...])
        for l in range(n_extra):
            c_ih, c_hh = layer_copies[l]
            c_ih.wait()
            c_hh.wait()
            wih_buf, whh_buf = wbufs[l]
            bias_ref = later[l][2]
            cur = run_layer(l + 1, cur[...], wih_buf[...], whh_buf[...],
                            bias_ref[...])

        # hidden2keyword + log_softmax(dim=2) + mean(dim=0), once, after the loop.
        c_lin.wait()
        logits = jnp.dot(cur[...].astype(mxu_dtype), wlin_buf[...],
                         preferred_element_type=jnp.float32) + blin_ref[...]
        klane = lax.broadcasted_iota(jnp.int32, logits.shape, 1)
        logits = jnp.where(klane < num_keywords, logits, -1e30)  # mask pad lanes
        m = jnp.max(logits, axis=-1, keepdims=True)
        s = logits - m
        lse = jnp.log(jnp.sum(jnp.exp(s), axis=-1, keepdims=True))
        logp = (s - lse).reshape(T, BP, KP)
        out_ref[...] = jnp.mean(logp, axis=0)

    vmem = pl.BlockSpec(memory_space=pltpu.MemorySpace.VMEM)
    hbm = pl.BlockSpec(memory_space=pl.ANY)
    in_specs = [vmem, vmem, vmem, vmem]                   # x, w_ih0, w_hh0, b0
    for _ in range(n_extra):
        in_specs += [hbm, hbm, vmem]                      # w_ih_l, w_hh_l, b_l
    in_specs += [hbm, vmem]                               # w_lin, b_lin

    scratch_shapes = [
        pltpu.VMEM((T * BP, NG), jnp.float32),            # gates_pre (all timesteps)
        pltpu.VMEM((T * BP, HP), jnp.float32),            # seq_a (layer output seq)
        pltpu.VMEM((T * BP, HP), jnp.float32),            # seq_b (ping-pong buffer)
    ]
    for _ in range(n_extra):
        scratch_shapes += [pltpu.VMEM((HP, NG), mxu_dtype),   # w_ih_l landing buffer
                           pltpu.VMEM((HP, NG), mxu_dtype)]   # w_hh_l landing buffer
    scratch_shapes += [pltpu.VMEM((HP, KP), mxu_dtype),       # w_lin landing buffer
                       pltpu.SemaphoreType.DMA((n_dma,))]

    return pl.pallas_call(
        kernel,
        out_shape=jax.ShapeDtypeStruct((BP, KP), jnp.float32),
        in_specs=in_specs,
        out_specs=pl.BlockSpec(memory_space=pltpu.MemorySpace.VMEM),
        scratch_shapes=scratch_shapes,
    )


def _pack_gate_weights(w, in_p, HP, dtype):
    """PyTorch (4*hid, in_d) weight -> (in_p, 4*HP): transposed, gates lane-packed."""
    hid = w.shape[0] // 4
    in_d = w.shape[1]
    blocks = []
    for g in range(4):
        blk = w[g * hid:(g + 1) * hid, :].T                   # (in_d, hid)
        blk = jnp.pad(blk, ((0, in_p - in_d), (0, HP - hid)))
        blocks.append(blk)
    return jnp.concatenate(blocks, axis=1).astype(dtype)      # (in_p, 4*HP)


def _pack_gate_bias(b_ih, b_hh, HP):
    hid = b_ih.shape[0] // 4
    b = b_ih + b_hh
    blocks = [jnp.pad(b[g * hid:(g + 1) * hid], (0, HP - hid)) for g in range(4)]
    return jnp.concatenate(blocks)[None, :].astype(jnp.float32)   # (1, 4*HP)


def lstm_keyword_spotter_forward(x, layers, w_lin, b_lin, num_layers,
                                 hidden_dim, num_keywords,
                                 mxu_dtype=jnp.float32):
    T, B, D = x.shape
    hidden_sizes = _layer_hidden_sizes(num_layers, hidden_dim, num_keywords)
    BP = _round_up(max(B, 8), 8)            # batch padded to sublane width
    HP = _round_up(max(hidden_sizes), 32)   # 4*HP is a multiple of 128 lanes
    KP = _round_up(num_keywords, 128)

    # (T, B, D) -> (T*BP, D) with zero-padded batch rows (time packed into sublanes).
    xp = jnp.pad(x, ((0, 0), (0, BP - B), (0, 0))).reshape(T * BP, D)

    args = [xp.astype(mxu_dtype)]
    in_p = D
    for (w_ih, w_hh, b_ih, b_hh), hid in zip(layers, hidden_sizes):
        args += [_pack_gate_weights(w_ih, in_p, HP, mxu_dtype),
                 _pack_gate_weights(w_hh, HP, HP, mxu_dtype),
                 _pack_gate_bias(b_ih, b_hh, HP)]
        in_p = HP
    last = hidden_sizes[-1]
    args += [jnp.pad(w_lin.T,
                     ((0, HP - last), (0, KP - num_keywords))).astype(mxu_dtype),
             jnp.pad(b_lin, (0, KP - num_keywords))[None, :].astype(jnp.float32)]

    call = make_lstm_forward(num_layers, T, BP, D, HP, KP, num_keywords, mxu_dtype)
    out = call(*args)
    return out[:B, :num_keywords]


def init_params(key, num_layers, input_dim, hidden_dim, num_keywords):
    """Deterministic init mimicking PyTorch's uniform(-1/sqrt(H), 1/sqrt(H))."""
    hidden_sizes = _layer_hidden_sizes(num_layers, hidden_dim, num_keywords)
    layers = []
    in_d = input_dim
    for hid in hidden_sizes:
        k = 1.0 / jnp.sqrt(hid)
        key, k1, k2, k3, k4 = jax.random.split(key, 5)
        w_ih = jax.random.uniform(k1, (4 * hid, in_d), jnp.float32, -k, k)
        w_hh = jax.random.uniform(k2, (4 * hid, hid), jnp.float32, -k, k)
        b_ih = jax.random.uniform(k3, (4 * hid,), jnp.float32, -k, k)
        b_hh = jax.random.uniform(k4, (4 * hid,), jnp.float32, -k, k)
        layers.append((w_ih, w_hh, b_ih, b_hh))
        in_d = hid
    k = 1.0 / jnp.sqrt(in_d)
    key, k1, k2 = jax.random.split(key, 3)
    w_lin = jax.random.uniform(k1, (num_keywords, in_d), jnp.float32, -k, k)
    b_lin = jax.random.uniform(k2, (num_keywords,), jnp.float32, -k, k)
    return layers, w_lin, b_lin


def reference_forward(x, layers, w_lin, b_lin):
    """Pure-JAX reference matching the PyTorch module semantics (true f32)."""
    hp = lax.Precision.HIGHEST
    out = x
    B = x.shape[1]
    for (w_ih, w_hh, b_ih, b_hh) in layers:
        H = w_hh.shape[1]

        def cell(carry, xt, w_ih=w_ih, w_hh=w_hh, b_ih=b_ih, b_hh=b_hh):
            h, c = carry
            gates = (jnp.dot(xt, w_ih.T, precision=hp)
                     + jnp.dot(h, w_hh.T, precision=hp) + b_ih + b_hh)
            i, f, g, o = jnp.split(gates, 4, axis=-1)
            i = jax.nn.sigmoid(i)
            f = jax.nn.sigmoid(f)
            g = jnp.tanh(g)
            o = jax.nn.sigmoid(o)
            c = f * c + i * g
            h = o * jnp.tanh(c)
            return (h, c), h

        init = (jnp.zeros((B, H), jnp.float32), jnp.zeros((B, H), jnp.float32))
        _, out = lax.scan(cell, init, out)
    logits = jnp.dot(out, w_lin.T, precision=hp) + b_lin
    logp = jax.nn.log_softmax(logits, axis=2)
    return logp.mean(axis=0)


if __name__ == "__main__":
    # Make f32 matmuls (reference and in-kernel) true-f32 so the strict check
    # below is meaningful on TPU regardless of the default matmul precision.
    jax.config.update("jax_default_matmul_precision", "highest")

    # Small shapes consistent with the module's forward (seq-major input).
    T, B = 8, 2
    input_dim, hidden_dim, num_keywords, num_layers = 16, 32, 10, 3

    key = jax.random.PRNGKey(0)
    key, kx = jax.random.split(key)
    x = jax.random.normal(kx, (T, B, input_dim), jnp.float32)

    layers, w_lin, b_lin = init_params(key, num_layers, input_dim,
                                       hidden_dim, num_keywords)
    ref = reference_forward(x, layers, w_lin, b_lin)

    # f32 MXU operands: matches the f32 PyTorch module closely.
    out = lstm_keyword_spotter_forward(x, layers, w_lin, b_lin, num_layers,
                                       hidden_dim, num_keywords,
                                       mxu_dtype=jnp.float32)
    out = jax.block_until_ready(out)
    assert out.shape == (B, num_keywords)
    err = float(jnp.max(jnp.abs(out - ref)))
    assert err < 2e-3, f"f32 kernel mismatch: max abs err {err}"

    # bf16 MXU operands (perf path for v6e/v7x): small expected precision loss,
    # so the tolerance is loosened as noted in the performance review.
    out_bf16 = lstm_keyword_spotter_forward(x, layers, w_lin, b_lin, num_layers,
                                            hidden_dim, num_keywords,
                                            mxu_dtype=jnp.bfloat16)
    out_bf16 = jax.block_until_ready(out_bf16)
    err_bf16 = float(jnp.max(jnp.abs(out_bf16 - ref)))
    assert err_bf16 < 1e-1, f"bf16 kernel mismatch: max abs err {err_bf16}"

    print("KERNEL_OK")
</pallas_src>

<mosaic_0001>
module attributes {stable_mosaic.version = 11 : i64} {
  func.func @kernel(%arg0: memref<64x16xf32, #tpu.memory_space<vmem>>, %arg1: memref<16x128xf32, #tpu.memory_space<vmem>>, %arg2: memref<32x128xf32, #tpu.memory_space<vmem>>, %arg3: memref<1x128xf32, #tpu.memory_space<vmem>>, %arg4: memref<32x128xf32, #tpu.memory_space<any>>, %arg5: memref<32x128xf32, #tpu.memory_space<any>>, %arg6: memref<1x128xf32, #tpu.memory_space<vmem>>, %arg7: memref<32x128xf32, #tpu.memory_space<any>>, %arg8: memref<32x128xf32, #tpu.memory_space<any>>, %arg9: memref<1x128xf32, #tpu.memory_space<vmem>>, %arg10: memref<32x128xf32, #tpu.memory_space<any>>, %arg11: memref<1x128xf32, #tpu.memory_space<vmem>>, %arg12: memref<8x128xf32, #tpu.memory_space<vmem>>, %arg13: memref<64x128xf32, #tpu.memory_space<vmem>>, %arg14: memref<64x32xf32, #tpu.memory_space<vmem>>, %arg15: memref<64x32xf32, #tpu.memory_space<vmem>>, %arg16: memref<32x128xf32, #tpu.memory_space<vmem>>, %arg17: memref<32x128xf32, #tpu.memory_space<vmem>>, %arg18: memref<32x128xf32, #tpu.memory_space<vmem>>, %arg19: memref<32x128xf32, #tpu.memory_space<vmem>>, %arg20: memref<32x128xf32, #tpu.memory_space<vmem>>, %arg21: memref<5x!tpu.dma_semaphore, #tpu.memory_space<semaphore_mem>>) attributes {dimension_semantics = [], scalar_prefetch = 0 : i64, scratch_operands = 9 : i64, tpu.core_type = #tpu.core_type<tc>} {
    %c0_i32 = arith.constant 0 : i32
    %0 = tpu.memref_slice %arg21[%c0_i32] : memref<5x!tpu.dma_semaphore, #tpu.memory_space<semaphore_mem>> -> memref<1x!tpu.dma_semaphore, #tpu.memory_space<semaphore_mem>>
    %1 = tpu.memref_squeeze %0 : memref<1x!tpu.dma_semaphore, #tpu.memory_space<semaphore_mem>> -> memref<!tpu.dma_semaphore, #tpu.memory_space<semaphore_mem>>
    tpu.enqueue_dma source(%arg4 : memref<32x128xf32, #tpu.memory_space<any>>) target(%arg16 : memref<32x128xf32, #tpu.memory_space<vmem>>) target_semaphore(%1 : memref<!tpu.dma_semaphore, #tpu.memory_space<semaphore_mem>>)
    %c1_i32 = arith.constant 1 : i32
    %2 = tpu.memref_slice %arg21[%c1_i32] : memref<5x!tpu.dma_semaphore, #tpu.memory_space<semaphore_mem>> -> memref<1x!tpu.dma_semaphore, #tpu.memory_space<semaphore_mem>>
    %3 = tpu.memref_squeeze %2 : memref<1x!tpu.dma_semaphore, #tpu.memory_space<semaphore_mem>> -> memref<!tpu.dma_semaphore, #tpu.memory_space<semaphore_mem>>
    tpu.enqueue_dma source(%arg5 : memref<32x128xf32, #tpu.memory_space<any>>) target(%arg17 : memref<32x128xf32, #tpu.memory_space<vmem>>) target_semaphore(%3 : memref<!tpu.dma_semaphore, #tpu.memory_space<semaphore_mem>>)
    %c2_i32 = arith.constant 2 : i32
    %4 = tpu.memref_slice %arg21[%c2_i32] : memref<5x!tpu.dma_semaphore, #tpu.memory_space<semaphore_mem>> -> memref<1x!tpu.dma_semaphore, #tpu.memory_space<semaphore_mem>>
    %5 = tpu.memref_squeeze %4 : memref<1x!tpu.dma_semaphore, #tpu.memory_space<semaphore_mem>> -> memref<!tpu.dma_semaphore, #tpu.memory_space<semaphore_mem>>
    tpu.enqueue_dma source(%arg7 : memref<32x128xf32, #tpu.memory_space<any>>) target(%arg18 : memref<32x128xf32, #tpu.memory_space<vmem>>) target_semaphore(%5 : memref<!tpu.dma_semaphore, #tpu.memory_space<semaphore_mem>>)
    %c3_i32 = arith.constant 3 : i32
    %6 = tpu.memref_slice %arg21[%c3_i32] : memref<5x!tpu.dma_semaphore, #tpu.memory_space<semaphore_mem>> -> memref<1x!tpu.dma_semaphore, #tpu.memory_space<semaphore_mem>>
    %7 = tpu.memref_squeeze %6 : memref<1x!tpu.dma_semaphore, #tpu.memory_space<semaphore_mem>> -> memref<!tpu.dma_semaphore, #tpu.memory_space<semaphore_mem>>
    tpu.enqueue_dma source(%arg8 : memref<32x128xf32, #tpu.memory_space<any>>) target(%arg19 : memref<32x128xf32, #tpu.memory_space<vmem>>) target_semaphore(%7 : memref<!tpu.dma_semaphore, #tpu.memory_space<semaphore_mem>>)
    %c4_i32 = arith.constant 4 : i32
    %8 = tpu.memref_slice %arg21[%c4_i32] : memref<5x!tpu.dma_semaphore, #tpu.memory_space<semaphore_mem>> -> memref<1x!tpu.dma_semaphore, #tpu.memory_space<semaphore_mem>>
    %9 = tpu.memref_squeeze %8 : memref<1x!tpu.dma_semaphore, #tpu.memory_space<semaphore_mem>> -> memref<!tpu.dma_semaphore, #tpu.memory_space<semaphore_mem>>
    tpu.enqueue_dma source(%arg10 : memref<32x128xf32, #tpu.memory_space<any>>) target(%arg20 : memref<32x128xf32, #tpu.memory_space<vmem>>) target_semaphore(%9 : memref<!tpu.dma_semaphore, #tpu.memory_space<semaphore_mem>>)
    %10 = tpu.iota {dimensions = array<i32: 1>} : vector<8x128xi32>
    %c64_i32 = arith.constant 64 : i32
    %11 = vector.broadcast %c64_i32 : i32 to vector<8x128xi32>
    %12 = arith.cmpi sge, %10, %11 : vector<8x128xi32>
    %c96_i32 = arith.constant 96 : i32
    %13 = vector.broadcast %c96_i32 : i32 to vector<8x128xi32>
    %14 = arith.cmpi slt, %10, %13 : vector<8x128xi32>
    %15 = arith.andi %12, %14 : vector<8x128xi1>
    %c0 = arith.constant 0 : index
    %c0_0 = arith.constant 0 : index
    %16 = vector.load %arg0[%c0, %c0_0] : memref<64x16xf32, #tpu.memory_space<vmem>>, vector<64x16xf32>
    %c0_1 = arith.constant 0 : index
    %c0_2 = arith.constant 0 : index
    %17 = vector.load %arg1[%c0_1, %c0_2] : memref<16x128xf32, #tpu.memory_space<vmem>>, vector<16x128xf32>
    %c0_3 = arith.constant 0 : index
    %c0_4 = arith.constant 0 : index
    %18 = vector.load %arg2[%c0_3, %c0_4] : memref<32x128xf32, #tpu.memory_space<vmem>>, vector<32x128xf32>
    %c0_5 = arith.constant 0 : index
    %c0_6 = arith.constant 0 : index
    %19 = vector.load %arg3[%c0_5, %c0_6] : memref<1x128xf32, #tpu.memory_space<vmem>>, vector<1x128xf32>
    %cst = arith.constant dense<0.000000e+00> : vector<64x128xf32>
    %20 = tpu.matmul %16, %17, %cst {dimension_numbers = #tpu.dot_dimension_numbers<[1], [0], [0], [1], [0, 0, 1, 1], [], []>, precision = #tpu.contract_precision<fp32>} : vector<64x16xf32>, vector<16x128xf32>, vector<64x128xf32> -> vector<64x128xf32>
    %21 = vector.broadcast %19 : vector<1x128xf32> to vector<64x128xf32>
    %22 = arith.addf %20, %21 : vector<64x128xf32>
    %c0_7 = arith.constant 0 : index
    %c0_8 = arith.constant 0 : index
    %23 = vector.load %arg13[%c0_7, %c0_8] : memref<64x128xf32, #tpu.memory_space<vmem>>, vector<64x128xf32>
    tpu.vector_store %arg13[%c0_7, %c0_8], %22 {strides = array<i32>} : memref<64x128xf32, #tpu.memory_space<vmem>>, vector<64x128xf32>,
    %cst_9 = arith.constant 0.000000e+00 : f32
    %24 = vector.broadcast %cst_9 : f32 to vector<8x32xf32>
    %c0_i32_10 = arith.constant 0 : i32
    %c8_i32 = arith.constant 8 : i32
    %25 = arith.muli %c0_i32_10, %c8_i32 : i32
    %26 = tpu.assume_multiple %25, 8 : i32
    %27 = arith.index_cast %26 : i32 to index
    %c0_11 = arith.constant 0 : index
    %28 = vector.load %arg13[%27, %c0_11] : memref<64x128xf32, #tpu.memory_space<vmem>>, vector<8x128xf32>
    %cst_12 = arith.constant dense<0.000000e+00> : vector<8x128xf32>
    %29 = tpu.matmul %24, %18, %cst_12 {dimension_numbers = #tpu.dot_dimension_numbers<[1], [0], [0], [1], [0, 0, 1, 1], [], []>, precision = #tpu.contract_precision<fp32>} : vector<8x32xf32>, vector<32x128xf32>, vector<8x128xf32> -> vector<8x128xf32>
    %30 = arith.addf %28, %29 : vector<8x128xf32>
    %31 = math.tanh %30 : vector<8x128xf32>
    %cst_13 = arith.constant 5.000000e-01 : f32
    %32 = vector.broadcast %cst_13 : f32 to vector<8x128xf32>
    %33 = arith.mulf %32, %30 : vector<8x128xf32>
    %34 = math.tanh %33 : vector<8x128xf32>
    %cst_14 = arith.constant 5.000000e-01 : f32
    %35 = vector.broadcast %cst_14 : f32 to vector<8x128xf32>
    %36 = arith.mulf %35, %34 : vector<8x128xf32>
    %cst_15 = arith.constant 5.000000e-01 : f32
    %37 = vector.broadcast %cst_15 : f32 to vector<8x128xf32>
    %38 = arith.addf %36, %37 : vector<8x128xf32>
    %39 = arith.select %15, %31, %38 : vector<8x128xi1>, vector<8x128xf32>
    %40 = vector.extract_strided_slice %39 {offsets = [0, 0], sizes = [8, 32], strides = [1, 1]} : vector<8x128xf32> to vector<8x32xf32>
    %41 = vector.extract_strided_slice %39 {offsets = [0, 32], sizes = [8, 32], strides = [1, 1]} : vector<8x128xf32> to vector<8x32xf32>
    %42 = vector.extract_strided_slice %39 {offsets = [0, 64], sizes = [8, 32], strides = [1, 1]} : vector<8x128xf32> to vector<8x32xf32>
    %43 = vector.extract_strided_slice %39 {offsets = [0, 96], sizes = [8, 32], strides = [1, 1]} : vector<8x128xf32> to vector<8x32xf32>
    %44 = arith.mulf %41, %24 : vector<8x32xf32>
    %45 = arith.mulf %40, %42 : vector<8x32xf32>
    %46 = arith.addf %44, %45 : vector<8x32xf32>
    %47 = math.tanh %46 : vector<8x32xf32>
    %48 = arith.mulf %43, %47 : vector<8x32xf32>
    %49 = arith.index_cast %26 : i32 to index
    %c0_16 = arith.constant 0 : index
    %50 = vector.load %arg14[%49, %c0_16] : memref<64x32xf32, #tpu.memory_space<vmem>>, vector<8x32xf32>
    tpu.vector_store %arg14[%49, %c0_16], %48 {strides = array<i32>} : memref<64x32xf32, #tpu.memory_space<vmem>>, vector<8x32xf32>,
    %c1_i32_17 = arith.constant 1 : i32
    %c8_i32_18 = arith.constant 8 : i32
    %51 = arith.muli %c1_i32_17, %c8_i32_18 : i32
    %52 = tpu.assume_multiple %51, 8 : i32
    %53 = arith.index_cast %52 : i32 to index
    %c0_19 = arith.constant 0 : index
    %54 = vector.load %arg13[%53, %c0_19] : memref<64x128xf32, #tpu.memory_space<vmem>>, vector<8x128xf32>
    %cst_20 = arith.constant dense<0.000000e+00> : vector<8x128xf32>
    %55 = tpu.matmul %48, %18, %cst_20 {dimension_numbers = #tpu.dot_dimension_numbers<[1], [0], [0], [1], [0, 0, 1, 1], [], []>, precision = #tpu.contract_precision<fp32>} : vector<8x32xf32>, vector<32x128xf32>, vector<8x128xf32> -> vector<8x128xf32>
    %56 = arith.addf %54, %55 : vector<8x128xf32>
    %57 = math.tanh %56 : vector<8x128xf32>
    %cst_21 = arith.constant 5.000000e-01 : f32
    %58 = vector.broadcast %cst_21 : f32 to vector<8x128xf32>
    %59 = arith.mulf %58, %56 : vector<8x128xf32>
    %60 = math.tanh %59 : vector<8x128xf32>
    %cst_22 = arith.constant 5.000000e-01 : f32
    %61 = vector.broadcast %cst_22 : f32 to vector<8x128xf32>
    %62 = arith.mulf %61, %60 : vector<8x128xf32>
    %cst_23 = arith.constant 5.000000e-01 : f32
    %63 = vector.broadcast %cst_23 : f32 to vector<8x128xf32>
    %64 = arith.addf %62, %63 : vector<8x128xf32>
    %65 = arith.select %15, %57, %64 : vector<8x128xi1>, vector<8x128xf32>
    %66 = vector.extract_strided_slice %65 {offsets = [0, 0], sizes = [8, 32], strides = [1, 1]} : vector<8x128xf32> to vector<8x32xf32>
    %67 = vector.extract_strided_slice %65 {offsets = [0, 32], sizes = [8, 32], strides = [1, 1]} : vector<8x128xf32> to vector<8x32xf32>
    %68 = vector.extract_strided_slice %65 {offsets = [0, 64], sizes = [8, 32], strides = [1, 1]} : vector<8x128xf32> to vector<8x32xf32>
    %69 = vector.extract_strided_slice %65 {offsets = [0, 96], sizes = [8, 32], strides = [1, 1]} : vector<8x128xf32> to vector<8x32xf32>
    %70 = arith.mulf %67, %46 : vector<8x32xf32>
    %71 = arith.mulf %66, %68 : vector<8x32xf32>
    %72 = arith.addf %70, %71 : vector<8x32xf32>
    %73 = math.tanh %72 : vector<8x32xf32>
    %74 = arith.mulf %69, %73 : vector<8x32xf32>
    %75 = arith.index_cast %52 : i32 to index
    %c0_24 = arith.constant 0 : index
    %76 = vector.load %arg14[%75, %c0_24] : memref<64x32xf32, #tpu.memory_space<vmem>>, vector<8x32xf32>
    tpu.vector_store %arg14[%75, %c0_24], %74 {strides = array<i32>} : memref<64x32xf32, #tpu.memory_space<vmem>>, vector<8x32xf32>,
    %c2_i32_25 = arith.constant 2 : i32
    %c8_i32_26 = arith.constant 8 : i32
    %77 = arith.muli %c2_i32_25, %c8_i32_26 : i32
    %78 = tpu.assume_multiple %77, 8 : i32
    %79 = arith.index_cast %78 : i32 to index
    %c0_27 = arith.constant 0 : index
    %80 = vector.load %arg13[%79, %c0_27] : memref<64x128xf32, #tpu.memory_space<vmem>>, vector<8x128xf32>
    %cst_28 = arith.constant dense<0.000000e+00> : vector<8x128xf32>
    %81 = tpu.matmul %74, %18, %cst_28 {dimension_numbers = #tpu.dot_dimension_numbers<[1], [0], [0], [1], [0, 0, 1, 1], [], []>, precision = #tpu.contract_precision<fp32>} : vector<8x32xf32>, vector<32x128xf32>, vector<8x128xf32> -> vector<8x128xf32>
    %82 = arith.addf %80, %81 : vector<8x128xf32>
    %83 = math.tanh %82 : vector<8x128xf32>
    %cst_29 = arith.constant 5.000000e-01 : f32
    %84 = vector.broadcast %cst_29 : f32 to vector<8x128xf32>
    %85 = arith.mulf %84, %82 : vector<8x128xf32>
    %86 = math.tanh %85 : vector<8x128xf32>
    %cst_30 = arith.constant 5.000000e-01 : f32
    %87 = vector.broadcast %cst_30 : f32 to vector<8x128xf32>
    %88 = arith.mulf %87, %86 : vector<8x128xf32>
    %cst_31 = arith.constant 5.000000e-01 : f32
    %89 = vector.broadcast %cst_31 : f32 to vector<8x128xf32>
    %90 = arith.addf %88, %89 : vector<8x128xf32>
    %91 = arith.select %15, %83, %90 : vector<8x128xi1>, vector<8x128xf32>
    %92 = vector.extract_strided_slice %91 {offsets = [0, 0], sizes = [8, 32], strides = [1, 1]} : vector<8x128xf32> to vector<8x32xf32>
    %93 = vector.extract_strided_slice %91 {offsets = [0, 32], sizes = [8, 32], strides = [1, 1]} : vector<8x128xf32> to vector<8x32xf32>
    %94 = vector.extract_strided_slice %91 {offsets = [0, 64], sizes = [8, 32], strides = [1, 1]} : vector<8x128xf32> to vector<8x32xf32>
    %95 = vector.extract_strided_slice %91 {offsets = [0, 96], sizes = [8, 32], strides = [1, 1]} : vector<8x128xf32> to vector<8x32xf32>
    %96 = arith.mulf %93, %72 : vector<8x32xf32>
    %97 = arith.mulf %92, %94 : vector<8x32xf32>
    %98 = arith.addf %96, %97 : vector<8x32xf32>
    %99 = math.tanh %98 : vector<8x32xf32>
    %100 = arith.mulf %95, %99 : vector<8x32xf32>
    %101 = arith.index_cast %78 : i32 to index
    %c0_32 = arith.constant 0 : index
    %102 = vector.load %arg14[%101, %c0_32] : memref<64x32xf32, #tpu.memory_space<vmem>>, vector<8x32xf32>
    tpu.vector_store %arg14[%101, %c0_32], %100 {strides = array<i32>} : memref<64x32xf32, #tpu.memory_space<vmem>>, vector<8x32xf32>,
    %c3_i32_33 = arith.constant 3 : i32
    %c8_i32_34 = arith.constant 8 : i32
    %103 = arith.muli %c3_i32_33, %c8_i32_34 : i32
    %104 = tpu.assume_multiple %103, 8 : i32
    %105 = arith.index_cast %104 : i32 to index
    %c0_35 = arith.constant 0 : index
    %106 = vector.load %arg13[%105, %c0_35] : memref<64x128xf32, #tpu.memory_space<vmem>>, vector<8x128xf32>
    %cst_36 = arith.constant dense<0.000000e+00> : vector<8x128xf32>
    %107 = tpu.matmul %100, %18, %cst_36 {dimension_numbers = #tpu.dot_dimension_numbers<[1], [0], [0], [1], [0, 0, 1, 1], [], []>, precision = #tpu.contract_precision<fp32>} : vector<8x32xf32>, vector<32x128xf32>, vector<8x128xf32> -> vector<8x128xf32>
    %108 = arith.addf %106, %107 : vector<8x128xf32>
    %109 = math.tanh %108 : vector<8x128xf32>
    %cst_37 = arith.constant 5.000000e-01 : f32
    %110 = vector.broadcast %cst_37 : f32 to vector<8x128xf32>
    %111 = arith.mulf %110, %108 : vector<8x128xf32>
    %112 = math.tanh %111 : vector<8x128xf32>
    %cst_38 = arith.constant 5.000000e-01 : f32
    %113 = vector.broadcast %cst_38 : f32 to vector<8x128xf32>
    %114 = arith.mulf %113, %112 : vector<8x128xf32>
    %cst_39 = arith.constant 5.000000e-01 : f32
    %115 = vector.broadcast %cst_39 : f32 to vector<8x128xf32>
    %116 = arith.addf %114, %115 : vector<8x128xf32>
    %117 = arith.select %15, %109, %116 : vector<8x128xi1>, vector<8x128xf32>
    %118 = vector.extract_strided_slice %117 {offsets = [0, 0], sizes = [8, 32], strides = [1, 1]} : vector<8x128xf32> to vector<8x32xf32>
    %119 = vector.extract_strided_slice %117 {offsets = [0, 32], sizes = [8, 32], strides = [1, 1]} : vector<8x128xf32> to vector<8x32xf32>
    %120 = vector.extract_strided_slice %117 {offsets = [0, 64], sizes = [8, 32], strides = [1, 1]} : vector<8x128xf32> to vector<8x32xf32>
    %121 = vector.extract_strided_slice %117 {offsets = [0, 96], sizes = [8, 32], strides = [1, 1]} : vector<8x128xf32> to vector<8x32xf32>
    %122 = arith.mulf %119, %98 : vector<8x32xf32>
    %123 = arith.mulf %118, %120 : vector<8x32xf32>
    %124 = arith.addf %122, %123 : vector<8x32xf32>
    %125 = math.tanh %124 : vector<8x32xf32>
    %126 = arith.mulf %121, %125 : vector<8x32xf32>
    %127 = arith.index_cast %104 : i32 to index
    %c0_40 = arith.constant 0 : index
    %128 = vector.load %arg14[%127, %c0_40] : memref<64x32xf32, #tpu.memory_space<vmem>>, vector<8x32xf32>
    tpu.vector_store %arg14[%127, %c0_40], %126 {strides = array<i32>} : memref<64x32xf32, #tpu.memory_space<vmem>>, vector<8x32xf32>,
    %c4_i32_41 = arith.constant 4 : i32
    %c8_i32_42 = arith.constant 8 : i32
    %129 = arith.muli %c4_i32_41, %c8_i32_42 : i32
    %130 = tpu.assume_multiple %129, 8 : i32
    %131 = arith.index_cast %130 : i32 to index
    %c0_43 = arith.constant 0 : index
    %132 = vector.load %arg13[%131, %c0_43] : memref<64x128xf32, #tpu.memory_space<vmem>>, vector<8x128xf32>
    %cst_44 = arith.constant dense<0.000000e+00> : vector<8x128xf32>
    %133 = tpu.matmul %126, %18, %cst_44 {dimension_numbers = #tpu.dot_dimension_numbers<[1], [0], [0], [1], [0, 0, 1, 1], [], []>, precision = #tpu.contract_precision<fp32>} : vector<8x32xf32>, vector<32x128xf32>, vector<8x128xf32> -> vector<8x128xf32>
    %134 = arith.addf %132, %133 : vector<8x128xf32>
    %135 = math.tanh %134 : vector<8x128xf32>
    %cst_45 = arith.constant 5.000000e-01 : f32
    %136 = vector.broadcast %cst_45 : f32 to vector<8x128xf32>
    %137 = arith.mulf %136, %134 : vector<8x128xf32>
    %138 = math.tanh %137 : vector<8x128xf32>
    %cst_46 = arith.constant 5.000000e-01 : f32
    %139 = vector.broadcast %cst_46 : f32 to vector<8x128xf32>
    %140 = arith.mulf %139, %138 : vector<8x128xf32>
    %cst_47 = arith.constant 5.000000e-01 : f32
    %141 = vector.broadcast %cst_47 : f32 to vector<8x128xf32>
    %142 = arith.addf %140, %141 : vector<8x128xf32>
    %143 = arith.select %15, %135, %142 : vector<8x128xi1>, vector<8x128xf32>
    %144 = vector.extract_strided_slice %143 {offsets = [0, 0], sizes = [8, 32], strides = [1, 1]} : vector<8x128xf32> to vector<8x32xf32>
    %145 = vector.extract_strided_slice %143 {offsets = [0, 32], sizes = [8, 32], strides = [1, 1]} : vector<8x128xf32> to vector<8x32xf32>
    %146 = vector.extract_strided_slice %143 {offsets = [0, 64], sizes = [8, 32], strides = [1, 1]} : vector<8x128xf32> to vector<8x32xf32>
    %147 = vector.extract_strided_slice %143 {offsets = [0, 96], sizes = [8, 32], strides = [1, 1]} : vector<8x128xf32> to vector<8x32xf32>
    %148 = arith.mulf %145, %124 : vector<8x32xf32>
    %149 = arith.mulf %144, %146 : vector<8x32xf32>
    %150 = arith.addf %148, %149 : vector<8x32xf32>
    %151 = math.tanh %150 : vector<8x32xf32>
    %152 = arith.mulf %147, %151 : vector<8x32xf32>
    %153 = arith.index_cast %130 : i32 to index
    %c0_48 = arith.constant 0 : index
    %154 = vector.load %arg14[%153, %c0_48] : memref<64x32xf32, #tpu.memory_space<vmem>>, vector<8x32xf32>
    tpu.vector_store %arg14[%153, %c0_48], %152 {strides = array<i32>} : memref<64x32xf32, #tpu.memory_space<vmem>>, vector<8x32xf32>,
    %c5_i32 = arith.constant 5 : i32
    %c8_i32_49 = arith.constant 8 : i32
    %155 = arith.muli %c5_i32, %c8_i32_49 : i32
    %156 = tpu.assume_multiple %155, 8 : i32
    %157 = arith.index_cast %156 : i32 to index
    %c0_50 = arith.constant 0 : index
    %158 = vector.load %arg13[%157, %c0_50] : memref<64x128xf32, #tpu.memory_space<vmem>>, vector<8x128xf32>
    %cst_51 = arith.constant dense<0.000000e+00> : vector<8x128xf32>
    %159 = tpu.matmul %152, %18, %cst_51 {dimension_numbers = #tpu.dot_dimension_numbers<[1], [0], [0], [1], [0, 0, 1, 1], [], []>, precision = #tpu.contract_precision<fp32>} : vector<8x32xf32>, vector<32x128xf32>, vector<8x128xf32> -> vector<8x128xf32>
    %160 = arith.addf %158, %159 : vector<8x128xf32>
    %161 = math.tanh %160 : vector<8x128xf32>
    %cst_52 = arith.constant 5.000000e-01 : f32
    %162 = vector.broadcast %cst_52 : f32 to vector<8x128xf32>
    %163 = arith.mulf %162, %160 : vector<8x128xf32>
    %164 = math.tanh %163 : vector<8x128xf32>
    %cst_53 = arith.constant 5.000000e-01 : f32
    %165 = vector.broadcast %cst_53 : f32 to vector<8x128xf32>
    %166 = arith.mulf %165, %164 : vector<8x128xf32>
    %cst_54 = arith.constant 5.000000e-01 : f32
    %167 = vector.broadcast %cst_54 : f32 to vector<8x128xf32>
    %168 = arith.addf %166, %167 : vector<8x128xf32>
    %169 = arith.select %15, %161, %168 : vector<8x128xi1>, vector<8x128xf32>
    %170 = vector.extract_strided_slice %169 {offsets = [0, 0], sizes = [8, 32], strides = [1, 1]} : vector<8x128xf32> to vector<8x32xf32>
    %171 = vector.extract_strided_slice %169 {offsets = [0, 32], sizes = [8, 32], strides = [1, 1]} : vector<8x128xf32> to vector<8x32xf32>
    %172 = vector.extract_strided_slice %169 {offsets = [0, 64], sizes = [8, 32], strides = [1, 1]} : vector<8x128xf32> to vector<8x32xf32>
    %173 = vector.extract_strided_slice %169 {offsets = [0, 96], sizes = [8, 32], strides = [1, 1]} : vector<8x128xf32> to vector<8x32xf32>
    %174 = arith.mulf %171, %150 : vector<8x32xf32>
    %175 = arith.mulf %170, %172 : vector<8x32xf32>
    %176 = arith.addf %174, %175 : vector<8x32xf32>
    %177 = math.tanh %176 : vector<8x32xf32>
    %178 = arith.mulf %173, %177 : vector<8x32xf32>
    %179 = arith.index_cast %156 : i32 to index
    %c0_55 = arith.constant 0 : index
    %180 = vector.load %arg14[%179, %c0_55] : memref<64x32xf32, #tpu.memory_space<vmem>>, vector<8x32xf32>
    tpu.vector_store %arg14[%179, %c0_55], %178 {strides = array<i32>} : memref<64x32xf32, #tpu.memory_space<vmem>>, vector<8x32xf32>,
    %c6_i32 = arith.constant 6 : i32
    %c8_i32_56 = arith.constant 8 : i32
    %181 = arith.muli %c6_i32, %c8_i32_56 : i32
    %182 = tpu.assume_multiple %181, 8 : i32
    %183 = arith.index_cast %182 : i32 to index
    %c0_57 = arith.constant 0 : index
    %184 = vector.load %arg13[%183, %c0_57] : memref<64x128xf32, #tpu.memory_space<vmem>>, vector<8x128xf32>
    %cst_58 = arith.constant dense<0.000000e+00> : vector<8x128xf32>
    %185 = tpu.matmul %178, %18, %cst_58 {dimension_numbers = #tpu.dot_dimension_numbers<[1], [0], [0], [1], [0, 0, 1, 1], [], []>, precision = #tpu.contract_precision<fp32>} : vector<8x32xf32>, vector<32x128xf32>, vector<8x128xf32> -> vector<8x128xf32>
    %186 = arith.addf %184, %185 : vector<8x128xf32>
    %187 = math.tanh %186 : vector<8x128xf32>
    %cst_59 = arith.constant 5.000000e-01 : f32
    %188 = vector.broadcast %cst_59 : f32 to vector<8x128xf32>
    %189 = arith.mulf %188, %186 : vector<8x128xf32>
    %190 = math.tanh %189 : vector<8x128xf32>
    %cst_60 = arith.constant 5.000000e-01 : f32
    %191 = vector.broadcast %cst_60 : f32 to vector<8x128xf32>
    %192 = arith.mulf %191, %190 : vector<8x128xf32>
    %cst_61 = arith.constant 5.000000e-01 : f32
    %193 = vector.broadcast %cst_61 : f32 to vector<8x128xf32>
    %194 = arith.addf %192, %193 : vector<8x128xf32>
    %195 = arith.select %15, %187, %194 : vector<8x128xi1>, vector<8x128xf32>
    %196 = vector.extract_strided_slice %195 {offsets = [0, 0], sizes = [8, 32], strides = [1, 1]} : vector<8x128xf32> to vector<8x32xf32>
    %197 = vector.extract_strided_slice %195 {offsets = [0, 32], sizes = [8, 32], strides = [1, 1]} : vector<8x128xf32> to vector<8x32xf32>
    %198 = vector.extract_strided_slice %195 {offsets = [0, 64], sizes = [8, 32], strides = [1, 1]} : vector<8x128xf32> to vector<8x32xf32>
    %199 = vector.extract_strided_slice %195 {offsets = [0, 96], sizes = [8, 32], strides = [1, 1]} : vector<8x128xf32> to vector<8x32xf32>
    %200 = arith.mulf %197, %176 : vector<8x32xf32>
    %201 = arith.mulf %196, %198 : vector<8x32xf32>
    %202 = arith.addf %200, %201 : vector<8x32xf32>
    %203 = math.tanh %202 : vector<8x32xf32>
    %204 = arith.mulf %199, %203 : vector<8x32xf32>
    %205 = arith.index_cast %182 : i32 to index
    %c0_62 = arith.constant 0 : index
    %206 = vector.load %arg14[%205, %c0_62] : memref<64x32xf32, #tpu.memory_space<vmem>>, vector<8x32xf32>
    tpu.vector_store %arg14[%205, %c0_62], %204 {strides = array<i32>} : memref<64x32xf32, #tpu.memory_space<vmem>>, vector<8x32xf32>,
    %c7_i32 = arith.constant 7 : i32
    %c8_i32_63 = arith.constant 8 : i32
    %207 = arith.muli %c7_i32, %c8_i32_63 : i32
    %208 = tpu.assume_multiple %207, 8 : i32
    %209 = arith.index_cast %208 : i32 to index
    %c0_64 = arith.constant 0 : index
    %210 = vector.load %arg13[%209, %c0_64] : memref<64x128xf32, #tpu.memory_space<vmem>>, vector<8x128xf32>
    %cst_65 = arith.constant dense<0.000000e+00> : vector<8x128xf32>
    %211 = tpu.matmul %204, %18, %cst_65 {dimension_numbers = #tpu.dot_dimension_numbers<[1], [0], [0], [1], [0, 0, 1, 1], [], []>, precision = #tpu.contract_precision<fp32>} : vector<8x32xf32>, vector<32x128xf32>, vector<8x128xf32> -> vector<8x128xf32>
    %212 = arith.addf %210, %211 : vector<8x128xf32>
    %213 = math.tanh %212 : vector<8x128xf32>
    %cst_66 = arith.constant 5.000000e-01 : f32
    %214 = vector.broadcast %cst_66 : f32 to vector<8x128xf32>
    %215 = arith.mulf %214, %212 : vector<8x128xf32>
    %216 = math.tanh %215 : vector<8x128xf32>
    %cst_67 = arith.constant 5.000000e-01 : f32
    %217 = vector.broadcast %cst_67 : f32 to vector<8x128xf32>
    %218 = arith.mulf %217, %216 : vector<8x128xf32>
    %cst_68 = arith.constant 5.000000e-01 : f32
    %219 = vector.broadcast %cst_68 : f32 to vector<8x128xf32>
    %220 = arith.addf %218, %219 : vector<8x128xf32>
    %221 = arith.select %15, %213, %220 : vector<8x128xi1>, vector<8x128xf32>
    %222 = vector.extract_strided_slice %221 {offsets = [0, 0], sizes = [8, 32], strides = [1, 1]} : vector<8x128xf32> to vector<8x32xf32>
    %223 = vector.extract_strided_slice %221 {offsets = [0, 32], sizes = [8, 32], strides = [1, 1]} : vector<8x128xf32> to vector<8x32xf32>
    %224 = vector.extract_strided_slice %221 {offsets = [0, 64], sizes = [8, 32], strides = [1, 1]} : vector<8x128xf32> to vector<8x32xf32>
    %225 = vector.extract_strided_slice %221 {offsets = [0, 96], sizes = [8, 32], strides = [1, 1]} : vector<8x128xf32> to vector<8x32xf32>
    %226 = arith.mulf %223, %202 : vector<8x32xf32>
    %227 = arith.mulf %222, %224 : vector<8x32xf32>
    %228 = arith.addf %226, %227 : vector<8x32xf32>
    %229 = math.tanh %228 : vector<8x32xf32>
    %230 = arith.mulf %225, %229 : vector<8x32xf32>
    %231 = arith.index_cast %208 : i32 to index
    %c0_69 = arith.constant 0 : index
    %232 = vector.load %arg14[%231, %c0_69] : memref<64x32xf32, #tpu.memory_space<vmem>>, vector<8x32xf32>
    tpu.vector_store %arg14[%231, %c0_69], %230 {strides = array<i32>} : memref<64x32xf32, #tpu.memory_space<vmem>>, vector<8x32xf32>,
    %c8_i32_70 = arith.constant 8 : i32
    %c0_i32_71 = arith.constant 0 : i32
    %233 = tpu.memref_slice %arg21[%c0_i32_71] : memref<5x!tpu.dma_semaphore, #tpu.memory_space<semaphore_mem>> -> memref<1x!tpu.dma_semaphore, #tpu.memory_space<semaphore_mem>>
    %234 = tpu.memref_squeeze %233 : memref<1x!tpu.dma_semaphore, #tpu.memory_space<semaphore_mem>> -> memref<!tpu.dma_semaphore, #tpu.memory_space<semaphore_mem>>
    tpu.wait_dma2 semaphore(%234 : memref<!tpu.dma_semaphore, #tpu.memory_space<semaphore_mem>>) src(%arg4 : memref<32x128xf32, #tpu.memory_space<any>>) dst(%arg16 : memref<32x128xf32, #tpu.memory_space<vmem>>)
    %c1_i32_72 = arith.constant 1 : i32
    %235 = tpu.memref_slice %arg21[%c1_i32_72] : memref<5x!tpu.dma_semaphore, #tpu.memory_space<semaphore_mem>> -> memref<1x!tpu.dma_semaphore, #tpu.memory_space<semaphore_mem>>
    %236 = tpu.memref_squeeze %235 : memref<1x!tpu.dma_semaphore, #tpu.memory_space<semaphore_mem>> -> memref<!tpu.dma_semaphore, #tpu.memory_space<semaphore_mem>>
    tpu.wait_dma2 semaphore(%236 : memref<!tpu.dma_semaphore, #tpu.memory_space<semaphore_mem>>) src(%arg5 : memref<32x128xf32, #tpu.memory_space<any>>) dst(%arg17 : memref<32x128xf32, #tpu.memory_space<vmem>>)
    %c0_73 = arith.constant 0 : index
    %c0_74 = arith.constant 0 : index
    %237 = vector.load %arg14[%c0_73, %c0_74] : memref<64x32xf32, #tpu.memory_space<vmem>>, vector<64x32xf32>
    %c0_75 = arith.constant 0 : index
    %c0_76 = arith.constant 0 : index
    %238 = vector.load %arg16[%c0_75, %c0_76] : memref<32x128xf32, #tpu.memory_space<vmem>>, vector<32x128xf32>
    %c0_77 = arith.constant 0 : index
    %c0_78 = arith.constant 0 : index
    %239 = vector.load %arg17[%c0_77, %c0_78] : memref<32x128xf32, #tpu.memory_space<vmem>>, vector<32x128xf32>
    %c0_79 = arith.constant 0 : index
    %c0_80 = arith.constant 0 : index
    %240 = vector.load %arg6[%c0_79, %c0_80] : memref<1x128xf32, #tpu.memory_space<vmem>>, vector<1x128xf32>
    %cst_81 = arith.constant dense<0.000000e+00> : vector<64x128xf32>
    %241 = tpu.matmul %237, %238, %cst_81 {dimension_numbers = #tpu.dot_dimension_numbers<[1], [0], [0], [1], [0, 0, 1, 1], [], []>, precision = #tpu.contract_precision<fp32>} : vector<64x32xf32>, vector<32x128xf32>, vector<64x128xf32> -> vector<64x128xf32>
    %242 = vector.broadcast %240 : vector<1x128xf32> to vector<64x128xf32>
    %243 = arith.addf %241, %242 : vector<64x128xf32>
    %c0_82 = arith.constant 0 : index
    %c0_83 = arith.constant 0 : index
    %244 = vector.load %arg13[%c0_82, %c0_83] : memref<64x128xf32, #tpu.memory_space<vmem>>, vector<64x128xf32>
    tpu.vector_store %arg13[%c0_82, %c0_83], %243 {strides = array<i32>} : memref<64x128xf32, #tpu.memory_space<vmem>>, vector<64x128xf32>,
    %cst_84 = arith.constant 0.000000e+00 : f32
    %245 = vector.broadcast %cst_84 : f32 to vector<8x32xf32>
    %c0_i32_85 = arith.constant 0 : i32
    %c8_i32_86 = arith.constant 8 : i32
    %246 = arith.muli %c0_i32_85, %c8_i32_86 : i32
    %247 = tpu.assume_multiple %246, 8 : i32
    %248 = arith.index_cast %247 : i32 to index
    %c0_87 = arith.constant 0 : index
    %249 = vector.load %arg13[%248, %c0_87] : memref<64x128xf32, #tpu.memory_space<vmem>>, vector<8x128xf32>
    %cst_88 = arith.constant dense<0.000000e+00> : vector<8x128xf32>
    %250 = tpu.matmul %245, %239, %cst_88 {dimension_numbers = #tpu.dot_dimension_numbers<[1], [0], [0], [1], [0, 0, 1, 1], [], []>, precision = #tpu.contract_precision<fp32>} : vector<8x32xf32>, vector<32x128xf32>, vector<8x128xf32> -> vector<8x128xf32>
    %251 = arith.addf %249, %250 : vector<8x128xf32>
    %252 = math.tanh %251 : vector<8x128xf32>
    %cst_89 = arith.constant 5.000000e-01 : f32
    %253 = vector.broadcast %cst_89 : f32 to vector<8x128xf32>
    %254 = arith.mulf %253, %251 : vector<8x128xf32>
    %255 = math.tanh %254 : vector<8x128xf32>
    %cst_90 = arith.constant 5.000000e-01 : f32
    %256 = vector.broadcast %cst_90 : f32 to vector<8x128xf32>
    %257 = arith.mulf %256, %255 : vector<8x128xf32>
    %cst_91 = arith.constant 5.000000e-01 : f32
    %258 = vector.broadcast %cst_91 : f32 to vector<8x128xf32>
    %259 = arith.addf %257, %258 : vector<8x128xf32>
    %260 = arith.select %15, %252, %259 : vector<8x128xi1>, vector<8x128xf32>
    %261 = vector.extract_strided_slice %260 {offsets = [0, 0], sizes = [8, 32], strides = [1, 1]} : vector<8x128xf32> to vector<8x32xf32>
    %262 = vector.extract_strided_slice %260 {offsets = [0, 32], sizes = [8, 32], strides = [1, 1]} : vector<8x128xf32> to vector<8x32xf32>
    %263 = vector.extract_strided_slice %260 {offsets = [0, 64], sizes = [8, 32], strides = [1, 1]} : vector<8x128xf32> to vector<8x32xf32>
    %264 = vector.extract_strided_slice %260 {offsets = [0, 96], sizes = [8, 32], strides = [1, 1]} : vector<8x128xf32> to vector<8x32xf32>
    %265 = arith.mulf %262, %245 : vector<8x32xf32>
    %266 = arith.mulf %261, %263 : vector<8x32xf32>
    %267 = arith.addf %265, %266 : vector<8x32xf32>
    %268 = math.tanh %267 : vector<8x32xf32>
    %269 = arith.mulf %264, %268 : vector<8x32xf32>
    %270 = arith.index_cast %247 : i32 to index
    %c0_92 = arith.constant 0 : index
    %271 = vector.load %arg15[%270, %c0_92] : memref<64x32xf32, #tpu.memory_space<vmem>>, vector<8x32xf32>
    tpu.vector_store %arg15[%270, %c0_92], %269 {strides = array<i32>} : memref<64x32xf32, #tpu.memory_space<vmem>>, vector<8x32xf32>,
    %c1_i32_93 = arith.constant 1 : i32
    %c8_i32_94 = arith.constant 8 : i32
    %272 = arith.muli %c1_i32_93, %c8_i32_94 : i32
    %273 = tpu.assume_multiple %272, 8 : i32
    %274 = arith.index_cast %273 : i32 to index
    %c0_95 = arith.constant 0 : index
    %275 = vector.load %arg13[%274, %c0_95] : memref<64x128xf32, #tpu.memory_space<vmem>>, vector<8x128xf32>
    %cst_96 = arith.constant dense<0.000000e+00> : vector<8x128xf32>
    %276 = tpu.matmul %269, %239, %cst_96 {dimension_numbers = #tpu.dot_dimension_numbers<[1], [0], [0], [1], [0, 0, 1, 1], [], []>, precision = #tpu.contract_precision<fp32>} : vector<8x32xf32>, vector<32x128xf32>, vector<8x128xf32> -> vector<8x128xf32>
    %277 = arith.addf %275, %276 : vector<8x128xf32>
    %278 = math.tanh %277 : vector<8x128xf32>
    %cst_97 = arith.constant 5.000000e-01 : f32
    %279 = vector.broadcast %cst_97 : f32 to vector<8x128xf32>
    %280 = arith.mulf %279, %277 : vector<8x128xf32>
    %281 = math.tanh %280 : vector<8x128xf32>
    %cst_98 = arith.constant 5.000000e-01 : f32
    %282 = vector.broadcast %cst_98 : f32 to vector<8x128xf32>
    %283 = arith.mulf %282, %281 : vector<8x128xf32>
    %cst_99 = arith.constant 5.000000e-01 : f32
    %284 = vector.broadcast %cst_99 : f32 to vector<8x128xf32>
    %285 = arith.addf %283, %284 : vector<8x128xf32>
    %286 = arith.select %15, %278, %285 : vector<8x128xi1>, vector<8x128xf32>
    %287 = vector.extract_strided_slice %286 {offsets = [0, 0], sizes = [8, 32], strides = [1, 1]} : vector<8x128xf32> to vector<8x32xf32>
    %288 = vector.extract_strided_slice %286 {offsets = [0, 32], sizes = [8, 32], strides = [1, 1]} : vector<8x128xf32> to vector<8x32xf32>
    %289 = vector.extract_strided_slice %286 {offsets = [0, 64], sizes = [8, 32], strides = [1, 1]} : vector<8x128xf32> to vector<8x32xf32>
    %290 = vector.extract_strided_slice %286 {offsets = [0, 96], sizes = [8, 32], strides = [1, 1]} : vector<8x128xf32> to vector<8x32xf32>
    %291 = arith.mulf %288, %267 : vector<8x32xf32>
    %292 = arith.mulf %287, %289 : vector<8x32xf32>
    %293 = arith.addf %291, %292 : vector<8x32xf32>
    %294 = math.tanh %293 : vector<8x32xf32>
    %295 = arith.mulf %290, %294 : vector<8x32xf32>
    %296 = arith.index_cast %273 : i32 to index
    %c0_100 = arith.constant 0 : index
    %297 = vector.load %arg15[%296, %c0_100] : memref<64x32xf32, #tpu.memory_space<vmem>>, vector<8x32xf32>
    tpu.vector_store %arg15[%296, %c0_100], %295 {strides = array<i32>} : memref<64x32xf32, #tpu.memory_space<vmem>>, vector<8x32xf32>,
    %c2_i32_101 = arith.constant 2 : i32
    %c8_i32_102 = arith.constant 8 : i32
    %298 = arith.muli %c2_i32_101, %c8_i32_102 : i32
    %299 = tpu.assume_multiple %298, 8 : i32
    %300 = arith.index_cast %299 : i32 to index
    %c0_103 = arith.constant 0 : index
    %301 = vector.load %arg13[%300, %c0_103] : memref<64x128xf32, #tpu.memory_space<vmem>>, vector<8x128xf32>
    %cst_104 = arith.constant dense<0.000000e+00> : vector<8x128xf32>
    %302 = tpu.matmul %295, %239, %cst_104 {dimension_numbers = #tpu.dot_dimension_numbers<[1], [0], [0], [1], [0, 0, 1, 1], [], []>, precision = #tpu.contract_precision<fp32>} : vector<8x32xf32>, vector<32x128xf32>, vector<8x128xf32> -> vector<8x128xf32>
    %303 = arith.addf %301, %302 : vector<8x128xf32>
    %304 = math.tanh %303 : vector<8x128xf32>
    %cst_105 = arith.constant 5.000000e-01 : f32
    %305 = vector.broadcast %cst_105 : f32 to vector<8x128xf32>
    %306 = arith.mulf %305, %303 : vector<8x128xf32>
    %307 = math.tanh %306 : vector<8x128xf32>
    %cst_106 = arith.constant 5.000000e-01 : f32
    %308 = vector.broadcast %cst_106 : f32 to vector<8x128xf32>
    %309 = arith.mulf %308, %307 : vector<8x128xf32>
    %cst_107 = arith.constant 5.000000e-01 : f32
    %310 = vector.broadcast %cst_107 : f32 to vector<8x128xf32>
    %311 = arith.addf %309, %310 : vector<8x128xf32>
    %312 = arith.select %15, %304, %311 : vector<8x128xi1>, vector<8x128xf32>
    %313 = vector.extract_strided_slice %312 {offsets = [0, 0], sizes = [8, 32], strides = [1, 1]} : vector<8x128xf32> to vector<8x32xf32>
    %314 = vector.extract_strided_slice %312 {offsets = [0, 32], sizes = [8, 32], strides = [1, 1]} : vector<8x128xf32> to vector<8x32xf32>
    %315 = vector.extract_strided_slice %312 {offsets = [0, 64], sizes = [8, 32], strides = [1, 1]} : vector<8x128xf32> to vector<8x32xf32>
    %316 = vector.extract_strided_slice %312 {offsets = [0, 96], sizes = [8, 32], strides = [1, 1]} : vector<8x128xf32> to vector<8x32xf32>
    %317 = arith.mulf %314, %293 : vector<8x32xf32>
    %318 = arith.mulf %313, %315 : vector<8x32xf32>
    %319 = arith.addf %317, %318 : vector<8x32xf32>
    %320 = math.tanh %319 : vector<8x32xf32>
    %321 = arith.mulf %316, %320 : vector<8x32xf32>
    %322 = arith.index_cast %299 : i32 to index
    %c0_108 = arith.constant 0 : index
    %323 = vector.load %arg15[%322, %c0_108] : memref<64x32xf32, #tpu.memory_space<vmem>>, vector<8x32xf32>
    tpu.vector_store %arg15[%322, %c0_108], %321 {strides = array<i32>} : memref<64x32xf32, #tpu.memory_space<vmem>>, vector<8x32xf32>,
    %c3_i32_109 = arith.constant 3 : i32
    %c8_i32_110 = arith.constant 8 : i32
    %324 = arith.muli %c3_i32_109, %c8_i32_110 : i32
    %325 = tpu.assume_multiple %324, 8 : i32
    %326 = arith.index_cast %325 : i32 to index
    %c0_111 = arith.constant 0 : index
    %327 = vector.load %arg13[%326, %c0_111] : memref<64x128xf32, #tpu.memory_space<vmem>>, vector<8x128xf32>
    %cst_112 = arith.constant dense<0.000000e+00> : vector<8x128xf32>
    %328 = tpu.matmul %321, %239, %cst_112 {dimension_numbers = #tpu.dot_dimension_numbers<[1], [0], [0], [1], [0, 0, 1, 1], [], []>, precision = #tpu.contract_precision<fp32>} : vector<8x32xf32>, vector<32x128xf32>, vector<8x128xf32> -> vector<8x128xf32>
    %329 = arith.addf %327, %328 : vector<8x128xf32>
    %330 = math.tanh %329 : vector<8x128xf32>
    %cst_113 = arith.constant 5.000000e-01 : f32
    %331 = vector.broadcast %cst_113 : f32 to vector<8x128xf32>
    %332 = arith.mulf %331, %329 : vector<8x128xf32>
    %333 = math.tanh %332 : vector<8x128xf32>
    %cst_114 = arith.constant 5.000000e-01 : f32
    %334 = vector.broadcast %cst_114 : f32 to vector<8x128xf32>
    %335 = arith.mulf %334, %333 : vector<8x128xf32>
    %cst_115 = arith.constant 5.000000e-01 : f32
    %336 = vector.broadcast %cst_115 : f32 to vector<8x128xf32>
    %337 = arith.addf %335, %336 : vector<8x128xf32>
    %338 = arith.select %15, %330, %337 : vector<8x128xi1>, vector<8x128xf32>
    %339 = vector.extract_strided_slice %338 {offsets = [0, 0], sizes = [8, 32], strides = [1, 1]} : vector<8x128xf32> to vector<8x32xf32>
    %340 = vector.extract_strided_slice %338 {offsets = [0, 32], sizes = [8, 32], strides = [1, 1]} : vector<8x128xf32> to vector<8x32xf32>
    %341 = vector.extract_strided_slice %338 {offsets = [0, 64], sizes = [8, 32], strides = [1, 1]} : vector<8x128xf32> to vector<8x32xf32>
    %342 = vector.extract_strided_slice %338 {offsets = [0, 96], sizes = [8, 32], strides = [1, 1]} : vector<8x128xf32> to vector<8x32xf32>
    %343 = arith.mulf %340, %319 : vector<8x32xf32>
    %344 = arith.mulf %339, %341 : vector<8x32xf32>
    %345 = arith.addf %343, %344 : vector<8x32xf32>
    %346 = math.tanh %345 : vector<8x32xf32>
    %347 = arith.mulf %342, %346 : vector<8x32xf32>
    %348 = arith.index_cast %325 : i32 to index
    %c0_116 = arith.constant 0 : index
    %349 = vector.load %arg15[%348, %c0_116] : memref<64x32xf32, #tpu.memory_space<vmem>>, vector<8x32xf32>
    tpu.vector_store %arg15[%348, %c0_116], %347 {strides = array<i32>} : memref<64x32xf32, #tpu.memory_space<vmem>>, vector<8x32xf32>,
    %c4_i32_117 = arith.constant 4 : i32
    %c8_i32_118 = arith.constant 8 : i32
    %350 = arith.muli %c4_i32_117, %c8_i32_118 : i32
    %351 = tpu.assume_multiple %350, 8 : i32
    %352 = arith.index_cast %351 : i32 to index
    %c0_119 = arith.constant 0 : index
    %353 = vector.load %arg13[%352, %c0_119] : memref<64x128xf32, #tpu.memory_space<vmem>>, vector<8x128xf32>
    %cst_120 = arith.constant dense<0.000000e+00> : vector<8x128xf32>
    %354 = tpu.matmul %347, %239, %cst_120 {dimension_numbers = #tpu.dot_dimension_numbers<[1], [0], [0], [1], [0, 0, 1, 1], [], []>, precision = #tpu.contract_precision<fp32>} : vector<8x32xf32>, vector<32x128xf32>, vector<8x128xf32> -> vector<8x128xf32>
    %355 = arith.addf %353, %354 : vector<8x128xf32>
    %356 = math.tanh %355 : vector<8x128xf32>
    %cst_121 = arith.constant 5.000000e-01 : f32
    %357 = vector.broadcast %cst_121 : f32 to vector<8x128xf32>
    %358 = arith.mulf %357, %355 : vector<8x128xf32>
    %359 = math.tanh %358 : vector<8x128xf32>
    %cst_122 = arith.constant 5.000000e-01 : f32
    %360 = vector.broadcast %cst_122 : f32 to vector<8x128xf32>
    %361 = arith.mulf %360, %359 : vector<8x128xf32>
    %cst_123 = arith.constant 5.000000e-01 : f32
    %362 = vector.broadcast %cst_123 : f32 to vector<8x128xf32>
    %363 = arith.addf %361, %362 : vector<8x128xf32>
    %364 = arith.select %15, %356, %363 : vector<8x128xi1>, vector<8x128xf32>
    %365 = vector.extract_strided_slice %364 {offsets = [0, 0], sizes = [8, 32], strides = [1, 1]} : vector<8x128xf32> to vector<8x32xf32>
    %366 = vector.extract_strided_slice %364 {offsets = [0, 32], sizes = [8, 32], strides = [1, 1]} : vector<8x128xf32> to vector<8x32xf32>
    %367 = vector.extract_strided_slice %364 {offsets = [0, 64], sizes = [8, 32], strides = [1, 1]} : vector<8x128xf32> to vector<8x32xf32>
    %368 = vector.extract_strided_slice %364 {offsets = [0, 96], sizes = [8, 32], strides = [1, 1]} : vector<8x128xf32> to vector<8x32xf32>
    %369 = arith.mulf %366, %345 : vector<8x32xf32>
    %370 = arith.mulf %365, %367 : vector<8x32xf32>
    %371 = arith.addf %369, %370 : vector<8x32xf32>
    %372 = math.tanh %371 : vector<8x32xf32>
    %373 = arith.mulf %368, %372 : vector<8x32xf32>
    %374 = arith.index_cast %351 : i32 to index
    %c0_124 = arith.constant 0 : index
    %375 = vector.load %arg15[%374, %c0_124] : memref<64x32xf32, #tpu.memory_space<vmem>>, vector<8x32xf32>
    tpu.vector_store %arg15[%374, %c0_124], %373 {strides = array<i32>} : memref<64x32xf32, #tpu.memory_space<vmem>>, vector<8x32xf32>,
    %c5_i32_125 = arith.constant 5 : i32
    %c8_i32_126 = arith.constant 8 : i32
    %376 = arith.muli %c5_i32_125, %c8_i32_126 : i32
    %377 = tpu.assume_multiple %376, 8 : i32
    %378 = arith.index_cast %377 : i32 to index
    %c0_127 = arith.constant 0 : index
    %379 = vector.load %arg13[%378, %c0_127] : memref<64x128xf32, #tpu.memory_space<vmem>>, vector<8x128xf32>
    %cst_128 = arith.constant dense<0.000000e+00> : vector<8x128xf32>
    %380 = tpu.matmul %373, %239, %cst_128 {dimension_numbers = #tpu.dot_dimension_numbers<[1], [0], [0], [1], [0, 0, 1, 1], [], []>, precision = #tpu.contract_precision<fp32>} : vector<8x32xf32>, vector<32x128xf32>, vector<8x128xf32> -> vector<8x128xf32>
    %381 = arith.addf %379, %380 : vector<8x128xf32>
    %382 = math.tanh %381 : vector<8x128xf32>
    %cst_129 = arith.constant 5.000000e-01 : f32
    %383 = vector.broadcast %cst_129 : f32 to vector<8x128xf32>
    %384 = arith.mulf %383, %381 : vector<8x128xf32>
    %385 = math.tanh %384 : vector<8x128xf32>
    %cst_130 = arith.constant 5.000000e-01 : f32
    %386 = vector.broadcast %cst_130 : f32 to vector<8x128xf32>
    %387 = arith.mulf %386, %385 : vector<8x128xf32>
    %cst_131 = arith.constant 5.000000e-01 : f32
    %388 = vector.broadcast %cst_131 : f32 to vector<8x128xf32>
    %389 = arith.addf %387, %388 : vector<8x128xf32>
    %390 = arith.select %15, %382, %389 : vector<8x128xi1>, vector<8x128xf32>
    %391 = vector.extract_strided_slice %390 {offsets = [0, 0], sizes = [8, 32], strides = [1, 1]} : vector<8x128xf32> to vector<8x32xf32>
    %392 = vector.extract_strided_slice %390 {offsets = [0, 32], sizes = [8, 32], strides = [1, 1]} : vector<8x128xf32> to vector<8x32xf32>
    %393 = vector.extract_strided_slice %390 {offsets = [0, 64], sizes = [8, 32], strides = [1, 1]} : vector<8x128xf32> to vector<8x32xf32>
    %394 = vector.extract_strided_slice %390 {offsets = [0, 96], sizes = [8, 32], strides = [1, 1]} : vector<8x128xf32> to vector<8x32xf32>
    %395 = arith.mulf %392, %371 : vector<8x32xf32>
    %396 = arith.mulf %391, %393 : vector<8x32xf32>
    %397 = arith.addf %395, %396 : vector<8x32xf32>
    %398 = math.tanh %397 : vector<8x32xf32>
    %399 = arith.mulf %394, %398 : vector<8x32xf32>
    %400 = arith.index_cast %377 : i32 to index
    %c0_132 = arith.constant 0 : index
    %401 = vector.load %arg15[%400, %c0_132] : memref<64x32xf32, #tpu.memory_space<vmem>>, vector<8x32xf32>
    tpu.vector_store %arg15[%400, %c0_132], %399 {strides = array<i32>} : memref<64x32xf32, #tpu.memory_space<vmem>>, vector<8x32xf32>,
    %c6_i32_133 = arith.constant 6 : i32
    %c8_i32_134 = arith.constant 8 : i32
    %402 = arith.muli %c6_i32_133, %c8_i32_134 : i32
    %403 = tpu.assume_multiple %402, 8 : i32
    %404 = arith.index_cast %403 : i32 to index
    %c0_135 = arith.constant 0 : index
    %405 = vector.load %arg13[%404, %c0_135] : memref<64x128xf32, #tpu.memory_space<vmem>>, vector<8x128xf32>
    %cst_136 = arith.constant dense<0.000000e+00> : vector<8x128xf32>
    %406 = tpu.matmul %399, %239, %cst_136 {dimension_numbers = #tpu.dot_dimension_numbers<[1], [0], [0], [1], [0, 0, 1, 1], [], []>, precision = #tpu.contract_precision<fp32>} : vector<8x32xf32>, vector<32x128xf32>, vector<8x128xf32> -> vector<8x128xf32>
    %407 = arith.addf %405, %406 : vector<8x128xf32>
    %408 = math.tanh %407 : vector<8x128xf32>
    %cst_137 = arith.constant 5.000000e-01 : f32
    %409 = vector.broadcast %cst_137 : f32 to vector<8x128xf32>
    %410 = arith.mulf %409, %407 : vector<8x128xf32>
    %411 = math.tanh %410 : vector<8x128xf32>
    %cst_138 = arith.constant 5.000000e-01 : f32
    %412 = vector.broadcast %cst_138 : f32 to vector<8x128xf32>
    %413 = arith.mulf %412, %411 : vector<8x128xf32>
    %cst_139 = arith.constant 5.000000e-01 : f32
    %414 = vector.broadcast %cst_139 : f32 to vector<8x128xf32>
    %415 = arith.addf %413, %414 : vector<8x128xf32>
    %416 = arith.select %15, %408, %415 : vector<8x128xi1>, vector<8x128xf32>
    %417 = vector.extract_strided_slice %416 {offsets = [0, 0], sizes = [8, 32], strides = [1, 1]} : vector<8x128xf32> to vector<8x32xf32>
    %418 = vector.extract_strided_slice %416 {offsets = [0, 32], sizes = [8, 32], strides = [1, 1]} : vector<8x128xf32> to vector<8x32xf32>
    %419 = vector.extract_strided_slice %416 {offsets = [0, 64], sizes = [8, 32], strides = [1, 1]} : vector<8x128xf32> to vector<8x32xf32>
    %420 = vector.extract_strided_slice %416 {offsets = [0, 96], sizes = [8, 32], strides = [1, 1]} : vector<8x128xf32> to vector<8x32xf32>
    %421 = arith.mulf %418, %397 : vector<8x32xf32>
    %422 = arith.mulf %417, %419 : vector<8x32xf32>
    %423 = arith.addf %421, %422 : vector<8x32xf32>
    %424 = math.tanh %423 : vector<8x32xf32>
    %425 = arith.mulf %420, %424 : vector<8x32xf32>
    %426 = arith.index_cast %403 : i32 to index
    %c0_140 = arith.constant 0 : index
    %427 = vector.load %arg15[%426, %c0_140] : memref<64x32xf32, #tpu.memory_space<vmem>>, vector<8x32xf32>
    tpu.vector_store %arg15[%426, %c0_140], %425 {strides = array<i32>} : memref<64x32xf32, #tpu.memory_space<vmem>>, vector<8x32xf32>,
    %c7_i32_141 = arith.constant 7 : i32
    %c8_i32_142 = arith.constant 8 : i32
    %428 = arith.muli %c7_i32_141, %c8_i32_142 : i32
    %429 = tpu.assume_multiple %428, 8 : i32
    %430 = arith.index_cast %429 : i32 to index
    %c0_143 = arith.constant 0 : index
    %431 = vector.load %arg13[%430, %c0_143] : memref<64x128xf32, #tpu.memory_space<vmem>>, vector<8x128xf32>
    %cst_144 = arith.constant dense<0.000000e+00> : vector<8x128xf32>
    %432 = tpu.matmul %425, %239, %cst_144 {dimension_numbers = #tpu.dot_dimension_numbers<[1], [0], [0], [1], [0, 0, 1, 1], [], []>, precision = #tpu.contract_precision<fp32>} : vector<8x32xf32>, vector<32x128xf32>, vector<8x128xf32> -> vector<8x128xf32>
    %433 = arith.addf %431, %432 : vector<8x128xf32>
    %434 = math.tanh %433 : vector<8x128xf32>
    %cst_145 = arith.constant 5.000000e-01 : f32
    %435 = vector.broadcast %cst_145 : f32 to vector<8x128xf32>
    %436 = arith.mulf %435, %433 : vector<8x128xf32>
    %437 = math.tanh %436 : vector<8x128xf32>
    %cst_146 = arith.constant 5.000000e-01 : f32
    %438 = vector.broadcast %cst_146 : f32 to vector<8x128xf32>
    %439 = arith.mulf %438, %437 : vector<8x128xf32>
    %cst_147 = arith.constant 5.000000e-01 : f32
    %440 = vector.broadcast %cst_147 : f32 to vector<8x128xf32>
    %441 = arith.addf %439, %440 : vector<8x128xf32>
    %442 = arith.select %15, %434, %441 : vector<8x128xi1>, vector<8x128xf32>
    %443 = vector.extract_strided_slice %442 {offsets = [0, 0], sizes = [8, 32], strides = [1, 1]} : vector<8x128xf32> to vector<8x32xf32>
    %444 = vector.extract_strided_slice %442 {offsets = [0, 32], sizes = [8, 32], strides = [1, 1]} : vector<8x128xf32> to vector<8x32xf32>
    %445 = vector.extract_strided_slice %442 {offsets = [0, 64], sizes = [8, 32], strides = [1, 1]} : vector<8x128xf32> to vector<8x32xf32>
    %446 = vector.extract_strided_slice %442 {offsets = [0, 96], sizes = [8, 32], strides = [1, 1]} : vector<8x128xf32> to vector<8x32xf32>
    %447 = arith.mulf %444, %423 : vector<8x32xf32>
    %448 = arith.mulf %443, %445 : vector<8x32xf32>
    %449 = arith.addf %447, %448 : vector<8x32xf32>
    %450 = math.tanh %449 : vector<8x32xf32>
    %451 = arith.mulf %446, %450 : vector<8x32xf32>
    %452 = arith.index_cast %429 : i32 to index
    %c0_148 = arith.constant 0 : index
    %453 = vector.load %arg15[%452, %c0_148] : memref<64x32xf32, #tpu.memory_space<vmem>>, vector<8x32xf32>
    tpu.vector_store %arg15[%452, %c0_148], %451 {strides = array<i32>} : memref<64x32xf32, #tpu.memory_space<vmem>>, vector<8x32xf32>,
    %c8_i32_149 = arith.constant 8 : i32
    %c2_i32_150 = arith.constant 2 : i32
    %454 = tpu.memref_slice %arg21[%c2_i32_150] : memref<5x!tpu.dma_semaphore, #tpu.memory_space<semaphore_mem>> -> memref<1x!tpu.dma_semaphore, #tpu.memory_space<semaphore_mem>>
    %455 = tpu.memref_squeeze %454 : memref<1x!tpu.dma_semaphore, #tpu.memory_space<semaphore_mem>> -> memref<!tpu.dma_semaphore, #tpu.memory_space<semaphore_mem>>
    tpu.wait_dma2 semaphore(%455 : memref<!tpu.dma_semaphore, #tpu.memory_space<semaphore_mem>>) src(%arg7 : memref<32x128xf32, #tpu.memory_space<any>>) dst(%arg18 : memref<32x128xf32, #tpu.memory_space<vmem>>)
    %c3_i32_151 = arith.constant 3 : i32
    %456 = tpu.memref_slice %arg21[%c3_i32_151] : memref<5x!tpu.dma_semaphore, #tpu.memory_space<semaphore_mem>> -> memref<1x!tpu.dma_semaphore, #tpu.memory_space<semaphore_mem>>
    %457 = tpu.memref_squeeze %456 : memref<1x!tpu.dma_semaphore, #tpu.memory_space<semaphore_mem>> -> memref<!tpu.dma_semaphore, #tpu.memory_space<semaphore_mem>>
    tpu.wait_dma2 semaphore(%457 : memref<!tpu.dma_semaphore, #tpu.memory_space<semaphore_mem>>) src(%arg8 : memref<32x128xf32, #tpu.memory_space<any>>) dst(%arg19 : memref<32x128xf32, #tpu.memory_space<vmem>>)
    %c0_152 = arith.constant 0 : index
    %c0_153 = arith.constant 0 : index
    %458 = vector.load %arg15[%c0_152, %c0_153] : memref<64x32xf32, #tpu.memory_space<vmem>>, vector<64x32xf32>
    %c0_154 = arith.constant 0 : index
    %c0_155 = arith.constant 0 : index
    %459 = vector.load %arg18[%c0_154, %c0_155] : memref<32x128xf32, #tpu.memory_space<vmem>>, vector<32x128xf32>
    %c0_156 = arith.constant 0 : index
    %c0_157 = arith.constant 0 : index
    %460 = vector.load %arg19[%c0_156, %c0_157] : memref<32x128xf32, #tpu.memory_space<vmem>>, vector<32x128xf32>
    %c0_158 = arith.constant 0 : index
    %c0_159 = arith.constant 0 : index
    %461 = vector.load %arg9[%c0_158, %c0_159] : memref<1x128xf32, #tpu.memory_space<vmem>>, vector<1x128xf32>
    %cst_160 = arith.constant dense<0.000000e+00> : vector<64x128xf32>
    %462 = tpu.matmul %458, %459, %cst_160 {dimension_numbers = #tpu.dot_dimension_numbers<[1], [0], [0], [1], [0, 0, 1, 1], [], []>, precision = #tpu.contract_precision<fp32>} : vector<64x32xf32>, vector<32x128xf32>, vector<64x128xf32> -> vector<64x128xf32>
    %463 = vector.broadcast %461 : vector<1x128xf32> to vector<64x128xf32>
    %464 = arith.addf %462, %463 : vector<64x128xf32>
    %c0_161 = arith.constant 0 : index
    %c0_162 = arith.constant 0 : index
    %465 = vector.load %arg13[%c0_161, %c0_162] : memref<64x128xf32, #tpu.memory_space<vmem>>, vector<64x128xf32>
    tpu.vector_store %arg13[%c0_161, %c0_162], %464 {strides = array<i32>} : memref<64x128xf32, #tpu.memory_space<vmem>>, vector<64x128xf32>,
    %cst_163 = arith.constant 0.000000e+00 : f32
    %466 = vector.broadcast %cst_163 : f32 to vector<8x32xf32>
    %c0_i32_164 = arith.constant 0 : i32
    %c8_i32_165 = arith.constant 8 : i32
    %467 = arith.muli %c0_i32_164, %c8_i32_165 : i32
    %468 = tpu.assume_multiple %467, 8 : i32
    %469 = arith.index_cast %468 : i32 to index
    %c0_166 = arith.constant 0 : index
    %470 = vector.load %arg13[%469, %c0_166] : memref<64x128xf32, #tpu.memory_space<vmem>>, vector<8x128xf32>
    %cst_167 = arith.constant dense<0.000000e+00> : vector<8x128xf32>
    %471 = tpu.matmul %466, %460, %cst_167 {dimension_numbers = #tpu.dot_dimension_numbers<[1], [0], [0], [1], [0, 0, 1, 1], [], []>, precision = #tpu.contract_precision<fp32>} : vector<8x32xf32>, vector<32x128xf32>, vector<8x128xf32> -> vector<8x128xf32>
    %472 = arith.addf %470, %471 : vector<8x128xf32>
    %473 = math.tanh %472 : vector<8x128xf32>
    %cst_168 = arith.constant 5.000000e-01 : f32
    %474 = vector.broadcast %cst_168 : f32 to vector<8x128xf32>
    %475 = arith.mulf %474, %472 : vector<8x128xf32>
    %476 = math.tanh %475 : vector<8x128xf32>
    %cst_169 = arith.constant 5.000000e-01 : f32
    %477 = vector.broadcast %cst_169 : f32 to vector<8x128xf32>
    %478 = arith.mulf %477, %476 : vector<8x128xf32>
    %cst_170 = arith.constant 5.000000e-01 : f32
    %479 = vector.broadcast %cst_170 : f32 to vector<8x128xf32>
    %480 = arith.addf %478, %479 : vector<8x128xf32>
    %481 = arith.select %15, %473, %480 : vector<8x128xi1>, vector<8x128xf32>
    %482 = vector.extract_strided_slice %481 {offsets = [0, 0], sizes = [8, 32], strides = [1, 1]} : vector<8x128xf32> to vector<8x32xf32>
    %483 = vector.extract_strided_slice %481 {offsets = [0, 32], sizes = [8, 32], strides = [1, 1]} : vector<8x128xf32> to vector<8x32xf32>
    %484 = vector.extract_strided_slice %481 {offsets = [0, 64], sizes = [8, 32], strides = [1, 1]} : vector<8x128xf32> to vector<8x32xf32>
    %485 = vector.extract_strided_slice %481 {offsets = [0, 96], sizes = [8, 32], strides = [1, 1]} : vector<8x128xf32> to vector<8x32xf32>
    %486 = arith.mulf %483, %466 : vector<8x32xf32>
    %487 = arith.mulf %482, %484 : vector<8x32xf32>
    %488 = arith.addf %486, %487 : vector<8x32xf32>
    %489 = math.tanh %488 : vector<8x32xf32>
    %490 = arith.mulf %485, %489 : vector<8x32xf32>
    %491 = arith.index_cast %468 : i32 to index
    %c0_171 = arith.constant 0 : index
    %492 = vector.load %arg14[%491, %c0_171] : memref<64x32xf32, #tpu.memory_space<vmem>>, vector<8x32xf32>
    tpu.vector_store %arg14[%491, %c0_171], %490 {strides = array<i32>} : memref<64x32xf32, #tpu.memory_space<vmem>>, vector<8x32xf32>,
    %c1_i32_172 = arith.constant 1 : i32
    %c8_i32_173 = arith.constant 8 : i32
    %493 = arith.muli %c1_i32_172, %c8_i32_173 : i32
    %494 = tpu.assume_multiple %493, 8 : i32
    %495 = arith.index_cast %494 : i32 to index
    %c0_174 = arith.constant 0 : index
    %496 = vector.load %arg13[%495, %c0_174] : memref<64x128xf32, #tpu.memory_space<vmem>>, vector<8x128xf32>
    %cst_175 = arith.constant dense<0.000000e+00> : vector<8x128xf32>
    %497 = tpu.matmul %490, %460, %cst_175 {dimension_numbers = #tpu.dot_dimension_numbers<[1], [0], [0], [1], [0, 0, 1, 1], [], []>, precision = #tpu.contract_precision<fp32>} : vector<8x32xf32>, vector<32x128xf32>, vector<8x128xf32> -> vector<8x128xf32>
    %498 = arith.addf %496, %497 : vector<8x128xf32>
    %499 = math.tanh %498 : vector<8x128xf32>
    %cst_176 = arith.constant 5.000000e-01 : f32
    %500 = vector.broadcast %cst_176 : f32 to vector<8x128xf32>
    %501 = arith.mulf %500, %498 : vector<8x128xf32>
    %502 = math.tanh %501 : vector<8x128xf32>
    %cst_177 = arith.constant 5.000000e-01 : f32
    %503 = vector.broadcast %cst_177 : f32 to vector<8x128xf32>
    %504 = arith.mulf %503, %502 : vector<8x128xf32>
    %cst_178 = arith.constant 5.000000e-01 : f32
    %505 = vector.broadcast %cst_178 : f32 to vector<8x128xf32>
    %506 = arith.addf %504, %505 : vector<8x128xf32>
    %507 = arith.select %15, %499, %506 : vector<8x128xi1>, vector<8x128xf32>
    %508 = vector.extract_strided_slice %507 {offsets = [0, 0], sizes = [8, 32], strides = [1, 1]} : vector<8x128xf32> to vector<8x32xf32>
    %509 = vector.extract_strided_slice %507 {offsets = [0, 32], sizes = [8, 32], strides = [1, 1]} : vector<8x128xf32> to vector<8x32xf32>
    %510 = vector.extract_strided_slice %507 {offsets = [0, 64], sizes = [8, 32], strides = [1, 1]} : vector<8x128xf32> to vector<8x32xf32>
    %511 = vector.extract_strided_slice %507 {offsets = [0, 96], sizes = [8, 32], strides = [1, 1]} : vector<8x128xf32> to vector<8x32xf32>
    %512 = arith.mulf %509, %488 : vector<8x32xf32>
    %513 = arith.mulf %508, %510 : vector<8x32xf32>
    %514 = arith.addf %512, %513 : vector<8x32xf32>
    %515 = math.tanh %514 : vector<8x32xf32>
    %516 = arith.mulf %511, %515 : vector<8x32xf32>
    %517 = arith.index_cast %494 : i32 to index
    %c0_179 = arith.constant 0 : index
    %518 = vector.load %arg14[%517, %c0_179] : memref<64x32xf32, #tpu.memory_space<vmem>>, vector<8x32xf32>
    tpu.vector_store %arg14[%517, %c0_179], %516 {strides = array<i32>} : memref<64x32xf32, #tpu.memory_space<vmem>>, vector<8x32xf32>,
    %c2_i32_180 = arith.constant 2 : i32
    %c8_i32_181 = arith.constant 8 : i32
    %519 = arith.muli %c2_i32_180, %c8_i32_181 : i32
    %520 = tpu.assume_multiple %519, 8 : i32
    %521 = arith.index_cast %520 : i32 to index
    %c0_182 = arith.constant 0 : index
    %522 = vector.load %arg13[%521, %c0_182] : memref<64x128xf32, #tpu.memory_space<vmem>>, vector<8x128xf32>
    %cst_183 = arith.constant dense<0.000000e+00> : vector<8x128xf32>
    %523 = tpu.matmul %516, %460, %cst_183 {dimension_numbers = #tpu.dot_dimension_numbers<[1], [0], [0], [1], [0, 0, 1, 1], [], []>, precision = #tpu.contract_precision<fp32>} : vector<8x32xf32>, vector<32x128xf32>, vector<8x128xf32> -> vector<8x128xf32>
    %524 = arith.addf %522, %523 : vector<8x128xf32>
    %525 = math.tanh %524 : vector<8x128xf32>
    %cst_184 = arith.constant 5.000000e-01 : f32
    %526 = vector.broadcast %cst_184 : f32 to vector<8x128xf32>
    %527 = arith.mulf %526, %524 : vector<8x128xf32>
    %528 = math.tanh %527 : vector<8x128xf32>
    %cst_185 = arith.constant 5.000000e-01 : f32
    %529 = vector.broadcast %cst_185 : f32 to vector<8x128xf32>
    %530 = arith.mulf %529, %528 : vector<8x128xf32>
    %cst_186 = arith.constant 5.000000e-01 : f32
    %531 = vector.broadcast %cst_186 : f32 to vector<8x128xf32>
    %532 = arith.addf %530, %531 : vector<8x128xf32>
    %533 = arith.select %15, %525, %532 : vector<8x128xi1>, vector<8x128xf32>
    %534 = vector.extract_strided_slice %533 {offsets = [0, 0], sizes = [8, 32], strides = [1, 1]} : vector<8x128xf32> to vector<8x32xf32>
    %535 = vector.extract_strided_slice %533 {offsets = [0, 32], sizes = [8, 32], strides = [1, 1]} : vector<8x128xf32> to vector<8x32xf32>
    %536 = vector.extract_strided_slice %533 {offsets = [0, 64], sizes = [8, 32], strides = [1, 1]} : vector<8x128xf32> to vector<8x32xf32>
    %537 = vector.extract_strided_slice %533 {offsets = [0, 96], sizes = [8, 32], strides = [1, 1]} : vector<8x128xf32> to vector<8x32xf32>
    %538 = arith.mulf %535, %514 : vector<8x32xf32>
    %539 = arith.mulf %534, %536 : vector<8x32xf32>
    %540 = arith.addf %538, %539 : vector<8x32xf32>
    %541 = math.tanh %540 : vector<8x32xf32>
    %542 = arith.mulf %537, %541 : vector<8x32xf32>
    %543 = arith.index_cast %520 : i32 to index
    %c0_187 = arith.constant 0 : index
    %544 = vector.load %arg14[%543, %c0_187] : memref<64x32xf32, #tpu.memory_space<vmem>>, vector<8x32xf32>
    tpu.vector_store %arg14[%543, %c0_187], %542 {strides = array<i32>} : memref<64x32xf32, #tpu.memory_space<vmem>>, vector<8x32xf32>,
    %c3_i32_188 = arith.constant 3 : i32
    %c8_i32_189 = arith.constant 8 : i32
    %545 = arith.muli %c3_i32_188, %c8_i32_189 : i32
    %546 = tpu.assume_multiple %545, 8 : i32
    %547 = arith.index_cast %546 : i32 to index
    %c0_190 = arith.constant 0 : index
    %548 = vector.load %arg13[%547, %c0_190] : memref<64x128xf32, #tpu.memory_space<vmem>>, vector<8x128xf32>
    %cst_191 = arith.constant dense<0.000000e+00> : vector<8x128xf32>
    %549 = tpu.matmul %542, %460, %cst_191 {dimension_numbers = #tpu.dot_dimension_numbers<[1], [0], [0], [1], [0, 0, 1, 1], [], []>, precision = #tpu.contract_precision<fp32>} : vector<8x32xf32>, vector<32x128xf32>, vector<8x128xf32> -> vector<8x128xf32>
    %550 = arith.addf %548, %549 : vector<8x128xf32>
    %551 = math.tanh %550 : vector<8x128xf32>
    %cst_192 = arith.constant 5.000000e-01 : f32
    %552 = vector.broadcast %cst_192 : f32 to vector<8x128xf32>
    %553 = arith.mulf %552, %550 : vector<8x128xf32>
    %554 = math.tanh %553 : vector<8x128xf32>
    %cst_193 = arith.constant 5.000000e-01 : f32
    %555 = vector.broadcast %cst_193 : f32 to vector<8x128xf32>
    %556 = arith.mulf %555, %554 : vector<8x128xf32>
    %cst_194 = arith.constant 5.000000e-01 : f32
    %557 = vector.broadcast %cst_194 : f32 to vector<8x128xf32>
    %558 = arith.addf %556, %557 : vector<8x128xf32>
    %559 = arith.select %15, %551, %558 : vector<8x128xi1>, vector<8x128xf32>
    %560 = vector.extract_strided_slice %559 {offsets = [0, 0], sizes = [8, 32], strides = [1, 1]} : vector<8x128xf32> to vector<8x32xf32>
    %561 = vector.extract_strided_slice %559 {offsets = [0, 32], sizes = [8, 32], strides = [1, 1]} : vector<8x128xf32> to vector<8x32xf32>
    %562 = vector.extract_strided_slice %559 {offsets = [0, 64], sizes = [8, 32], strides = [1, 1]} : vector<8x128xf32> to vector<8x32xf32>
    %563 = vector.extract_strided_slice %559 {offsets = [0, 96], sizes = [8, 32], strides = [1, 1]} : vector<8x128xf32> to vector<8x32xf32>
    %564 = arith.mulf %561, %540 : vector<8x32xf32>
    %565 = arith.mulf %560, %562 : vector<8x32xf32>
    %566 = arith.addf %564, %565 : vector<8x32xf32>
    %567 = math.tanh %566 : vector<8x32xf32>
    %568 = arith.mulf %563, %567 : vector<8x32xf32>
    %569 = arith.index_cast %546 : i32 to index
    %c0_195 = arith.constant 0 : index
    %570 = vector.load %arg14[%569, %c0_195] : memref<64x32xf32, #tpu.memory_space<vmem>>, vector<8x32xf32>
    tpu.vector_store %arg14[%569, %c0_195], %568 {strides = array<i32>} : memref<64x32xf32, #tpu.memory_space<vmem>>, vector<8x32xf32>,
    %c4_i32_196 = arith.constant 4 : i32
    %c8_i32_197 = arith.constant 8 : i32
    %571 = arith.muli %c4_i32_196, %c8_i32_197 : i32
    %572 = tpu.assume_multiple %571, 8 : i32
    %573 = arith.index_cast %572 : i32 to index
    %c0_198 = arith.constant 0 : index
    %574 = vector.load %arg13[%573, %c0_198] : memref<64x128xf32, #tpu.memory_space<vmem>>, vector<8x128xf32>
    %cst_199 = arith.constant dense<0.000000e+00> : vector<8x128xf32>
    %575 = tpu.matmul %568, %460, %cst_199 {dimension_numbers = #tpu.dot_dimension_numbers<[1], [0], [0], [1], [0, 0, 1, 1], [], []>, precision = #tpu.contract_precision<fp32>} : vector<8x32xf32>, vector<32x128xf32>, vector<8x128xf32> -> vector<8x128xf32>
    %576 = arith.addf %574, %575 : vector<8x128xf32>
    %577 = math.tanh %576 : vector<8x128xf32>
    %cst_200 = arith.constant 5.000000e-01 : f32
    %578 = vector.broadcast %cst_200 : f32 to vector<8x128xf32>
    %579 = arith.mulf %578, %576 : vector<8x128xf32>
    %580 = math.tanh %579 : vector<8x128xf32>
    %cst_201 = arith.constant 5.000000e-01 : f32
    %581 = vector.broadcast %cst_201 : f32 to vector<8x128xf32>
    %582 = arith.mulf %581, %580 : vector<8x128xf32>
    %cst_202 = arith.constant 5.000000e-01 : f32
    %583 = vector.broadcast %cst_202 : f32 to vector<8x128xf32>
    %584 = arith.addf %582, %583 : vector<8x128xf32>
    %585 = arith.select %15, %577, %584 : vector<8x128xi1>, vector<8x128xf32>
    %586 = vector.extract_strided_slice %585 {offsets = [0, 0], sizes = [8, 32], strides = [1, 1]} : vector<8x128xf32> to vector<8x32xf32>
    %587 = vector.extract_strided_slice %585 {offsets = [0, 32], sizes = [8, 32], strides = [1, 1]} : vector<8x128xf32> to vector<8x32xf32>
    %588 = vector.extract_strided_slice %585 {offsets = [0, 64], sizes = [8, 32], strides = [1, 1]} : vector<8x128xf32> to vector<8x32xf32>
    %589 = vector.extract_strided_slice %585 {offsets = [0, 96], sizes = [8, 32], strides = [1, 1]} : vector<8x128xf32> to vector<8x32xf32>
    %590 = arith.mulf %587, %566 : vector<8x32xf32>
    %591 = arith.mulf %586, %588 : vector<8x32xf32>
    %592 = arith.addf %590, %591 : vector<8x32xf32>
    %593 = math.tanh %592 : vector<8x32xf32>
    %594 = arith.mulf %589, %593 : vector<8x32xf32>
    %595 = arith.index_cast %572 : i32 to index
    %c0_203 = arith.constant 0 : index
    %596 = vector.load %arg14[%595, %c0_203] : memref<64x32xf32, #tpu.memory_space<vmem>>, vector<8x32xf32>
    tpu.vector_store %arg14[%595, %c0_203], %594 {strides = array<i32>} : memref<64x32xf32, #tpu.memory_space<vmem>>, vector<8x32xf32>,
    %c5_i32_204 = arith.constant 5 : i32
    %c8_i32_205 = arith.constant 8 : i32
    %597 = arith.muli %c5_i32_204, %c8_i32_205 : i32
    %598 = tpu.assume_multiple %597, 8 : i32
    %599 = arith.index_cast %598 : i32 to index
    %c0_206 = arith.constant 0 : index
    %600 = vector.load %arg13[%599, %c0_206] : memref<64x128xf32, #tpu.memory_space<vmem>>, vector<8x128xf32>
    %cst_207 = arith.constant dense<0.000000e+00> : vector<8x128xf32>
    %601 = tpu.matmul %594, %460, %cst_207 {dimension_numbers = #tpu.dot_dimension_numbers<[1], [0], [0], [1], [0, 0, 1, 1], [], []>, precision = #tpu.contract_precision<fp32>} : vector<8x32xf32>, vector<32x128xf32>, vector<8x128xf32> -> vector<8x128xf32>
    %602 = arith.addf %600, %601 : vector<8x128xf32>
    %603 = math.tanh %602 : vector<8x128xf32>
    %cst_208 = arith.constant 5.000000e-01 : f32
    %604 = vector.broadcast %cst_208 : f32 to vector<8x128xf32>
    %605 = arith.mulf %604, %602 : vector<8x128xf32>
    %606 = math.tanh %605 : vector<8x128xf32>
    %cst_209 = arith.constant 5.000000e-01 : f32
    %607 = vector.broadcast %cst_209 : f32 to vector<8x128xf32>
    %608 = arith.mulf %607, %606 : vector<8x128xf32>
    %cst_210 = arith.constant 5.000000e-01 : f32
    %609 = vector.broadcast %cst_210 : f32 to vector<8x128xf32>
    %610 = arith.addf %608, %609 : vector<8x128xf32>
    %611 = arith.select %15, %603, %610 : vector<8x128xi1>, vector<8x128xf32>
    %612 = vector.extract_strided_slice %611 {offsets = [0, 0], sizes = [8, 32], strides = [1, 1]} : vector<8x128xf32> to vector<8x32xf32>
    %613 = vector.extract_strided_slice %611 {offsets = [0, 32], sizes = [8, 32], strides = [1, 1]} : vector<8x128xf32> to vector<8x32xf32>
    %614 = vector.extract_strided_slice %611 {offsets = [0, 64], sizes = [8, 32], strides = [1, 1]} : vector<8x128xf32> to vector<8x32xf32>
    %615 = vector.extract_strided_slice %611 {offsets = [0, 96], sizes = [8, 32], strides = [1, 1]} : vector<8x128xf32> to vector<8x32xf32>
    %616 = arith.mulf %613, %592 : vector<8x32xf32>
    %617 = arith.mulf %612, %614 : vector<8x32xf32>
    %618 = arith.addf %616, %617 : vector<8x32xf32>
    %619 = math.tanh %618 : vector<8x32xf32>
    %620 = arith.mulf %615, %619 : vector<8x32xf32>
    %621 = arith.index_cast %598 : i32 to index
    %c0_211 = arith.constant 0 : index
    %622 = vector.load %arg14[%621, %c0_211] : memref<64x32xf32, #tpu.memory_space<vmem>>, vector<8x32xf32>
    tpu.vector_store %arg14[%621, %c0_211], %620 {strides = array<i32>} : memref<64x32xf32, #tpu.memory_space<vmem>>, vector<8x32xf32>,
    %c6_i32_212 = arith.constant 6 : i32
    %c8_i32_213 = arith.constant 8 : i32
    %623 = arith.muli %c6_i32_212, %c8_i32_213 : i32
    %624 = tpu.assume_multiple %623, 8 : i32
    %625 = arith.index_cast %624 : i32 to index
    %c0_214 = arith.constant 0 : index
    %626 = vector.load %arg13[%625, %c0_214] : memref<64x128xf32, #tpu.memory_space<vmem>>, vector<8x128xf32>
    %cst_215 = arith.constant dense<0.000000e+00> : vector<8x128xf32>
    %627 = tpu.matmul %620, %460, %cst_215 {dimension_numbers = #tpu.dot_dimension_numbers<[1], [0], [0], [1], [0, 0, 1, 1], [], []>, precision = #tpu.contract_precision<fp32>} : vector<8x32xf32>, vector<32x128xf32>, vector<8x128xf32> -> vector<8x128xf32>
    %628 = arith.addf %626, %627 : vector<8x128xf32>
    %629 = math.tanh %628 : vector<8x128xf32>
    %cst_216 = arith.constant 5.000000e-01 : f32
    %630 = vector.broadcast %cst_216 : f32 to vector<8x128xf32>
    %631 = arith.mulf %630, %628 : vector<8x128xf32>
    %632 = math.tanh %631 : vector<8x128xf32>
    %cst_217 = arith.constant 5.000000e-01 : f32
    %633 = vector.broadcast %cst_217 : f32 to vector<8x128xf32>
    %634 = arith.mulf %633, %632 : vector<8x128xf32>
    %cst_218 = arith.constant 5.000000e-01 : f32
    %635 = vector.broadcast %cst_218 : f32 to vector<8x128xf32>
    %636 = arith.addf %634, %635 : vector<8x128xf32>
    %637 = arith.select %15, %629, %636 : vector<8x128xi1>, vector<8x128xf32>
    %638 = vector.extract_strided_slice %637 {offsets = [0, 0], sizes = [8, 32], strides = [1, 1]} : vector<8x128xf32> to vector<8x32xf32>
    %639 = vector.extract_strided_slice %637 {offsets = [0, 32], sizes = [8, 32], strides = [1, 1]} : vector<8x128xf32> to vector<8x32xf32>
    %640 = vector.extract_strided_slice %637 {offsets = [0, 64], sizes = [8, 32], strides = [1, 1]} : vector<8x128xf32> to vector<8x32xf32>
    %641 = vector.extract_strided_slice %637 {offsets = [0, 96], sizes = [8, 32], strides = [1, 1]} : vector<8x128xf32> to vector<8x32xf32>
    %642 = arith.mulf %639, %618 : vector<8x32xf32>
    %643 = arith.mulf %638, %640 : vector<8x32xf32>
    %644 = arith.addf %642, %643 : vector<8x32xf32>
    %645 = math.tanh %644 : vector<8x32xf32>
    %646 = arith.mulf %641, %645 : vector<8x32xf32>
    %647 = arith.index_cast %624 : i32 to index
    %c0_219 = arith.constant 0 : index
    %648 = vector.load %arg14[%647, %c0_219] : memref<64x32xf32, #tpu.memory_space<vmem>>, vector<8x32xf32>
    tpu.vector_store %arg14[%647, %c0_219], %646 {strides = array<i32>} : memref<64x32xf32, #tpu.memory_space<vmem>>, vector<8x32xf32>,
    %c7_i32_220 = arith.constant 7 : i32
    %c8_i32_221 = arith.constant 8 : i32
    %649 = arith.muli %c7_i32_220, %c8_i32_221 : i32
    %650 = tpu.assume_multiple %649, 8 : i32
    %651 = arith.index_cast %650 : i32 to index
    %c0_222 = arith.constant 0 : index
    %652 = vector.load %arg13[%651, %c0_222] : memref<64x128xf32, #tpu.memory_space<vmem>>, vector<8x128xf32>
    %cst_223 = arith.constant dense<0.000000e+00> : vector<8x128xf32>
    %653 = tpu.matmul %646, %460, %cst_223 {dimension_numbers = #tpu.dot_dimension_numbers<[1], [0], [0], [1], [0, 0, 1, 1], [], []>, precision = #tpu.contract_precision<fp32>} : vector<8x32xf32>, vector<32x128xf32>, vector<8x128xf32> -> vector<8x128xf32>
    %654 = arith.addf %652, %653 : vector<8x128xf32>
    %655 = math.tanh %654 : vector<8x128xf32>
    %cst_224 = arith.constant 5.000000e-01 : f32
    %656 = vector.broadcast %cst_224 : f32 to vector<8x128xf32>
    %657 = arith.mulf %656, %654 : vector<8x128xf32>
    %658 = math.tanh %657 : vector<8x128xf32>
    %cst_225 = arith.constant 5.000000e-01 : f32
    %659 = vector.broadcast %cst_225 : f32 to vector<8x128xf32>
    %660 = arith.mulf %659, %658 : vector<8x128xf32>
    %cst_226 = arith.constant 5.000000e-01 : f32
    %661 = vector.broadcast %cst_226 : f32 to vector<8x128xf32>
    %662 = arith.addf %660, %661 : vector<8x128xf32>
    %663 = arith.select %15, %655, %662 : vector<8x128xi1>, vector<8x128xf32>
    %664 = vector.extract_strided_slice %663 {offsets = [0, 0], sizes = [8, 32], strides = [1, 1]} : vector<8x128xf32> to vector<8x32xf32>
    %665 = vector.extract_strided_slice %663 {offsets = [0, 32], sizes = [8, 32], strides = [1, 1]} : vector<8x128xf32> to vector<8x32xf32>
    %666 = vector.extract_strided_slice %663 {offsets = [0, 64], sizes = [8, 32], strides = [1, 1]} : vector<8x128xf32> to vector<8x32xf32>
    %667 = vector.extract_strided_slice %663 {offsets = [0, 96], sizes = [8, 32], strides = [1, 1]} : vector<8x128xf32> to vector<8x32xf32>
    %668 = arith.mulf %665, %644 : vector<8x32xf32>
    %669 = arith.mulf %664, %666 : vector<8x32xf32>
    %670 = arith.addf %668, %669 : vector<8x32xf32>
    %671 = math.tanh %670 : vector<8x32xf32>
    %672 = arith.mulf %667, %671 : vector<8x32xf32>
    %673 = arith.index_cast %650 : i32 to index
    %c0_227 = arith.constant 0 : index
    %674 = vector.load %arg14[%673, %c0_227] : memref<64x32xf32, #tpu.memory_space<vmem>>, vector<8x32xf32>
    tpu.vector_store %arg14[%673, %c0_227], %672 {strides = array<i32>} : memref<64x32xf32, #tpu.memory_space<vmem>>, vector<8x32xf32>,
    %c8_i32_228 = arith.constant 8 : i32
    %c4_i32_229 = arith.constant 4 : i32
    %675 = tpu.memref_slice %arg21[%c4_i32_229] : memref<5x!tpu.dma_semaphore, #tpu.memory_space<semaphore_mem>> -> memref<1x!tpu.dma_semaphore, #tpu.memory_space<semaphore_mem>>
    %676 = tpu.memref_squeeze %675 : memref<1x!tpu.dma_semaphore, #tpu.memory_space<semaphore_mem>> -> memref<!tpu.dma_semaphore, #tpu.memory_space<semaphore_mem>>
    tpu.wait_dma2 semaphore(%676 : memref<!tpu.dma_semaphore, #tpu.memory_space<semaphore_mem>>) src(%arg10 : memref<32x128xf32, #tpu.memory_space<any>>) dst(%arg20 : memref<32x128xf32, #tpu.memory_space<vmem>>)
    %c0_230 = arith.constant 0 : index
    %c0_231 = arith.constant 0 : index
    %677 = vector.load %arg14[%c0_230, %c0_231] : memref<64x32xf32, #tpu.memory_space<vmem>>, vector<64x32xf32>
    %c0_232 = arith.constant 0 : index
    %c0_233 = arith.constant 0 : index
    %678 = vector.load %arg20[%c0_232, %c0_233] : memref<32x128xf32, #tpu.memory_space<vmem>>, vector<32x128xf32>
    %cst_234 = arith.constant dense<0.000000e+00> : vector<64x128xf32>
    %679 = tpu.matmul %677, %678, %cst_234 {dimension_numbers = #tpu.dot_dimension_numbers<[1], [0], [0], [1], [0, 0, 1, 1], [], []>, precision = #tpu.contract_precision<fp32>} : vector<64x32xf32>, vector<32x128xf32>, vector<64x128xf32> -> vector<64x128xf32>
    %c0_235 = arith.constant 0 : index
    %c0_236 = arith.constant 0 : index
    %680 = vector.load %arg11[%c0_235, %c0_236] : memref<1x128xf32, #tpu.memory_space<vmem>>, vector<1x128xf32>
    %681 = vector.broadcast %680 : vector<1x128xf32> to vector<64x128xf32>
    %682 = arith.addf %679, %681 : vector<64x128xf32>
    %683 = tpu.iota {dimensions = array<i32: 1>} : vector<64x128xi32>
    %c10_i32 = arith.constant 10 : i32
    %684 = vector.broadcast %c10_i32 : i32 to vector<64x128xi32>
    %685 = arith.cmpi slt, %683, %684 : vector<64x128xi32>
    %cst_237 = arith.constant -1.000000e+30 : f32
    %686 = vector.broadcast %cst_237 : f32 to vector<64x128xf32>
    %687 = arith.select %685, %682, %686 : vector<64x128xi1>, vector<64x128xf32>
    %cst_238 = arith.constant dense<0xFF800000> : vector<64xf32>
    %688 = vector.multi_reduction <maximumf>, %687, %cst_238 [1] : vector<64x128xf32> to vector<64xf32>
    %689 = vector.shape_cast %688 : vector<64xf32> to vector<64x1xf32>
    %690 = vector.broadcast %689 : vector<64x1xf32> to vector<64x128xf32>
    %691 = arith.subf %687, %690 : vector<64x128xf32>
    %692 = math.exp %691 : vector<64x128xf32>
    %cst_239 = arith.constant dense<0.000000e+00> : vector<64xf32>
    %693 = vector.multi_reduction <add>, %692, %cst_239 [1] : vector<64x128xf32> to vector<64xf32>
    %694 = vector.shape_cast %693 : vector<64xf32> to vector<64x1xf32>
    %695 = math.log %694 : vector<64x1xf32>
    %696 = vector.broadcast %695 : vector<64x1xf32> to vector<64x128xf32>
    %697 = arith.subf %691, %696 : vector<64x128xf32>
    %698 = vector.shape_cast %697 : vector<64x128xf32> to vector<8x8x128xf32>
    %cst_240 = arith.constant dense<0.000000e+00> : vector<8x128xf32>
    %699 = vector.multi_reduction <add>, %698, %cst_240 [0] : vector<8x8x128xf32> to vector<8x128xf32>
    %cst_241 = arith.constant 8.000000e+00 : f32
    %700 = vector.broadcast %cst_241 : f32 to vector<8x128xf32>
    %701 = arith.divf %699, %700 : vector<8x128xf32>
    %c0_242 = arith.constant 0 : index
    %c0_243 = arith.constant 0 : index
    %702 = vector.load %arg12[%c0_242, %c0_243] : memref<8x128xf32, #tpu.memory_space<vmem>>, vector<8x128xf32>
    tpu.vector_store %arg12[%c0_242, %c0_243], %701 {strides = array<i32>} : memref<8x128xf32, #tpu.memory_space<vmem>>, vector<8x128xf32>,
    return
  }
}

</mosaic_0001>

<bundles_post_ra>
// kernel: tpu_custom_call.1
= control target key start
LH: loop header
LB: loop body
LE: loop exit
PB: predicated region body
PF: predicated region fallthrough
CT: control target
= control target key end

     0   :  { %17 = vsyncpa [#allocation12], 0  ;;  %s23204_s0 = inlined_call_operand.vmem [shape: f32[64,16], index: 0, kind: input, shape index: {}]   ;;  %s23205_s1 = inlined_call_operand.hbm [shape: f32[16,128], index: 1, kind: input, shape index: {}]   ;;  %s23206_s2 = inlined_call_operand.vmem [shape: f32[32,128], index: 2, kind: input, shape index: {}]   ;;  %s23207_s3 = inlined_call_operand.vmem [shape: f32[1,128], index: 3, kind: input, shape index: {}]   ;;  %s23208_s4 = inlined_call_operand.vmem [shape: f32[32,128], index: 4, kind: input, shape index: {}]   ;;  %s23209_s5 = inlined_call_operand.vmem [shape: f32[32,128], index: 5, kind: input, shape index: {}]   ;;  %s23210_s6 = inlined_call_operand.vmem [shape: f32[1,128], index: 6, kind: input, shape index: {}]   ;;  %s23211_s7 = inlined_call_operand.hbm [shape: f32[32,128], index: 7, kind: input, shape index: {}]   ;;  %s23212_s8 = inlined_call_operand.hbm [shape: f32[32,128], index: 8, kind: input, shape index: {}]   ;;  %s23213_s9 = inlined_call_operand.vmem [shape: f32[1,128], index: 9, kind: input, shape index: {}]   ;;  %s23214_s10 = inlined_call_operand.hbm [shape: f32[32,128], index: 10, kind: input, shape index: {}]   ;;  %s23215_s11 = inlined_call_operand.vmem [shape: f32[1,128], index: 11, kind: input, shape index: {}]   ;;  %s23216_s12 = inlined_call_operand.hbm [shape: f32[8,128], index: 12, kind: output, shape index: {}]  }
   0x1   :  { %18 = vsyncpa [#allocation13], 0  ;;  %s20932_s21 = smov [#allocation11]   ;;  %s20808_s25 = scalar_lea.hbm %s23205_s1, 256 }
   0x2   :  { %s26_s22 = sshll.u32 %s20932_s21, 4  ;;  %p20809_p0 = scmp.ne.s32.totalorder %s23205_s1, %s20808_s25  ;;  %s27_s22 = int_to_ptr.vmem [resolvable:$true] %s26_s22 }
   0x3   :  { %p20812_p1 = scmp.lt.u32.totalorder %s20808_s25, %s23205_s1 }
   0x5   :  { %p20814_p2 = pnand %p20812_p1, %p20809_p0 }
   0x7   :  { %20817 = shalt.err (!%p20814_p2)
}
   0x8   :  { %s20818_s30 = scalar_lea.vmem %s27_s22, 256  ;;  %p20823_p4 = scmp.lt.s32.totalorder %s27_s22, %s27_s22 }
   0x9   :  { %p20819_p3 = scmp.ne.s32.totalorder %s27_s22, %s20818_s30  ;;  %p20824_p5 = scmp.lt.s32.totalorder %s20818_s30, %s20818_s30 }
   0xb   :  { %p20825_p6 = por %p20824_p5, %p20823_p4 }
   0xd   :  { %p20826_p7 = pnand %p20825_p6, %p20819_p3 }
   0xf   :  { %20829 = shalt.err (!%p20826_p7)
}
  0x10   :  { %s20933_s13 = smov 128   ;;  %s20934_s14 = smov 8  }
  0x11   :  { %32 = dma.hbm_to_vmem [thread:$0]  %s23205_s1, 256, %s27_s22, [#allocation12], %s20933_s13, %s20933_s13, %s20934_s14  }
  0x12   :  { %20918 = dma.done.wait [#allocation12], 256  }
  0x13   :  { %20919 = vsyncadd [#allocation12], 4294967040  ;;  %v21024_v0 = vld [vmem:[%s23208_s4] sm:$0xff]  ;;  %v21029_v1 = vld [vmem:[%s23208_s4 + $0x8] sm:$0xff] }
  0x14   :  { %v21034_v2 = vld [vmem:[%s23208_s4 + $0x10] sm:$0xff]  ;;  %v21039_v3 = vld [vmem:[%s23208_s4 + $0x18] sm:$0xff] }
  0x15   :  { %93 = vsyncadd [#allocation10], 512  ;;  %v21044_v4 = vld [vmem:[%s23209_s5] sm:$0xff]  ;;  %v21049_v5 = vld [vmem:[%s23209_s5 + $0x8] sm:$0xff]  ;;  %vm205_vm0 = vcmask 130048  }
  0x16   :  { %v21054_v6 = vld [vmem:[%s23209_s5 + $0x10] sm:$0xff]  ;;  %v21059_v7 = vld [vmem:[%s23209_s5 + $0x18] sm:$0xff]  ;;  %v192_v8 = vld [vmem:[#allocation11] sm:$0xff] }
  0x17   :  { %v193_v9 = vld [vmem:[#allocation11 + $0x8] sm:$0xff]  ;;  %v184_v10 = vld [vmem:[%s23204_s0] sm:$0xff]  ;;  %v231_v11 = vand.u32 4294901760, %v192_v8  ;;  %v186_v15 = vld [vmem:[%s23204_s0 + $0x10] sm:$0xff] }
  0x18   :  { %v234_v12 = vand.u32 4294901760, %v193_v9  ;;  %v207_v13 = vsel %vm205_vm0, %v184_v10, 0  ;;  %v185_v14 = vld [vmem:[%s23204_s0 + $0x8] sm:$0xff]  ;;  %v187_v16 = vld [vmem:[%s23204_s0 + $0x18] sm:$0xff]  ;;  %v213_v19 = vsel %vm205_vm0, %v186_v15, 0  ;;  %v188_v21 = vld [vmem:[%s23204_s0 + $0x20] sm:$0xff] }
  0x19   :  { %v21074_v17 = vand.u32 4294901760, %v207_v13  ;;  %v210_v18 = vsel %vm205_vm0, %v185_v14, 0  ;;  %v216_v20 = vsel %vm205_vm0, %v187_v16, 0  ;;  %v379_v24 = vsub.f32 %v192_v8, %v231_v11  ;;  %v189_v26 = vld [vmem:[%s23204_s0 + $0x28] sm:$0xff] }
  0x1a   :  { %v21082_v22 = vpack.c.bf16 %v234_v12, %v231_v11  ;;  %v21084_v23 = vand.u32 4294901760, %v210_v18  ;;  %v386_v25 = vsub.f32 %v193_v9, %v234_v12  ;;  %v21092_v28 = vand.u32 4294901760, %v213_v19 }
  0x1b   :  { %v21090_v27 = vsub.f32 %v207_v13, %v21074_v17  ;;  %v21094_v29 = vand.u32 4294901760, %v216_v20  ;;  %v219_v30 = vsel %vm205_vm0, %v188_v21, 0  ;;  %v380_v32 = vand.u32 4294901760, %v379_v24 }
  0x1c   :  { %19157 = vmatprep.subr.bf16.mxu1 %v21082_v22  ;;  %19169 = vmatprep.subr.bf16.mxu0 %v21082_v22  ;;  %v21100_v31 = vsub.f32 %v210_v18, %v21084_v23  ;;  %v387_v33 = vand.u32 4294901760, %v386_v25  ;;  %v21102_v34 = vand.u32 4294901760, %v219_v30  ;;  %v21108_v36 = vsub.f32 %v213_v19, %v21092_v28 }
  0x1d   :  { %19159 = vmatpush3.bf16.msra.mxu1 %v21082_v22  ;;  %v299_v35 = vand.u32 4294901760, %v21090_v27  ;;  %19171 = vmatpush3.bf16.msra.mxu0 %v21082_v22  ;;  %v21111_v37 = vsub.f32 %v216_v20, %v21094_v29  ;;  %v222_v38 = vsel %vm205_vm0, %v189_v26, 0 }
  0x1e   :  { %142 = vsyncadd [#allocation10 + $0x1], 512  ;;  %v309_v39 = vand.u32 4294901760, %v21100_v31  ;;  %v381_v40 = vsub.f32 %v379_v24, %v380_v32  ;;  %v388_v41 = vsub.f32 %v386_v25, %v387_v33  ;;  %v21116_v42 = vsub.f32 %v219_v30, %v21102_v34  ;;  %v190_v47 = vld [vmem:[%s23204_s0 + $0x30] sm:$0xff]  ;;  %v191_v56 = vld [vmem:[%s23204_s0 + $0x38] sm:$0xff]  ;;  %s20939_s16 = smov 32  }
  0x1f   :  { %v300_v43 = vsub.f32 %v21090_v27, %v299_v35  ;;  %17168 = vmatprep.mubr.f32.mxu0 %v299_v35  ;;  %v319_v44 = vand.u32 4294901760, %v21108_v36  ;;  %v329_v45 = vand.u32 4294901760, %v21111_v37  ;;  %v21121_v46 = vand.u32 4294901760, %v222_v38  ;;  %s20940_s17 = smov [#allocation7]   ;;  %s20941_s5 = smov [#allocation8]  }
  0x20   :  { %v310_v48 = vsub.f32 %v21100_v31, %v309_v39  ;;  %v382_v49 = vand.u32 4294901760, %v381_v40  ;;  %v389_v50 = vand.u32 4294901760, %v388_v41  ;;  %17169 = vmatmul.mubr.f32.vlgmr.msra.gmra.mrb[0].mxu0 %v309_v39  ;;  %v339_v51 = vand.u32 4294901760, %v21116_v42  ;;  %v197_v39 = vld [vmem:[%s23206_s2 + $0x18] sm:$0xff]  ;;  %s151_s18 = sshll.u32 %s20940_s17, 4  ;;  %s163_s19 = sshll.u32 %s20941_s5, 4  ;;  %s152_s18 = int_to_ptr.vmem [resolvable:$true] %s151_s18  ;;  %s164_s19 = int_to_ptr.vmem [resolvable:$true] %s163_s19 }
  0x21   :  { %v301_v52 = vand.u32 4294901760, %v300_v43  ;;  %v320_v53 = vsub.f32 %v21108_v36, %v319_v44  ;;  %v330_v54 = vsub.f32 %v21111_v37, %v329_v45  ;;  %17171 = vmatprep.mubr.f32.mxu0 %v319_v44  ;;  %v21131_v55 = vsub.f32 %v222_v38, %v21121_v46  ;;  %v196_v38 = vld [vmem:[%s23206_s2 + $0x10] sm:$0xff]  ;;  %s20830_s23 = scalar_lea.hbm %s23211_s7, 512 }
  0x22   :  { %v311_v57 = vand.u32 4294901760, %v310_v48  ;;  %v19160_v58 = vpack.c.bf16 %v389_v50, %v382_v49  ;;  %v340_v59 = vsub.f32 %v21116_v42, %v339_v51  ;;  %v225_v60 = vsel %vm205_vm0, %v190_v47, 0  ;;  %p20831_p8 = scmp.ne.s32.totalorder %s23211_s7, %s20830_s23  ;;  %p20834_p9 = scmp.lt.u32.totalorder %s20830_s23, %s23211_s7 }
  0x23   :  { %17120 = vmatprep.mubr.f32.mxu1 %v301_v52  ;;  %v321_v61 = vand.u32 4294901760, %v320_v53  ;;  %v349_v62 = vand.u32 4294901760, %v21131_v55  ;;  %v21139_v63 = vand.u32 4294901760, %v225_v60  ;;  %v331_v8 = vand.u32 4294901760, %v330_v54 }
  0x24   :  { %17121 = vmatmul.mubr.f32.vlgmr.msra.gmra.mrb[0].mxu1 %v311_v57  ;;  %19161 = vmatprep.subr.bf16.mxu1 %v19160_v58  ;;  %v228_v9 = vsel %vm205_vm0, %v191_v56, 0  ;;  %v19172_v10 = vpack.c.bf16 %v387_v33, %v380_v32  ;;  %v19164_v11 = vpack.c.bf16 %v386_v25, %v379_v24  ;;  %v341_v12 = vand.u32 4294901760, %v340_v59  ;;  %v195_v32 = vld [vmem:[%s23206_s2 + $0x8] sm:$0xff]  ;;  %p20836_p10 = pnand %p20834_p9, %p20831_p8 }
  0x25   :  { %19163 = vmatpush3.bf16.msra.mxu1 %v19160_v58  ;;  %17123 = vmatprep.mubr.f32.mxu1 %v321_v61  ;;  %v350_v13 = vsub.f32 %v21131_v55, %v349_v62  ;;  %v21144_v14 = vsub.f32 %v225_v60, %v21139_v63  ;;  %v21146_v15 = vand.u32 4294901760, %v228_v9  ;;  %v20935_v30 = vmov 0.0|0.0   ;;  %v16111_v58 = vld [vmem:[%s23207_s3] ss:$0 sm:$0xff]  ;;  %s20938_s3 = smov 64  }
  0x26   :  { %17172 = vmatmul.mubr.f32.gmra.mrb[2].mxu0 %v329_v45  ;;  %19173 = vmatprep.subr.bf16.mxu0 %v19172_v10  ;;  %v1007_v35 = vand.u32 4294901760, %v195_v32  ;;  %v1010_v40 = vand.u32 4294901760, %v196_v38  ;;  %v1013_v41 = vand.u32 4294901760, %v197_v39  ;;  %vm20936_vm1 = vmmov 0  }
  0x27   :  { %17174 = vmatprep.mubr.f32.mxu0 %v339_v51  ;;  %v359_v16 = vand.u32 4294901760, %v21144_v14  ;;  %v21150_v18 = vsub.f32 %v228_v9, %v21146_v15  ;;  %19175 = vmatpush3.bf16.msra.mxu0 %v19172_v10  ;;  %v351_v19 = vand.u32 4294901760, %v350_v13  ;;  %v20937_v50 = vmov 0.0  }
  0x28   :  { %17124 = vmatmul.mubr.f32.gmra.mrb[2].mxu1 %v331_v8  ;;  %19165 = vmatprep.subr.bf16.mxu1 %v19164_v11  ;;  %v21193_v45 = vsub.f32 %v195_v32, %v1007_v35  ;;  %v1098_v48 = vsub.f32 %v196_v38, %v1010_v40  ;;  %vm999_vm5 = vcmask 261120  }
  0x29   :  { %17126 = vmatprep.mubr.f32.mxu1 %v341_v12  ;;  %v360_v20 = vsub.f32 %v21144_v14, %v359_v16  ;;  %v369_v21 = vand.u32 4294901760, %v21150_v18  ;;  %19177 = vmatprep.subr.bf16.mxu0 %v21082_v22 }
  0x2a   :  { %17175 = vmatmul.mubr.f32.gmra.mrb[4].mxu0 %v349_v62  ;;  %v1092_v47 = vand.u32 4294901760, %v21193_v45 }
  0x2b   :  { %v361_v24 = vand.u32 4294901760, %v360_v20  ;;  %v370_v25 = vsub.f32 %v21150_v18, %v369_v21  ;;  %17177 = vmatprep.mubr.f32.mxu0 %v359_v16 }
  0x2c   :  { %17127 = vmatmul.mubr.f32.gmra.mrb[4].mxu1 %v351_v19 }
  0x2d   :  { %17129 = vmatprep.mubr.f32.mxu1 %v361_v24  ;;  %v371_v26 = vand.u32 4294901760, %v370_v25 }
  0x2e   :  { %17178 = vmatmul.mubr.f32.gmra.mrb[6].mxu0 %v369_v21 }
  0x2f   :  { %17184 = vmatprep.mubr.f32.mxu0 %v21074_v17 }
  0x30   :  { %17130 = vmatmul.mubr.f32.gmra.mrb[6].mxu1 %v371_v26 }
  0x31   :  { %17136 = vmatprep.mubr.f32.mxu1 %v21074_v17 }
  0x32   :  { %17185 = vmatmul.mubr.f32.vlgmr.msra.gmra.mrb[0].mxu0 %v21084_v23 }
  0x33   :  { %17187 = vmatprep.mubr.f32.mxu0 %v21092_v28  ;;  %19179 = vmatpush3.bf16.msra.mxu0 %v21082_v22  ;;  %v194_v22 = vld [vmem:[%s23206_s2] sm:$0xff] }
  0x34   :  { %17137 = vmatmul.mubr.f32.vlgmr.msra.gmra.mrb[0].mxu1 %v21084_v23  ;;  %19252 = vmatprep.subr.bf16.mxu0 %v20935_v30  ;;  %v1004_v33 = vand.u32 4294901760, %v194_v22 }
  0x35   :  { %19167 = vmatpush3.bf16.msra.mxu1 %v19164_v11  ;;  %17139 = vmatprep.mubr.f32.mxu1 %v21092_v28 }
  0x36   :  { %17188 = vmatmul.mubr.f32.gmra.mrb[2].mxu0 %v21094_v29  ;;  %19180 = vmatprep.subr.bf16.mxu1 %v20935_v30  ;;  %v21189_v43 = vpack.c.bf16 %v1007_v35, %v1004_v33  ;;  %v21191_v44 = vsub.f32 %v194_v22, %v1004_v33 }
  0x37   :  { %17190 = vmatprep.mubr.f32.mxu0 %v21102_v34 }
  0x38   :  { %17140 = vmatmul.mubr.f32.gmra.mrb[2].mxu1 %v21094_v29  ;;  %v21239_v54 = vpack.c.bf16 %v21193_v45, %v21191_v44 }
  0x39   :  { %17142 = vmatprep.mubr.f32.mxu1 %v21102_v34 }
  0x3a   :  { %17191 = vmatmul.mubr.f32.gmra.mrb[4].mxu0 %v21121_v46 }
  0x3b   :  { %17193 = vmatprep.mubr.f32.mxu0 %v21139_v63 }
  0x3c   :  { %17143 = vmatmul.mubr.f32.gmra.mrb[4].mxu1 %v21121_v46 }
  0x3d   :  { %17145 = vmatprep.mubr.f32.mxu1 %v21139_v63 }
  0x3e   :  { %17194 = vmatmul.mubr.f32.gmra.mrb[6].mxu0 %v21146_v15 }
  0x3f   :  { %17200 = vmatprep.mubr.f32.mxu0 %v21074_v17  ;;  %v21199_v17 = vpack.c.bf16 %v1013_v41, %v1010_v40 }
  0x40   :  { %17146 = vmatmul.mubr.f32.gmra.mrb[6].mxu1 %v21146_v15 }
  0x41   :  { %17152 = vmatprep.mubr.f32.mxu1 %v21090_v27  ;;  %v1085_v27 = vand.u32 4294901760, %v21191_v44 }
  0x42   :  { %17201 = vmatmul.mubr.f32.vlgmr.msra.gmra.mrb[0].mxu0 %v21084_v23  ;;  %v1105_v23 = vsub.f32 %v197_v39, %v1013_v41 }
  0x43   :  { %17203 = vmatprep.mubr.f32.mxu0 %v21092_v28  ;;  %19254 = vmatpush3.bf16.msra.mxu0 %v21189_v43  ;;  %v1086_v28 = vsub.f32 %v21191_v44, %v1085_v27  ;;  %v21257_v56 = vpack.c.bf16 %v1092_v47, %v1085_v27 }
  0x44   :  { %17153 = vmatmul.mubr.f32.vlgmr.msra.gmra.mrb[0].mxu1 %v21100_v31  ;;  %19255 = vmatprep.subr.bf16.mxu0 %v20935_v30  ;;  %v1093_v31 = vsub.f32 %v21193_v45, %v1092_v47 }
  0x45   :  { %19182 = vmatpush3.bf16.msra.mxu1 %v21189_v43  ;;  %17155 = vmatprep.mubr.f32.mxu1 %v21108_v36  ;;  %v1099_v36 = vand.u32 4294901760, %v1098_v48 }
  0x46   :  { %17204 = vmatmul.mubr.f32.gmra.mrb[2].mxu0 %v21094_v29  ;;  %19183 = vmatprep.subr.bf16.mxu1 %v20935_v30  ;;  %v1106_v29 = vand.u32 4294901760, %v1105_v23 }
  0x47   :  { %17206 = vmatprep.mubr.f32.mxu0 %v21102_v34  ;;  %19257 = vmatpush3.bf16.msra.mxu0 %v21199_v17  ;;  %v1087_v34 = vand.u32 4294901760, %v1086_v28 }
  0x48   :  { %17156 = vmatmul.mubr.f32.gmra.mrb[2].mxu1 %v21111_v37  ;;  %19258 = vmatprep.subr.bf16.mxu0 %v20935_v30  ;;  %v1094_v37 = vand.u32 4294901760, %v1093_v31  ;;  %v1107_v49 = vsub.f32 %v1105_v23, %v1106_v29  ;;  %v21262_v57 = vpack.c.bf16 %v1106_v29, %v1099_v36  ;;  %v179_v31 = vlaneseq }
  0x49   :  { %17158 = vmatprep.mubr.f32.mxu1 %v21116_v42  ;;  %19185 = vmatpush3.bf16.msra.mxu1 %v21199_v17  ;;  %v1100_v42 = vsub.f32 %v1098_v48, %v1099_v36 }
  0x4a   :  { %17207 = vmatmul.mubr.f32.gmra.mrb[4].mxu0 %v21121_v46  ;;  %19186 = vmatprep.subr.bf16.mxu1 %v20935_v30  ;;  %v21227_v46 = vpack.c.bf16 %v1094_v37, %v1087_v34  ;;  %v1108_v52 = vand.u32 4294901760, %v1107_v49  ;;  %v21300_v36 = vand.u32 127, %v179_v31 }
  0x4b   :  { %17209 = vmatprep.mubr.f32.mxu0 %v21139_v63  ;;  %v1101_v51 = vand.u32 4294901760, %v1100_v42 }
  0x4c   :  { %17159 = vmatmul.mubr.f32.gmra.mrb[4].mxu1 %v21131_v55  ;;  %v21244_v55 = vpack.c.bf16 %v1105_v23, %v1098_v48  ;;  %vm181_vm2 = vcmp.ge.s32.totalorder %v21300_v36, 64  ;;  %vm182_vm3 = vcmp.lt.s32.totalorder %v21300_v36, 96 }
  0x4d   :  { %17161 = vmatprep.mubr.f32.mxu1 %v21144_v14  ;;  %v21231_v53 = vpack.c.bf16 %v1108_v52, %v1101_v51  ;;  %vm21304_vm4 = vmand %vm181_vm2, %vm182_vm3 }
  0x4e   :  { %17210 = vmatmul.mubr.f32.gmra.mrb[6].mxu0 %v21146_v15 }
  0x4f   :  { %17352 = vmatprep.mubr.msk.f32.mxu0 %vm20936_vm1, %v20937_v50 }
  0x50   :  { %17162 = vmatmul.mubr.f32.gmra.mrb[6].mxu1 %v21150_v18 }
  0x51   :  { %17220 = vmatprep.mubr.msk.f32.mxu1 %vm20936_vm1, %v20937_v50 }
  0x54   :  { %17221 = vmatmul.mubr.f32.vlgmr.msra.gmra.mrb[8].mxu1 %v20937_v50 }
  0x55   :  { %19188 = vmatpush3.bf16.msra.mxu1 %v21227_v46  ;;  %17231 = vmatprep.mubr.msk.f32.mxu1 %vm20936_vm1, %v20937_v50 }
  0x56   :  { %19189 = vmatprep.subr.bf16.mxu1 %v20935_v30 }
  0x59   :  { %19191 = vmatpush3.bf16.msra.mxu1 %v21231_v53 }
  0x5a   :  { %19192 = vmatprep.subr.bf16.mxu1 %v20935_v30 }
  0x5c   :  { %17232 = vmatmul.mubr.f32.vlgmr.msra.gmra.mrb[8].mxu1 %v20937_v50 }
  0x5d   :  { %19194 = vmatpush3.bf16.msra.mxu1 %v21239_v54  ;;  %17242 = vmatprep.mubr.msk.f32.mxu1 %vm20936_vm1, %v20937_v50 }
  0x5e   :  { %19195 = vmatprep.subr.bf16.mxu1 %v20935_v30 }
  0x61   :  { %19197 = vmatpush3.bf16.msra.mxu1 %v21244_v55 }
  0x62   :  { %19198 = vmatprep.subr.bf16.mxu1 %v20935_v30 }
  0x64   :  { %17243 = vmatmul.mubr.f32.vlgmr.msra.gmra.mrb[8].mxu1 %v20937_v50 }
  0x65   :  { %19200 = vmatpush3.bf16.msra.mxu1 %v21189_v43  ;;  %17253 = vmatprep.mubr.msk.f32.mxu1 %vm20936_vm1, %v20937_v50 }
  0x66   :  { %19201 = vmatprep.subr.bf16.mxu1 %v20935_v30 }
  0x69   :  { %19203 = vmatpush3.bf16.msra.mxu1 %v21199_v17 }
  0x6a   :  { %19204 = vmatprep.subr.bf16.mxu1 %v20935_v30 }
  0x6c   :  { %17254 = vmatmul.mubr.f32.vlgmr.msra.gmra.mrb[8].mxu1 %v20937_v50 }
  0x6d   :  { %19206 = vmatpush3.bf16.msra.mxu1 %v21257_v56  ;;  %17264 = vmatprep.mubr.msk.f32.mxu1 %vm20936_vm1, %v20937_v50 }
  0x6e   :  { %19207 = vmatprep.subr.bf16.mxu1 %v20935_v30 }
  0x71   :  { %19209 = vmatpush3.bf16.msra.mxu1 %v21262_v57 }
  0x72   :  { %19210 = vmatprep.subr.bf16.mxu1 %v20935_v30 }
  0x74   :  { %17265 = vmatmul.mubr.f32.vlgmr.msra.gmra.mrb[8].mxu1 %v20937_v50 }
  0x75   :  { %19212 = vmatpush3.bf16.msra.mxu1 %v21189_v43  ;;  %17275 = vmatprep.mubr.msk.f32.mxu1 %vm20936_vm1, %v20937_v50 }
  0x76   :  { %19213 = vmatprep.subr.bf16.mxu1 %v20935_v30 }
  0x79   :  { %19215 = vmatpush3.bf16.msra.mxu1 %v21199_v17 }
  0x7a   :  { %19216 = vmatprep.subr.bf16.mxu1 %v20935_v30 }
  0x7c   :  { %17276 = vmatmul.mubr.f32.vlgmr.msra.gmra.mrb[8].mxu1 %v20937_v50 }
  0x7d   :  { %19218 = vmatpush3.bf16.msra.mxu1 %v21189_v43  ;;  %17286 = vmatprep.mubr.msk.f32.mxu1 %vm20936_vm1, %v20937_v50 }
  0x7e   :  { %19219 = vmatprep.subr.bf16.mxu1 %v20935_v30 }
  0x81   :  { %19221 = vmatpush3.bf16.msra.mxu1 %v21199_v17 }
  0x82   :  { %19222 = vmatprep.subr.bf16.mxu1 %v20935_v30 }
 0x115   :  { %v17202_v59 = vpop.f32.mrb[0].mxu0 }
 0x116   :  { %v944_v60 = vpop.f32.mrb[1].mxu0 }
 0x117   :  { %v17154_v61 = vpop.f32.mrb[0].mxu1 }
 0x118   :  { %v20188_v62 = vadd.f32 %v17154_v61, %v16111_v58  ;;  %v572_v63 = vpop.f32.mrb[1].mxu1 }
 0x119   :  { %v20190_v8 = vadd.f32 %v16111_v58, %v572_v63  ;;  %v17205_v9 = vpop.f32.mrb[2].mxu0 }
 0x11a   :  { %v21286_v10 = vadd.f32 %v20188_v62, %v17202_v59  ;;  %v956_v11 = vpop.f32.mrb[3].mxu0 }
 0x11b   :  { %v20191_v12 = vadd.f32 %v20190_v8, %v944_v60  ;;  %v17157_v13 = vpop.f32.mrb[2].mxu1 }
 0x11c   :  { %v20192_v14 = vadd.f32 %v17157_v13, %v16111_v58  ;;  %v586_v15 = vpop.f32.mrb[3].mxu1 }
 0x11d   :  { %v20194_v16 = vadd.f32 %v16111_v58, %v586_v15  ;;  %v17208_v18 = vpop.f32.mrb[4].mxu0 }
 0x11e   :  { %v21288_v19 = vadd.f32 %v20192_v14, %v17205_v9  ;;  %v968_v20 = vpop.f32.mrb[5].mxu0 }
 0x11f   :  { %v21290_v21 = vadd.f32 %v20194_v16, %v956_v11  ;;  %v17160_v24 = vpop.f32.mrb[4].mxu1 }
 0x120   :  { %v20196_v25 = vadd.f32 %v17160_v24, %v16111_v58  ;;  %v600_v26 = vpop.f32.mrb[5].mxu1 }
 0x121   :  { %v20198_v22 = vadd.f32 %v16111_v58, %v600_v26  ;;  %v17211_v32 = vpop.f32.mrb[6].mxu0 }
 0x122   :  { %v21292_v33 = vadd.f32 %v20196_v25, %v17208_v18  ;;  %v980_v35 = vpop.f32.mrb[7].mxu0 }
 0x123   :  { %v21294_v38 = vadd.f32 %v20198_v22, %v968_v20  ;;  %v17163_v39 = vpop.f32.mrb[6].mxu1 }
 0x124   :  { %v20200_v40 = vadd.f32 %v17163_v39, %v16111_v58  ;;  %v614_v41 = vpop.f32.mrb[7].mxu1 }
 0x125   :  { %v20202_v44 = vadd.f32 %v16111_v58, %v614_v41 }
 0x126   :  { %v21296_v45 = vadd.f32 %v20200_v40, %v17211_v32 }
 0x127   :  { %v21298_v27 = vadd.f32 %v20202_v44, %v980_v35 }
 0x14f   :  { %v1484_v47 = vpop.f32.mrb[8].mxu1 }
 0x150   :  { %v1488_v48 = vadd.f32 %v20191_v12, %v1484_v47  ;;  %v17277_v23 = vpop.f32.mrb[9].mxu1 }
 0x152   :  { %v1490_v28 = vmul.f32 0.5, %v1488_v48 }
 0x154   :  { %20632 = vtanh.f32 %v1490_v28 }
 0x155   :  { %20634 = vtanh.f32 %v1488_v48 }
 0x15e   :  { %v20633_v29 = vpop.eup %20632 }
 0x15f   :  { %v1492_v34 = vmul.f32 0.5, %v20633_v29  ;;  %v20635_v49 = vpop.eup %20634 }
 0x161   :  { %v1493_v42 = vadd.f32 0.5, %v1492_v34 }
 0x163   :  { %v1494_v51 = vsel %vm21304_vm4, %v20635_v49, %v1493_v42 }
 0x164   :  { %1497 = vrot.lane.b32.xlu0 %v1494_v51, %s20938_s3  ;;  %v1495_v59 = vmul.f32 0.0, %v1494_v51 }
 0x1d6   :  { %v1498_v52 = vpop.permute.xlu0 %1497 }
 0x1d7   :  { %v1500_v58 = vmul.f32 %v1498_v52, %v1494_v51 }
 0x1d9   :  { %1502 = vrot.lane.b32.xlu0 %v1500_v58, %s20939_s16 }
 0x24b   :  { %v1503_v60 = vpop.permute.xlu0 %1502 }
 0x24c   :  { %v21312_v61 = vadd.f32 %v1503_v60, %v1495_v59 }
 0x24e   :  { %20636 = vtanh.f32 %v21312_v61 }
 0x258   :  { %v20637_v62 = vpop.eup %20636 }
 0x259   :  { %1508 = vrot.lane.b32.xlu1 %v20637_v62, %s20938_s3 }
 0x2cb   :  { %v1509_v63 = vpop.permute.xlu1 %1508 }
 0x2cc   :  { %v1511_v8 = vmul.f32 %v1509_v63, %v1494_v51 }
 0x2ce   :  { %1513 = vrot.lane.b32.xlu1 %v1511_v8, %s20939_s16 }
 0x340   :  { %v1514_v9 = vpop.permute.xlu1 %1513 }
 0x341   :  { %1516 = vst.msk [vmem:[#allocation3] sm:$0xff] %vm999_vm5, %v1514_v9  ;;  %v1519_v11 = vsel %vm999_vm5, %v1514_v9, 0 }
 0x342   :  { %v1590_v12 = vand.u32 4294901760, %v1519_v11 }
 0x344   :  { %v1591_v13 = vsub.f32 %v1519_v11, %v1590_v12 }
 0x346   :  { %v1592_v14 = vand.u32 4294901760, %v1591_v13 }
 0x348   :  { %v1593_v15 = vsub.f32 %v1591_v13, %v1592_v14 }
 0x34a   :  { %v1594_v16 = vand.u32 4294901760, %v1593_v15 }
 0x34c   :  { %17287 = vmatmul.mubr.f32.vlgmr.msra.gmra.mrb[10].mxu1 %v1594_v16 }
 0x34d   :  { %19224 = vmatpush3.bf16.msra.mxu1 %v21227_v46  ;;  %17297 = vmatprep.mubr.msk.f32.mxu1 %vm20936_vm1, %v20937_v50 }
 0x34e   :  { %19225 = vmatprep.subr.bf16.mxu1 %v20935_v30 }
 0x351   :  { %19227 = vmatpush3.bf16.msra.mxu1 %v21231_v53 }
 0x352   :  { %19228 = vmatprep.subr.bf16.mxu1 %v20935_v30 }
 0x354   :  { %17298 = vmatmul.mubr.f32.vlgmr.msra.gmra.mrb[10].mxu1 %v1590_v12 }
 0x355   :  { %19230 = vmatpush3.bf16.msra.mxu1 %v21239_v54  ;;  %17308 = vmatprep.mubr.msk.f32.mxu1 %vm20936_vm1, %v20937_v50 }
 0x356   :  { %19231 = vmatprep.subr.bf16.mxu1 %v20935_v30 }
 0x359   :  { %19233 = vmatpush3.bf16.msra.mxu1 %v21244_v55 }
 0x35a   :  { %19234 = vmatprep.subr.bf16.mxu1 %v20935_v30 }
 0x35c   :  { %17309 = vmatmul.mubr.f32.vlgmr.msra.gmra.mrb[10].mxu1 %v1591_v13 }
 0x35d   :  { %19236 = vmatpush3.bf16.msra.mxu1 %v21189_v43  ;;  %17319 = vmatprep.mubr.msk.f32.mxu1 %vm20936_vm1, %v20937_v50 }
 0x35e   :  { %19237 = vmatprep.subr.bf16.mxu1 %v20935_v30 }
 0x361   :  { %19239 = vmatpush3.bf16.msra.mxu1 %v21199_v17 }
 0x362   :  { %19240 = vmatprep.subr.bf16.mxu1 %v20935_v30 }
 0x364   :  { %17320 = vmatmul.mubr.f32.vlgmr.msra.gmra.mrb[10].mxu1 %v1592_v14 }
 0x365   :  { %19242 = vmatpush3.bf16.msra.mxu1 %v21257_v56  ;;  %17330 = vmatprep.mubr.msk.f32.mxu1 %vm20936_vm1, %v20937_v50 }
 0x366   :  { %19243 = vmatprep.subr.bf16.mxu1 %v20935_v30 }
 0x369   :  { %19245 = vmatpush3.bf16.msra.mxu1 %v21262_v57 }
 0x36a   :  { %19246 = vmatprep.subr.bf16.mxu1 %v20935_v30 }
 0x36c   :  { %17331 = vmatmul.mubr.f32.vlgmr.msra.gmra.mrb[10].mxu1 %v1590_v12 }
 0x36d   :  { %19248 = vmatpush3.bf16.msra.mxu1 %v21189_v43  ;;  %17341 = vmatprep.mubr.msk.f32.mxu1 %vm20936_vm1, %v20937_v50 }
 0x36e   :  { %19249 = vmatprep.subr.bf16.mxu1 %v20935_v30 }
 0x371   :  { %19251 = vmatpush3.bf16.msra.mxu1 %v21199_v17 }
 0x372   :  { %19288 = vmatprep.subr.bf16.mxu1 %v20935_v30 }
 0x374   :  { %17342 = vmatmul.mubr.f32.vlgmr.msra.gmra.mrb[10].mxu1 %v1590_v12 }
 0x375   :  { %19290 = vmatpush3.bf16.msra.mxu1 %v21189_v43  ;;  %17418 = vmatprep.mubr.msk.f32.mxu1 %vm20936_vm1, %v20937_v50 }
 0x376   :  { %19291 = vmatprep.subr.bf16.mxu1 %v20935_v30 }
 0x379   :  { %19293 = vmatpush3.bf16.msra.mxu1 %v21199_v17 }
 0x37a   :  { %19294 = vmatprep.subr.bf16.mxu1 %v20935_v30 }
 0x447   :  { %v2002_v18 = vpop.f32.mrb[10].mxu1 }
 0x448   :  { %v2006_v20 = vadd.f32 %v21286_v10, %v2002_v18  ;;  %v17343_v24 = vpop.f32.mrb[11].mxu1 }
 0x44a   :  { %v2008_v25 = vmul.f32 0.5, %v2006_v20 }
 0x44c   :  { %20638 = vtanh.f32 %v2008_v25 }
 0x44d   :  { %20640 = vtanh.f32 %v2006_v20 }
 0x456   :  { %v20639_v26 = vpop.eup %20638 }
 0x457   :  { %v2010_v22 = vmul.f32 0.5, %v20639_v26  ;;  %v20641_v35 = vpop.eup %20640 }
 0x459   :  { %v2011_v32 = vadd.f32 0.5, %v2010_v22 }
 0x45b   :  { %v2012_v39 = vsel %vm21304_vm4, %v20641_v35, %v2011_v32 }
 0x45c   :  { %2015 = vrot.lane.b32.xlu0 %v2012_v39, %s20938_s3  ;;  %v2013_v44 = vmul.f32 %v2012_v39, %v21312_v61 }
 0x4ce   :  { %v2016_v40 = vpop.permute.xlu0 %2015 }
 0x4cf   :  { %v2018_v41 = vmul.f32 %v2016_v40, %v2012_v39 }
 0x4d1   :  { %2020 = vrot.lane.b32.xlu1 %v2018_v41, %s20939_s16 }
 0x543   :  { %v2021_v10 = vpop.permute.xlu1 %2020 }
 0x544   :  { %v21361_v47 = vadd.f32 %v2021_v10, %v2013_v44 }
 0x546   :  { %20642 = vtanh.f32 %v21361_v47 }
 0x550   :  { %v20643_v48 = vpop.eup %20642 }
 0x551   :  { %2026 = vrot.lane.b32.xlu0 %v20643_v48, %s20938_s3 }
 0x5c3   :  { %v2027_v23 = vpop.permute.xlu0 %2026 }
 0x5c4   :  { %v2029_v28 = vmul.f32 %v2027_v23, %v2012_v39 }
 0x5c6   :  { %2031 = vrot.lane.b32.xlu1 %v2029_v28, %s20939_s16 }
 0x638   :  { %v2032_v31 = vpop.permute.xlu1 %2031 }
 0x639   :  { %2035 = vst.msk [vmem:[#allocation3 + $0x8] sm:$0xff] %vm999_vm5, %v2032_v31  ;;  %v2038_v29 = vsel %vm999_vm5, %v2032_v31, 0 }
 0x63a   :  { %v2109_v34 = vand.u32 4294901760, %v2038_v29 }
 0x63c   :  { %v2110_v42 = vsub.f32 %v2038_v29, %v2109_v34 }
 0x63e   :  { %v2111_v49 = vand.u32 4294901760, %v2110_v42 }
 0x640   :  { %v2112_v51 = vsub.f32 %v2110_v42, %v2111_v49 }
 0x642   :  { %v2113_v52 = vand.u32 4294901760, %v2112_v51 }
 0x644   :  { %17353 = vmatmul.mubr.f32.vlgmr.msra.gmra.mrb[8].mxu0 %v2113_v52 }
 0x645   :  { %19260 = vmatpush3.bf16.msra.mxu0 %v21227_v46  ;;  %17363 = vmatprep.mubr.msk.f32.mxu0 %vm20936_vm1, %v20937_v50 }
 0x646   :  { %19261 = vmatprep.subr.bf16.mxu0 %v20935_v30 }
 0x649   :  { %19263 = vmatpush3.bf16.msra.mxu0 %v21231_v53 }
 0x64a   :  { %19264 = vmatprep.subr.bf16.mxu0 %v20935_v30 }
 0x64c   :  { %17364 = vmatmul.mubr.f32.vlgmr.msra.gmra.mrb[8].mxu0 %v2109_v34 }
 0x64d   :  { %19266 = vmatpush3.bf16.msra.mxu0 %v21239_v54  ;;  %17374 = vmatprep.mubr.msk.f32.mxu0 %vm20936_vm1, %v20937_v50 }
 0x64e   :  { %19267 = vmatprep.subr.bf16.mxu0 %v20935_v30 }
 0x651   :  { %19269 = vmatpush3.bf16.msra.mxu0 %v21244_v55 }
 0x652   :  { %19270 = vmatprep.subr.bf16.mxu0 %v20935_v30 }
 0x654   :  { %17375 = vmatmul.mubr.f32.vlgmr.msra.gmra.mrb[8].mxu0 %v2110_v42 }
 0x655   :  { %19272 = vmatpush3.bf16.msra.mxu0 %v21189_v43  ;;  %17385 = vmatprep.mubr.msk.f32.mxu0 %vm20936_vm1, %v20937_v50 }
 0x656   :  { %19273 = vmatprep.subr.bf16.mxu0 %v20935_v30 }
 0x659   :  { %19275 = vmatpush3.bf16.msra.mxu0 %v21199_v17 }
 0x65a   :  { %19276 = vmatprep.subr.bf16.mxu0 %v20935_v30 }
 0x65c   :  { %17386 = vmatmul.mubr.f32.vlgmr.msra.gmra.mrb[8].mxu0 %v2111_v49 }
 0x65d   :  { %19278 = vmatpush3.bf16.msra.mxu0 %v21257_v56  ;;  %17396 = vmatprep.mubr.msk.f32.mxu0 %vm20936_vm1, %v20937_v50 }
 0x65e   :  { %19279 = vmatprep.subr.bf16.mxu0 %v20935_v30 }
 0x661   :  { %19281 = vmatpush3.bf16.msra.mxu0 %v21262_v57 }
 0x662   :  { %19282 = vmatprep.subr.bf16.mxu0 %v20935_v30 }
 0x664   :  { %17397 = vmatmul.mubr.f32.vlgmr.msra.gmra.mrb[8].mxu0 %v2109_v34 }
 0x665   :  { %19284 = vmatpush3.bf16.msra.mxu0 %v21189_v43  ;;  %17407 = vmatprep.mubr.msk.f32.mxu0 %vm20936_vm1, %v20937_v50 }
 0x666   :  { %19285 = vmatprep.subr.bf16.mxu0 %v20935_v30 }
 0x669   :  { %19287 = vmatpush3.bf16.msra.mxu0 %v21199_v17 }
 0x66a   :  { %19324 = vmatprep.subr.bf16.mxu0 %v20935_v30 }
 0x66c   :  { %17408 = vmatmul.mubr.f32.vlgmr.msra.gmra.mrb[8].mxu0 %v2109_v34 }
 0x66d   :  { %19326 = vmatpush3.bf16.msra.mxu0 %v21189_v43  ;;  %17484 = vmatprep.mubr.msk.f32.mxu0 %vm20936_vm1, %v20937_v50 }
 0x66e   :  { %19327 = vmatprep.subr.bf16.mxu0 %v20935_v30 }
 0x671   :  { %19329 = vmatpush3.bf16.msra.mxu0 %v21199_v17 }
 0x672   :  { %19330 = vmatprep.subr.bf16.mxu0 %v20935_v30 }
 0x73f   :  { %v2521_v58 = vpop.f32.mrb[8].mxu0 }
 0x740   :  { %v2525_v59 = vadd.f32 %v21290_v21, %v2521_v58  ;;  %v17409_v60 = vpop.f32.mrb[9].mxu0 }
 0x742   :  { %v2527_v61 = vmul.f32 0.5, %v2525_v59 }
 0x744   :  { %20644 = vtanh.f32 %v2527_v61 }
 0x745   :  { %20646 = vtanh.f32 %v2525_v59 }
 0x74e   :  { %v20645_v62 = vpop.eup %20644 }
 0x74f   :  { %v2529_v63 = vmul.f32 0.5, %v20645_v62  ;;  %v20647_v9 = vpop.eup %20646 }
 0x751   :  { %v2530_v8 = vadd.f32 0.5, %v2529_v63 }
 0x753   :  { %v2531_v11 = vsel %vm21304_vm4, %v20647_v9, %v2530_v8 }
 0x754   :  { %2534 = vrot.lane.b32.xlu0 %v2531_v11, %s20938_s3  ;;  %v2532_v14 = vmul.f32 %v2531_v11, %v21361_v47 }
 0x7c6   :  { %v2535_v12 = vpop.permute.xlu0 %2534 }
 0x7c7   :  { %v2537_v13 = vmul.f32 %v2535_v12, %v2531_v11 }
 0x7c9   :  { %2539 = vrot.lane.b32.xlu1 %v2537_v13, %s20939_s16 }
 0x83b   :  { %v2540_v21 = vpop.permute.xlu1 %2539 }
 0x83c   :  { %v21410_v15 = vadd.f32 %v2540_v21, %v2532_v14 }
 0x83e   :  { %20648 = vtanh.f32 %v21410_v15 }
 0x848   :  { %v20649_v16 = vpop.eup %20648 }
 0x849   :  { %2545 = vrot.lane.b32.xlu0 %v20649_v16, %s20938_s3 }
 0x8bb   :  { %v2546_v18 = vpop.permute.xlu0 %2545 }
 0x8bc   :  { %v2548_v20 = vmul.f32 %v2546_v18, %v2531_v11 }
 0x8be   :  { %2550 = vrot.lane.b32.xlu1 %v2548_v20, %s20939_s16 }
 0x930   :  { %v2551_v24 = vpop.permute.xlu1 %2550 }
 0x931   :  { %2554 = vst.msk [vmem:[#allocation3 + $0x10] sm:$0xff] %vm999_vm5, %v2551_v24  ;;  %v2557_v25 = vsel %vm999_vm5, %v2551_v24, 0 }
 0x932   :  { %v2628_v26 = vand.u32 4294901760, %v2557_v25 }
 0x934   :  { %v2629_v22 = vsub.f32 %v2557_v25, %v2628_v26 }
 0x936   :  { %v2630_v32 = vand.u32 4294901760, %v2629_v22 }
 0x938   :  { %v2631_v35 = vsub.f32 %v2629_v22, %v2630_v32 }
 0x93a   :  { %v2632_v39 = vand.u32 4294901760, %v2631_v35 }
 0x93c   :  { %17419 = vmatmul.mubr.f32.vlgmr.msra.gmra.mrb[12].mxu1 %v2632_v39 }
 0x93d   :  { %19296 = vmatpush3.bf16.msra.mxu1 %v21227_v46  ;;  %17429 = vmatprep.mubr.msk.f32.mxu1 %vm20936_vm1, %v20937_v50 }
 0x93e   :  { %19297 = vmatprep.subr.bf16.mxu1 %v20935_v30 }
 0x941   :  { %19299 = vmatpush3.bf16.msra.mxu1 %v21231_v53 }
 0x942   :  { %19300 = vmatprep.subr.bf16.mxu1 %v20935_v30 }
 0x944   :  { %17430 = vmatmul.mubr.f32.vlgmr.msra.gmra.mrb[12].mxu1 %v2628_v26 }
 0x945   :  { %19302 = vmatpush3.bf16.msra.mxu1 %v21239_v54  ;;  %17440 = vmatprep.mubr.msk.f32.mxu1 %vm20936_vm1, %v20937_v50 }
 0x946   :  { %19303 = vmatprep.subr.bf16.mxu1 %v20935_v30 }
 0x949   :  { %19305 = vmatpush3.bf16.msra.mxu1 %v21244_v55 }
 0x94a   :  { %19306 = vmatprep.subr.bf16.mxu1 %v20935_v30 }
 0x94c   :  { %17441 = vmatmul.mubr.f32.vlgmr.msra.gmra.mrb[12].mxu1 %v2629_v22 }
 0x94d   :  { %19308 = vmatpush3.bf16.msra.mxu1 %v21189_v43  ;;  %17451 = vmatprep.mubr.msk.f32.mxu1 %vm20936_vm1, %v20937_v50 }
 0x94e   :  { %19309 = vmatprep.subr.bf16.mxu1 %v20935_v30 }
 0x951   :  { %19311 = vmatpush3.bf16.msra.mxu1 %v21199_v17 }
 0x952   :  { %19312 = vmatprep.subr.bf16.mxu1 %v20935_v30 }
 0x954   :  { %17452 = vmatmul.mubr.f32.vlgmr.msra.gmra.mrb[12].mxu1 %v2630_v32 }
 0x955   :  { %19314 = vmatpush3.bf16.msra.mxu1 %v21257_v56  ;;  %17462 = vmatprep.mubr.msk.f32.mxu1 %vm20936_vm1, %v20937_v50 }
 0x956   :  { %19315 = vmatprep.subr.bf16.mxu1 %v20935_v30 }
 0x959   :  { %19317 = vmatpush3.bf16.msra.mxu1 %v21262_v57 }
 0x95a   :  { %19318 = vmatprep.subr.bf16.mxu1 %v20935_v30 }
 0x95c   :  { %17463 = vmatmul.mubr.f32.vlgmr.msra.gmra.mrb[12].mxu1 %v2628_v26 }
 0x95d   :  { %19320 = vmatpush3.bf16.msra.mxu1 %v21189_v43  ;;  %17473 = vmatprep.mubr.msk.f32.mxu1 %vm20936_vm1, %v20937_v50 }
 0x95e   :  { %19321 = vmatprep.subr.bf16.mxu1 %v20935_v30 }
 0x961   :  { %19323 = vmatpush3.bf16.msra.mxu1 %v21199_v17 }
 0x962   :  { %19360 = vmatprep.subr.bf16.mxu1 %v20935_v30 }
 0x964   :  { %17474 = vmatmul.mubr.f32.vlgmr.msra.gmra.mrb[12].mxu1 %v2628_v26 }
 0x965   :  { %19362 = vmatpush3.bf16.msra.mxu1 %v21189_v43  ;;  %17550 = vmatprep.mubr.msk.f32.mxu1 %vm20936_vm1, %v20937_v50 }
 0x966   :  { %19363 = vmatprep.subr.bf16.mxu1 %v20935_v30 }
 0x969   :  { %19365 = vmatpush3.bf16.msra.mxu1 %v21199_v17 }
 0x96a   :  { %19366 = vmatprep.subr.bf16.mxu1 %v20935_v30 }
 0xa37   :  { %v3040_v40 = vpop.f32.mrb[12].mxu1 }
 0xa38   :  { %v3044_v41 = vadd.f32 %v21288_v19, %v3040_v40  ;;  %v17475_v44 = vpop.f32.mrb[13].mxu1 }
 0xa3a   :  { %v3046_v10 = vmul.f32 0.5, %v3044_v41 }
 0xa3c   :  { %20650 = vtanh.f32 %v3046_v10 }
 0xa3d   :  { %20652 = vtanh.f32 %v3044_v41 }
 0xa46   :  { %v20651_v47 = vpop.eup %20650 }
 0xa47   :  { %v3048_v48 = vmul.f32 0.5, %v20651_v47  ;;  %v20653_v28 = vpop.eup %20652 }
 0xa49   :  { %v3049_v23 = vadd.f32 0.5, %v3048_v48 }
 0xa4b   :  { %v3050_v31 = vsel %vm21304_vm4, %v20653_v28, %v3049_v23 }
 0xa4c   :  { %3053 = vrot.lane.b32.xlu0 %v3050_v31, %s20938_s3  ;;  %v3051_v42 = vmul.f32 %v3050_v31, %v21410_v15 }
 0xabe   :  { %v3054_v29 = vpop.permute.xlu0 %3053 }
 0xabf   :  { %v3056_v34 = vmul.f32 %v3054_v29, %v3050_v31 }
 0xac1   :  { %3058 = vrot.lane.b32.xlu1 %v3056_v34, %s20939_s16 }
 0xb33   :  { %v3059_v19 = vpop.permute.xlu1 %3058 }
 0xb34   :  { %v21459_v49 = vadd.f32 %v3059_v19, %v3051_v42 }
 0xb36   :  { %20654 = vtanh.f32 %v21459_v49 }
 0xb40   :  { %v20655_v51 = vpop.eup %20654 }
 0xb41   :  { %3064 = vrot.lane.b32.xlu0 %v20655_v51, %s20938_s3 }
 0xbb3   :  { %v3065_v52 = vpop.permute.xlu0 %3064 }
 0xbb4   :  { %v3067_v58 = vmul.f32 %v3065_v52, %v3050_v31 }
 0xbb6   :  { %3069 = vrot.lane.b32.xlu1 %v3067_v58, %s20939_s16 }
 0xc28   :  { %v3070_v59 = vpop.permute.xlu1 %3069 }
 0xc29   :  { %3073 = vst.msk [vmem:[#allocation3 + $0x18] sm:$0xff] %vm999_vm5, %v3070_v59  ;;  %v3076_v60 = vsel %vm999_vm5, %v3070_v59, 0 }
 0xc2a   :  { %v3147_v61 = vand.u32 4294901760, %v3076_v60 }
 0xc2c   :  { %v3148_v62 = vsub.f32 %v3076_v60, %v3147_v61 }
 0xc2e   :  { %v3149_v63 = vand.u32 4294901760, %v3148_v62 }
 0xc30   :  { %v3150_v8 = vsub.f32 %v3148_v62, %v3149_v63 }
 0xc32   :  { %v3151_v9 = vand.u32 4294901760, %v3150_v8 }
 0xc34   :  { %17485 = vmatmul.mubr.f32.vlgmr.msra.gmra.mrb[10].mxu0 %v3151_v9 }
 0xc35   :  { %19332 = vmatpush3.bf16.msra.mxu0 %v21227_v46  ;;  %17495 = vmatprep.mubr.msk.f32.mxu0 %vm20936_vm1, %v20937_v50 }
 0xc36   :  { %19333 = vmatprep.subr.bf16.mxu0 %v20935_v30 }
 0xc39   :  { %19335 = vmatpush3.bf16.msra.mxu0 %v21231_v53 }
 0xc3a   :  { %19336 = vmatprep.subr.bf16.mxu0 %v20935_v30 }
 0xc3c   :  { %17496 = vmatmul.mubr.f32.vlgmr.msra.gmra.mrb[10].mxu0 %v3147_v61 }
 0xc3d   :  { %19338 = vmatpush3.bf16.msra.mxu0 %v21239_v54  ;;  %17506 = vmatprep.mubr.msk.f32.mxu0 %vm20936_vm1, %v20937_v50 }
 0xc3e   :  { %19339 = vmatprep.subr.bf16.mxu0 %v20935_v30 }
 0xc41   :  { %19341 = vmatpush3.bf16.msra.mxu0 %v21244_v55 }
 0xc42   :  { %19342 = vmatprep.subr.bf16.mxu0 %v20935_v30 }
 0xc44   :  { %17507 = vmatmul.mubr.f32.vlgmr.msra.gmra.mrb[10].mxu0 %v3148_v62 }
 0xc45   :  { %19344 = vmatpush3.bf16.msra.mxu0 %v21189_v43  ;;  %17517 = vmatprep.mubr.msk.f32.mxu0 %vm20936_vm1, %v20937_v50 }
 0xc46   :  { %19345 = vmatprep.subr.bf16.mxu0 %v20935_v30 }
 0xc49   :  { %19347 = vmatpush3.bf16.msra.mxu0 %v21199_v17 }
 0xc4a   :  { %19348 = vmatprep.subr.bf16.mxu0 %v20935_v30 }
 0xc4c   :  { %17518 = vmatmul.mubr.f32.vlgmr.msra.gmra.mrb[10].mxu0 %v3149_v63 }
 0xc4d   :  { %19350 = vmatpush3.bf16.msra.mxu0 %v21257_v56  ;;  %17528 = vmatprep.mubr.msk.f32.mxu0 %vm20936_vm1, %v20937_v50 }
 0xc4e   :  { %19351 = vmatprep.subr.bf16.mxu0 %v20935_v30 }
 0xc51   :  { %19353 = vmatpush3.bf16.msra.mxu0 %v21262_v57 }
 0xc52   :  { %19354 = vmatprep.subr.bf16.mxu0 %v20935_v30 }
 0xc54   :  { %17529 = vmatmul.mubr.f32.vlgmr.msra.gmra.mrb[10].mxu0 %v3147_v61 }
 0xc55   :  { %19356 = vmatpush3.bf16.msra.mxu0 %v21189_v43  ;;  %17539 = vmatprep.mubr.msk.f32.mxu0 %vm20936_vm1, %v20937_v50 }
 0xc56   :  { %19357 = vmatprep.subr.bf16.mxu0 %v20935_v30 }
 0xc59   :  { %19359 = vmatpush3.bf16.msra.mxu0 %v21199_v17 }
 0xc5a   :  { %19396 = vmatprep.subr.bf16.mxu0 %v20935_v30 }
 0xc5c   :  { %17540 = vmatmul.mubr.f32.vlgmr.msra.gmra.mrb[10].mxu0 %v3147_v61 }
 0xc5d   :  { %19398 = vmatpush3.bf16.msra.mxu0 %v21189_v43  ;;  %17616 = vmatprep.mubr.msk.f32.mxu0 %vm20936_vm1, %v20937_v50 }
 0xc5e   :  { %19399 = vmatprep.subr.bf16.mxu0 %v20935_v30 }
 0xc61   :  { %19401 = vmatpush3.bf16.msra.mxu0 %v21199_v17 }
 0xc62   :  { %19402 = vmatprep.subr.bf16.mxu0 %v20935_v30 }
 0xd2f   :  { %v3559_v11 = vpop.f32.mrb[10].mxu0 }
 0xd30   :  { %v3563_v12 = vadd.f32 %v21294_v38, %v3559_v11  ;;  %v17541_v13 = vpop.f32.mrb[11].mxu0 }
 0xd32   :  { %v3565_v14 = vmul.f32 0.5, %v3563_v12 }
 0xd34   :  { %20656 = vtanh.f32 %v3565_v14 }
 0xd35   :  { %20658 = vtanh.f32 %v3563_v12 }
 0xd3e   :  { %v20657_v21 = vpop.eup %20656 }
 0xd3f   :  { %v3567_v15 = vmul.f32 0.5, %v20657_v21  ;;  %v20659_v18 = vpop.eup %20658 }
 0xd41   :  { %v3568_v16 = vadd.f32 0.5, %v3567_v15 }
 0xd43   :  { %v3569_v20 = vsel %vm21304_vm4, %v20659_v18, %v3568_v16 }
 0xd44   :  { %3572 = vrot.lane.b32.xlu0 %v3569_v20, %s20938_s3  ;;  %v3570_v26 = vmul.f32 %v3569_v20, %v21459_v49 }
 0xdb6   :  { %v3573_v24 = vpop.permute.xlu0 %3572 }
 0xdb7   :  { %v3575_v25 = vmul.f32 %v3573_v24, %v3569_v20 }
 0xdb9   :  { %3577 = vrot.lane.b32.xlu1 %v3575_v25, %s20939_s16 }
 0xe2b   :  { %v3578_v38 = vpop.permute.xlu1 %3577 }
 0xe2c   :  { %v21508_v22 = vadd.f32 %v3578_v38, %v3570_v26 }
 0xe2e   :  { %20660 = vtanh.f32 %v21508_v22 }
 0xe38   :  { %v20661_v32 = vpop.eup %20660 }
 0xe39   :  { %3583 = vrot.lane.b32.xlu0 %v20661_v32, %s20938_s3 }
 0xeab   :  { %v3584_v35 = vpop.permute.xlu0 %3583 }
 0xeac   :  { %v3586_v39 = vmul.f32 %v3584_v35, %v3569_v20 }
 0xeae   :  { %3588 = vrot.lane.b32.xlu1 %v3586_v39, %s20939_s16 }
 0xf20   :  { %v3589_v40 = vpop.permute.xlu1 %3588 }
 0xf21   :  { %3592 = vst.msk [vmem:[#allocation3 + $0x20] sm:$0xff] %vm999_vm5, %v3589_v40  ;;  %v3595_v41 = vsel %vm999_vm5, %v3589_v40, 0 }
 0xf22   :  { %v3666_v44 = vand.u32 4294901760, %v3595_v41 }
 0xf24   :  { %v3667_v10 = vsub.f32 %v3595_v41, %v3666_v44 }
 0xf26   :  { %v3668_v47 = vand.u32 4294901760, %v3667_v10 }
 0xf28   :  { %v3669_v48 = vsub.f32 %v3667_v10, %v3668_v47 }
 0xf2a   :  { %v3670_v23 = vand.u32 4294901760, %v3669_v48 }
 0xf2c   :  { %17551 = vmatmul.mubr.f32.vlgmr.msra.gmra.mrb[14].mxu1 %v3670_v23 }
 0xf2d   :  { %19368 = vmatpush3.bf16.msra.mxu1 %v21227_v46  ;;  %17561 = vmatprep.mubr.msk.f32.mxu1 %vm20936_vm1, %v20937_v50 }
 0xf2e   :  { %19369 = vmatprep.subr.bf16.mxu1 %v20935_v30 }
 0xf31   :  { %19371 = vmatpush3.bf16.msra.mxu1 %v21231_v53 }
 0xf32   :  { %19372 = vmatprep.subr.bf16.mxu1 %v20935_v30 }
 0xf34   :  { %17562 = vmatmul.mubr.f32.vlgmr.msra.gmra.mrb[14].mxu1 %v3666_v44 }
 0xf35   :  { %19374 = vmatpush3.bf16.msra.mxu1 %v21239_v54  ;;  %17572 = vmatprep.mubr.msk.f32.mxu1 %vm20936_vm1, %v20937_v50 }
 0xf36   :  { %19375 = vmatprep.subr.bf16.mxu1 %v20935_v30 }
 0xf39   :  { %19377 = vmatpush3.bf16.msra.mxu1 %v21244_v55 }
 0xf3a   :  { %19378 = vmatprep.subr.bf16.mxu1 %v20935_v30 }
 0xf3c   :  { %17573 = vmatmul.mubr.f32.vlgmr.msra.gmra.mrb[14].mxu1 %v3667_v10 }
 0xf3d   :  { %19380 = vmatpush3.bf16.msra.mxu1 %v21189_v43  ;;  %17583 = vmatprep.mubr.msk.f32.mxu1 %vm20936_vm1, %v20937_v50 }
 0xf3e   :  { %19381 = vmatprep.subr.bf16.mxu1 %v20935_v30 }
 0xf41   :  { %19383 = vmatpush3.bf16.msra.mxu1 %v21199_v17 }
 0xf42   :  { %19384 = vmatprep.subr.bf16.mxu1 %v20935_v30 }
 0xf44   :  { %17584 = vmatmul.mubr.f32.vlgmr.msra.gmra.mrb[14].mxu1 %v3668_v47 }
 0xf45   :  { %19386 = vmatpush3.bf16.msra.mxu1 %v21257_v56  ;;  %17594 = vmatprep.mubr.msk.f32.mxu1 %vm20936_vm1, %v20937_v50 }
 0xf46   :  { %19387 = vmatprep.subr.bf16.mxu1 %v20935_v30 }
 0xf49   :  { %19389 = vmatpush3.bf16.msra.mxu1 %v21262_v57 }
 0xf4a   :  { %19390 = vmatprep.subr.bf16.mxu1 %v20935_v30 }
 0xf4c   :  { %17595 = vmatmul.mubr.f32.vlgmr.msra.gmra.mrb[14].mxu1 %v3666_v44 }
 0xf4d   :  { %19392 = vmatpush3.bf16.msra.mxu1 %v21189_v43  ;;  %17605 = vmatprep.mubr.msk.f32.mxu1 %vm20936_vm1, %v20937_v50 }
 0xf4e   :  { %19393 = vmatprep.subr.bf16.mxu1 %v20935_v30 }
 0xf51   :  { %19395 = vmatpush3.bf16.msra.mxu1 %v21199_v17 }
 0xf52   :  { %19432 = vmatprep.subr.bf16.mxu1 %v20935_v30 }
 0xf54   :  { %17606 = vmatmul.mubr.f32.vlgmr.msra.gmra.mrb[14].mxu1 %v3666_v44 }
 0xf55   :  { %19434 = vmatpush3.bf16.msra.mxu1 %v21189_v43  ;;  %17682 = vmatprep.mubr.msk.f32.mxu1 %vm20936_vm1, %v20937_v50 }
 0xf56   :  { %19435 = vmatprep.subr.bf16.mxu1 %v20935_v30 }
 0xf59   :  { %19437 = vmatpush3.bf16.msra.mxu1 %v21199_v17 }
 0xf5a   :  { %19438 = vmatprep.subr.bf16.mxu1 %v20935_v30 }
0x1027   :  { %v4078_v28 = vpop.f32.mrb[14].mxu1 }
0x1028   :  { %v4082_v31 = vadd.f32 %v21292_v33, %v4078_v28  ;;  %v17607_v29 = vpop.f32.mrb[15].mxu1 }
0x102a   :  { %v4084_v34 = vmul.f32 0.5, %v4082_v31 }
0x102c   :  { %20662 = vtanh.f32 %v4084_v34 }
0x102d   :  { %20664 = vtanh.f32 %v4082_v31 }
0x1036   :  { %v20663_v42 = vpop.eup %20662 }
0x1037   :  { %v4086_v19 = vmul.f32 0.5, %v20663_v42  ;;  %v20665_v51 = vpop.eup %20664 }
0x1039   :  { %v4087_v49 = vadd.f32 0.5, %v4086_v19 }
0x103b   :  { %v4088_v52 = vsel %vm21304_vm4, %v20665_v51, %v4087_v49 }
0x103c   :  { %4091 = vrot.lane.b32.xlu0 %v4088_v52, %s20938_s3  ;;  %v4089_v60 = vmul.f32 %v4088_v52, %v21508_v22 }
0x10ae   :  { %v4092_v58 = vpop.permute.xlu0 %4091 }
0x10af   :  { %v4094_v59 = vmul.f32 %v4092_v58, %v4088_v52 }
0x10b1   :  { %4096 = vrot.lane.b32.xlu1 %v4094_v59, %s20939_s16 }
0x1123   :  { %v4097_v33 = vpop.permute.xlu1 %4096 }
0x1124   :  { %v4099_v61 = vadd.f32 %v4097_v33, %v4089_v60 }
0x1126   :  { %20666 = vtanh.f32 %v4099_v61 }
0x1130   :  { %v20667_v62 = vpop.eup %20666 }
0x1131   :  { %4102 = vrot.lane.b32.xlu0 %v20667_v62, %s20938_s3 }
0x11a3   :  { %v4103_v63 = vpop.permute.xlu0 %4102 }
0x11a4   :  { %v4105_v8 = vmul.f32 %v4103_v63, %v4088_v52 }
0x11a6   :  { %4107 = vrot.lane.b32.xlu1 %v4105_v8, %s20939_s16 }
0x1218   :  { %v4108_v9 = vpop.permute.xlu1 %4107 }
0x1219   :  { %4111 = vst.msk [vmem:[#allocation3 + $0x28] sm:$0xff] %vm999_vm5, %v4108_v9  ;;  %v4114_v11 = vsel %vm999_vm5, %v4108_v9, 0 }
0x121a   :  { %v4185_v12 = vand.u32 4294901760, %v4114_v11 }
0x121c   :  { %v4186_v13 = vsub.f32 %v4114_v11, %v4185_v12 }
0x121e   :  { %v4187_v14 = vand.u32 4294901760, %v4186_v13 }
0x1220   :  { %v4188_v21 = vsub.f32 %v4186_v13, %v4187_v14 }
0x1222   :  { %v4189_v15 = vand.u32 4294901760, %v4188_v21 }
0x1224   :  { %17617 = vmatmul.mubr.f32.vlgmr.msra.gmra.mrb[12].mxu0 %v4189_v15 }
0x1225   :  { %19404 = vmatpush3.bf16.msra.mxu0 %v21227_v46  ;;  %17627 = vmatprep.mubr.msk.f32.mxu0 %vm20936_vm1, %v20937_v50 }
0x1226   :  { %19405 = vmatprep.subr.bf16.mxu0 %v20935_v30 }
0x1229   :  { %19407 = vmatpush3.bf16.msra.mxu0 %v21231_v53 }
0x122a   :  { %19408 = vmatprep.subr.bf16.mxu0 %v20935_v30 }
0x122c   :  { %17628 = vmatmul.mubr.f32.vlgmr.msra.gmra.mrb[12].mxu0 %v4185_v12 }
0x122d   :  { %19410 = vmatpush3.bf16.msra.mxu0 %v21239_v54  ;;  %17638 = vmatprep.mubr.msk.f32.mxu0 %vm20936_vm1, %v20937_v50 }
0x122e   :  { %19411 = vmatprep.subr.bf16.mxu0 %v20935_v30 }
0x1231   :  { %19413 = vmatpush3.bf16.msra.mxu0 %v21244_v55 }
0x1232   :  { %19414 = vmatprep.subr.bf16.mxu0 %v20935_v30 }
0x1234   :  { %17639 = vmatmul.mubr.f32.vlgmr.msra.gmra.mrb[12].mxu0 %v4186_v13 }
0x1235   :  { %19416 = vmatpush3.bf16.msra.mxu0 %v21189_v43  ;;  %17649 = vmatprep.mubr.msk.f32.mxu0 %vm20936_vm1, %v20937_v50 }
0x1236   :  { %19417 = vmatprep.subr.bf16.mxu0 %v20935_v30 }
0x1239   :  { %19419 = vmatpush3.bf16.msra.mxu0 %v21199_v17 }
0x123a   :  { %19420 = vmatprep.subr.bf16.mxu0 %v20935_v30 }
0x123c   :  { %17650 = vmatmul.mubr.f32.vlgmr.msra.gmra.mrb[12].mxu0 %v4187_v14 }
0x123d   :  { %19422 = vmatpush3.bf16.msra.mxu0 %v21257_v56  ;;  %17660 = vmatprep.mubr.msk.f32.mxu0 %vm20936_vm1, %v20937_v50 }
0x123e   :  { %19423 = vmatprep.subr.bf16.mxu0 %v20935_v30 }
0x1241   :  { %19425 = vmatpush3.bf16.msra.mxu0 %v21262_v57 }
0x1242   :  { %19426 = vmatprep.subr.bf16.mxu0 %v20935_v30 }
0x1244   :  { %17661 = vmatmul.mubr.f32.vlgmr.msra.gmra.mrb[12].mxu0 %v4185_v12 }
0x1245   :  { %19428 = vmatpush3.bf16.msra.mxu0 %v21189_v43  ;;  %17671 = vmatprep.mubr.msk.f32.mxu0 %vm20936_vm1, %v20937_v50 }
0x1246   :  { %19429 = vmatprep.subr.bf16.mxu0 %v20935_v30 }
0x1249   :  { %19431 = vmatpush3.bf16.msra.mxu0 %v21199_v17 }
0x124c   :  { %17672 = vmatmul.mubr.f32.vlgmr.msra.gmra.mrb[12].mxu0 %v4185_v12 }
0x131f   :  { %v4597_v16 = vpop.f32.mrb[12].mxu0 }
0x1320   :  { %v4601_v18 = vadd.f32 %v21298_v27, %v4597_v16  ;;  %v17673_v20 = vpop.f32.mrb[13].mxu0 }
0x1322   :  { %v4603_v24 = vmul.f32 0.5, %v4601_v18 }
0x1324   :  { %20668 = vtanh.f32 %v4603_v24 }
0x1325   :  { %20670 = vtanh.f32 %v4601_v18 }
0x132e   :  { %v20669_v25 = vpop.eup %20668 }
0x132f   :  { %v4605_v26 = vmul.f32 0.5, %v20669_v25  ;;  %v20671_v22 = vpop.eup %20670 }
0x1331   :  { %v4606_v38 = vadd.f32 0.5, %v4605_v26 }
0x1333   :  { %v4607_v32 = vsel %vm21304_vm4, %v20671_v22, %v4606_v38 }
0x1334   :  { %4610 = vrot.lane.b32.xlu0 %v4607_v32, %s20938_s3  ;;  %v4608_v40 = vmul.f32 %v4607_v32, %v4099_v61 }
0x13a6   :  { %v4611_v35 = vpop.permute.xlu0 %4610 }
0x13a7   :  { %v4613_v39 = vmul.f32 %v4611_v35, %v4607_v32 }
0x13a9   :  { %4615 = vrot.lane.b32.xlu1 %v4613_v39, %s20939_s16 }
0x141b   :  { %v4616_v41 = vpop.permute.xlu1 %4615 }
0x141c   :  { %v4618_v27 = vadd.f32 %v4616_v41, %v4608_v40 }
0x141e   :  { %20672 = vtanh.f32 %v4618_v27 }
0x1428   :  { %v20673_v44 = vpop.eup %20672 }
0x1429   :  { %4621 = vrot.lane.b32.xlu0 %v20673_v44, %s20938_s3 }
0x149b   :  { %v4622_v10 = vpop.permute.xlu0 %4621 }
0x149c   :  { %v4624_v47 = vmul.f32 %v4622_v10, %v4607_v32 }
0x149e   :  { %4626 = vrot.lane.b32.xlu1 %v4624_v47, %s20939_s16 }
0x1510   :  { %v4627_v48 = vpop.permute.xlu1 %4626 }
0x1511   :  { %4630 = vst.msk [vmem:[#allocation3 + $0x30] sm:$0xff] %vm999_vm5, %v4627_v48  ;;  %v4633_v23 = vsel %vm999_vm5, %v4627_v48, 0 }
0x1512   :  { %v4704_v28 = vand.u32 4294901760, %v4633_v23 }
0x1514   :  { %v4705_v31 = vsub.f32 %v4633_v23, %v4704_v28 }
0x1516   :  { %v4706_v29 = vand.u32 4294901760, %v4705_v31 }
0x1518   :  { %v4707_v34 = vsub.f32 %v4705_v31, %v4706_v29 }
0x151a   :  { %v4708_v42 = vand.u32 4294901760, %v4707_v34 }
0x151c   :  { %17683 = vmatmul.mubr.f32.vlgmr.msra.gmra.mrb[16].mxu1 %v4708_v42 }
0x151d   :  { %19440 = vmatpush3.bf16.msra.mxu1 %v21227_v46  ;;  %17693 = vmatprep.mubr.msk.f32.mxu1 %vm20936_vm1, %v20937_v50 }
0x151e   :  { %19441 = vmatprep.subr.bf16.mxu1 %v20935_v30 }
0x1521   :  { %19443 = vmatpush3.bf16.msra.mxu1 %v21231_v53 }
0x1522   :  { %19444 = vmatprep.subr.bf16.mxu1 %v20935_v30 }
0x1524   :  { %17694 = vmatmul.mubr.f32.vlgmr.msra.gmra.mrb[16].mxu1 %v4704_v28 }
0x1525   :  { %19446 = vmatpush3.bf16.msra.mxu1 %v21239_v54  ;;  %17704 = vmatprep.mubr.msk.f32.mxu1 %vm20936_vm1, %v20937_v50 }
0x1526   :  { %19447 = vmatprep.subr.bf16.mxu1 %v20935_v30 }
0x1529   :  { %19449 = vmatpush3.bf16.msra.mxu1 %v21244_v55 }
0x152a   :  { %19450 = vmatprep.subr.bf16.mxu1 %v20935_v30 }
0x152c   :  { %17705 = vmatmul.mubr.f32.vlgmr.msra.gmra.mrb[16].mxu1 %v4705_v31 }
0x152d   :  { %19452 = vmatpush3.bf16.msra.mxu1 %v21189_v43  ;;  %17715 = vmatprep.mubr.msk.f32.mxu1 %vm20936_vm1, %v20937_v50 }
0x152e   :  { %19453 = vmatprep.subr.bf16.mxu1 %v20935_v30 }
0x1531   :  { %19455 = vmatpush3.bf16.msra.mxu1 %v21199_v17 }
0x1532   :  { %19456 = vmatprep.subr.bf16.mxu1 %v20935_v30 }
0x1534   :  { %17716 = vmatmul.mubr.f32.vlgmr.msra.gmra.mrb[16].mxu1 %v4706_v29 }
0x1535   :  { %19458 = vmatpush3.bf16.msra.mxu1 %v21257_v56  ;;  %17726 = vmatprep.mubr.msk.f32.mxu1 %vm20936_vm1, %v20937_v50 }
0x1536   :  { %19459 = vmatprep.subr.bf16.mxu1 %v20935_v30 }
0x1539   :  { %19461 = vmatpush3.bf16.msra.mxu1 %v21262_v57 }
0x153a   :  { %19462 = vmatprep.subr.bf16.mxu1 %v20935_v30 }
0x153c   :  { %17727 = vmatmul.mubr.f32.vlgmr.msra.gmra.mrb[16].mxu1 %v4704_v28 }
0x153d   :  { %19464 = vmatpush3.bf16.msra.mxu1 %v21189_v43  ;;  %17737 = vmatprep.mubr.msk.f32.mxu1 %vm20936_vm1, %v20937_v50 }
0x153e   :  { %19465 = vmatprep.subr.bf16.mxu1 %v20935_v30 }
0x1541   :  { %19467 = vmatpush3.bf16.msra.mxu1 %v21199_v17 }
0x1544   :  { %17738 = vmatmul.mubr.f32.vlgmr.msra.gmra.mrb[16].mxu1 %v4704_v28 }
0x1617   :  { %v5116_v46 = vpop.f32.mrb[16].mxu1 }
0x1618   :  { %v5120_v53 = vadd.f32 %v21296_v45, %v5116_v46  ;;  %v17739_v54 = vpop.f32.mrb[17].mxu1 }
0x161a   :  { %v5122_v55 = vmul.f32 0.5, %v5120_v53 }
0x161c   :  { %20674 = vtanh.f32 %v5122_v55 }
0x161d   :  { %20676 = vtanh.f32 %v5120_v53 }
0x1626   :  { %v20675_v56 = vpop.eup %20674 }
0x1627   :  { %v5124_v57 = vmul.f32 0.5, %v20675_v56  ;;  %v20677_v49 = vpop.eup %20676 }
0x1629   :  { %v5125_v19 = vadd.f32 0.5, %v5124_v57 }
0x162b   :  { %v5126_v43 = vsel %vm21304_vm4, %v20677_v49, %v5125_v19 }
0x162c   :  { %5129 = vrot.lane.b32.xlu0 %v5126_v43, %s20938_s3  ;;  %v5127_v17 = vmul.f32 %v5126_v43, %v4618_v27 }
0x169e   :  { %v5130_v51 = vpop.permute.xlu0 %5129 }
0x169f   :  { %v5132_v52 = vmul.f32 %v5130_v51, %v5126_v43 }
0x16a1   :  { %5134 = vrot.lane.b32.xlu1 %v5132_v52, %s20939_s16 }
0x1713   :  { %v5135_v58 = vpop.permute.xlu1 %5134 }
0x1714   :  { %v5137_v45 = vadd.f32 %v5135_v58, %v5127_v17 }
0x1716   :  { %20678 = vtanh.f32 %v5137_v45 }
0x1720   :  { %v20679_v59 = vpop.eup %20678 }
0x1721   :  { %5140 = vrot.lane.b32.xlu0 %v20679_v59, %s20938_s3 }
0x1722   :  { %20839 = shalt.err (!%p20836_p10)  }
0x1723   :  { %s20840_s26 = scalar_lea.vmem %s152_s18, 512  ;;  %p20845_p12 = scmp.lt.s32.totalorder %s152_s18, %s152_s18 }
0x1724   :  { %p20841_p11 = scmp.ne.s32.totalorder %s152_s18, %s20840_s26  ;;  %p20846_p13 = scmp.lt.s32.totalorder %s20840_s26, %s20840_s26 }
0x1726   :  { %p20847_p0 = por %p20846_p13, %p20845_p12 }
0x1728   :  { %p20848_p1 = pnand %p20847_p0, %p20841_p11 }
0x172a   :  { %20851 = shalt.err (!%p20848_p1)  }
0x172b   :  { %154 = dma.hbm_to_vmem [thread:$0]  %s23211_s7, 512, %s152_s18, [#allocation10 + $0x2] }
0x172c   :  { %s20852_s30 = scalar_lea.hbm %s23212_s8, 512 }
0x172d   :  { %p20853_p2 = scmp.ne.s32.totalorder %s23212_s8, %s20852_s30  ;;  %p20856_p3 = scmp.lt.u32.totalorder %s20852_s30, %s23212_s8 }
0x172f   :  { %p20858_p4 = pnand %p20856_p3, %p20853_p2 }
0x1731   :  { %20861 = shalt.err (!%p20858_p4)  }
0x1732   :  { %s20862_s15 = scalar_lea.vmem %s164_s19, 512  ;;  %p20867_p6 = scmp.lt.s32.totalorder %s164_s19, %s164_s19 }
0x1733   :  { %p20863_p5 = scmp.ne.s32.totalorder %s164_s19, %s20862_s15  ;;  %p20868_p7 = scmp.lt.s32.totalorder %s20862_s15, %s20862_s15 }
0x1735   :  { %p20869_p8 = por %p20868_p7, %p20867_p6 }
0x1737   :  { %p20870_p9 = pnand %p20869_p8, %p20863_p5 }
0x1739   :  { %20873 = shalt.err (!%p20870_p9)  }
0x173a   :  { %166 = dma.hbm_to_vmem [thread:$0]  %s23212_s8, 512, %s164_s19, [#allocation10 + $0x3] }
0x173b   :  { %s20942_s18 = smov [#allocation9]   ;;  %s20874_s23 = scalar_lea.hbm %s23214_s10, 512 }
0x173c   :  { %s175_s5 = sshll.u32 %s20942_s18, 4  ;;  %p20875_p10 = scmp.ne.s32.totalorder %s23214_s10, %s20874_s23  ;;  %s176_s5 = int_to_ptr.vmem [resolvable:$true] %s175_s5 }
0x173d   :  { %p20878_p11 = scmp.lt.u32.totalorder %s20874_s23, %s23214_s10 }
0x173f   :  { %p20880_p12 = pnand %p20878_p11, %p20875_p10 }
0x1741   :  { %20883 = shalt.err (!%p20880_p12)  }
0x1742   :  { %s20884_s26 = scalar_lea.vmem %s176_s5, 512  ;;  %p20889_p0 = scmp.lt.s32.totalorder %s176_s5, %s176_s5 }
0x1743   :  { %p20885_p13 = scmp.ne.s32.totalorder %s176_s5, %s20884_s26  ;;  %p20890_p1 = scmp.lt.s32.totalorder %s20884_s26, %s20884_s26 }
0x1745   :  { %p20891_p2 = por %p20890_p1, %p20889_p0 }
0x1747   :  { %p20892_p3 = pnand %p20891_p2, %p20885_p13 }
0x1749   :  { %20895 = shalt.err (!%p20892_p3)  }
0x174a   :  { %178 = dma.hbm_to_vmem [thread:$0]  %s23214_s10, 512, %s176_s5, [#allocation10 + $0x4] }
0x1793   :  { %v5141_v60 = vpop.permute.xlu0 %5140 }
0x1794   :  { %v5143_v33 = vmul.f32 %v5141_v60, %v5126_v43 }
0x1796   :  { %5145 = vrot.lane.b32.xlu1 %v5143_v33, %s20939_s16 }
0x1808   :  { %v5146_v61 = vpop.permute.xlu1 %5145 }
0x1809   :  { %5149 = vst.msk [vmem:[#allocation3 + $0x38] sm:$0xff] %vm999_vm5, %v5146_v61 }
0x180a   :  { %20920 = dma.done.wait [#allocation10], 512 }
0x180b   :  { %20921 = vsyncadd [#allocation10], 4294966784 }
0x180c   :  { %20922 = dma.done.wait [#allocation10 + $0x1], 512 }
0x180d   :  { %20923 = vsyncadd [#allocation10 + $0x1], 4294966784  ;;  %v5203_v62 = vand.u32 4294901760, %v21024_v0  ;;  %v5206_v63 = vand.u32 4294901760, %v21029_v1  ;;  %19516 = vmatprep.subr.bf16.mxu1 %v20935_v30  ;;  %v5209_v8 = vand.u32 4294901760, %v21034_v2  ;;  %v5212_v9 = vand.u32 4294901760, %v21039_v3  ;;  %17868 = vmatprep.mubr.msk.f32.mxu1 %vm20936_vm1, %v20937_v50 }
0x180e   :  { %v5998_v11 = vand.u32 4294901760, %v21044_v4  ;;  %v6001_v12 = vand.u32 4294901760, %v21049_v5  ;;  %v6004_v13 = vand.u32 4294901760, %v21054_v6  ;;  %v6007_v14 = vand.u32 4294901760, %v21059_v7  ;;  %v5155_v40 = vld [vmem:[#allocation3] sm:$0xff]  ;;  %v5156_v41 = vld [vmem:[#allocation3 + $0x8] sm:$0xff] }
0x180f   :  { %v21683_v21 = vpack.c.bf16 %v5206_v63, %v5203_v62  ;;  %v21685_v15 = vpack.c.bf16 %v5212_v9, %v5209_v8  ;;  %v21688_v16 = vsub.f32 %v21024_v0, %v5203_v62  ;;  %v21691_v18 = vsub.f32 %v21029_v1, %v5206_v63  ;;  %v5158_v29 = vld [vmem:[#allocation3 + $0x18] sm:$0xff]  ;;  %v5159_v34 = vld [vmem:[#allocation3 + $0x20] sm:$0xff] }
0x1810   :  { %v21693_v20 = vpack.c.bf16 %v6001_v12, %v5998_v11  ;;  %v21695_v24 = vpack.c.bf16 %v6007_v14, %v6004_v13  ;;  %v21698_v25 = vsub.f32 %v21044_v4, %v5998_v11  ;;  %v21701_v26 = vsub.f32 %v21049_v5, %v6001_v12 }
0x1811   :  { %19469 = vmatprep.subr.bf16.mxu0 %v21683_v21  ;;  %v5354_v38 = vand.u32 4294901760, %v21688_v16  ;;  %v5361_v0 = vand.u32 4294901760, %v21691_v18  ;;  %v21707_v22 = vsub.f32 %v21034_v2, %v5209_v8  ;;  %v21710_v1 = vsub.f32 %v21039_v3, %v5212_v9 }
0x1812   :  { %19471 = vmatpush3.bf16.msra.mxu0 %v21683_v21  ;;  %19518 = vmatpush3.bf16.msra.mxu1 %v21693_v20  ;;  %v6079_v4 = vand.u32 4294901760, %v21698_v25  ;;  %v6086_v5 = vand.u32 4294901760, %v21701_v26  ;;  %v21717_v32 = vsub.f32 %v21054_v6, %v6004_v13  ;;  %v21720_v35 = vsub.f32 %v21059_v7, %v6007_v14  ;;  %v5157_v7 = vld [vmem:[#allocation3 + $0x10] sm:$0xff] }
0x1813   :  { %19473 = vmatprep.subr.bf16.mxu0 %v21685_v15  ;;  %19519 = vmatprep.subr.bf16.mxu1 %v20935_v30  ;;  %v5355_v2 = vsub.f32 %v21688_v16, %v5354_v38  ;;  %v5362_v3 = vsub.f32 %v21691_v18, %v5361_v0  ;;  %v5368_v39 = vand.u32 4294901760, %v21707_v22  ;;  %v5375_v6 = vand.u32 4294901760, %v21710_v1 }
0x1814   :  { %v6080_v27 = vsub.f32 %v21698_v25, %v6079_v4  ;;  %v6087_v44 = vsub.f32 %v21701_v26, %v6086_v5  ;;  %v6093_v10 = vand.u32 4294901760, %v21717_v32  ;;  %v6100_v47 = vand.u32 4294901760, %v21720_v35 }
0x1815   :  { %v5179_v48 = vsel %vm999_vm5, %v5155_v40, 0  ;;  %v5356_v23 = vand.u32 4294901760, %v5355_v2  ;;  %v5363_v28 = vand.u32 4294901760, %v5362_v3  ;;  %v5182_v31 = vsel %vm999_vm5, %v5156_v41, 0  ;;  %v5160_v3 = vld [vmem:[#allocation3 + $0x28] sm:$0xff] }
0x1816   :  { %19475 = vmatpush3.bf16.msra.mxu0 %v21685_v15  ;;  %v21743_v42 = vand.u32 4294901760, %v5179_v48  ;;  %19521 = vmatpush3.bf16.msra.mxu1 %v21695_v24  ;;  %v21746_v46 = vand.u32 4294901760, %v5182_v31  ;;  %v5185_v53 = vsel %vm999_vm5, %v5157_v7, 0  ;;  %v6081_v54 = vand.u32 4294901760, %v6080_v27 }
0x1817   :  { %v19476_v55 = vpack.c.bf16 %v5363_v28, %v5356_v23  ;;  %19522 = vmatprep.subr.bf16.mxu1 %v20935_v30  ;;  %v21750_v56 = vand.u32 4294901760, %v5185_v53  ;;  %v6088_v57 = vand.u32 4294901760, %v6087_v44  ;;  %v5188_v19 = vsel %vm999_vm5, %v5158_v29, 0  ;;  %v5161_v44 = vld [vmem:[#allocation3 + $0x30] sm:$0xff]  ;;  %v5162_v29 = vld [vmem:[#allocation3 + $0x38] sm:$0xff] }
0x1818   :  { %v21754_v49 = vsub.f32 %v5179_v48, %v21743_v42  ;;  %v21757_v43 = vsub.f32 %v5182_v31, %v21746_v46  ;;  %v21759_v51 = vand.u32 4294901760, %v5188_v19  ;;  %v5191_v52 = vsel %vm999_vm5, %v5159_v34, 0 }
0x1819   :  { %19477 = vmatprep.subr.bf16.mxu0 %v19476_v55  ;;  %17869 = vmatmul.mubr.f32.vlgmr.msra.gmra.mrb[18].mxu1 %v20937_v50  ;;  %v21764_v17 = vsub.f32 %v5185_v53, %v21750_v56  ;;  %v21766_v58 = vpack.c.bf16 %v6088_v57, %v6081_v54  ;;  %v21768_v45 = vand.u32 4294901760, %v5191_v52  ;;  %v5369_v59 = vsub.f32 %v21707_v22, %v5368_v39 }
0x181a   :  { %v5273_v60 = vand.u32 4294901760, %v21754_v49  ;;  %v5283_v33 = vand.u32 4294901760, %v21757_v43  ;;  %v21776_v61 = vsub.f32 %v5188_v19, %v21759_v51  ;;  %v5376_v62 = vsub.f32 %v21710_v1, %v5375_v6  ;;  %17879 = vmatprep.mubr.msk.f32.mxu1 %vm20936_vm1, %v20937_v50 }
0x181b   :  { %v5293_v63 = vand.u32 4294901760, %v21764_v17  ;;  %19524 = vmatpush3.bf16.msra.mxu1 %v21766_v58  ;;  %v21786_v8 = vsub.f32 %v5191_v52, %v21768_v45  ;;  %v5370_v9 = vand.u32 4294901760, %v5369_v59  ;;  %v6094_v11 = vsub.f32 %v21717_v32, %v6093_v10 }
0x181c   :  { %v5274_v12 = vsub.f32 %v21754_v49, %v5273_v60  ;;  %v5284_v13 = vsub.f32 %v21757_v43, %v5283_v33  ;;  %v5303_v14 = vand.u32 4294901760, %v21776_v61  ;;  %19525 = vmatprep.subr.bf16.mxu1 %v20935_v30  ;;  %v5377_v2 = vand.u32 4294901760, %v5376_v62 }
0x181d   :  { %v5294_v40 = vsub.f32 %v21764_v17, %v5293_v63  ;;  %v5313_v41 = vand.u32 4294901760, %v21786_v8  ;;  %v6095_v7 = vand.u32 4294901760, %v6094_v11  ;;  %v6101_v27 = vsub.f32 %v21720_v35, %v6100_v47 }
0x181e   :  { %v5275_v48 = vand.u32 4294901760, %v5274_v12  ;;  %v5285_v23 = vand.u32 4294901760, %v5284_v13  ;;  %v5304_v28 = vsub.f32 %v21776_v61, %v5303_v14  ;;  %v19480_v31 = vpack.c.bf16 %v5377_v2, %v5370_v9 }
0x181f   :  { %v5295_v34 = vand.u32 4294901760, %v5294_v40  ;;  %v5314_v53 = vsub.f32 %v21786_v8, %v5313_v41  ;;  %v6102_v54 = vand.u32 4294901760, %v6101_v27  ;;  %v5194_v57 = vsel %vm999_vm5, %v5160_v3, 0 }
0x1820   :  { %17748 = vmatprep.mubr.f32.mxu0 %v5275_v48  ;;  %v21813_v19 = vand.u32 4294901760, %v5194_v57  ;;  %v5197_v52 = vsel %vm999_vm5, %v5161_v44, 0  ;;  %v5305_v59 = vand.u32 4294901760, %v5304_v28  ;;  %v5200_v9 = vsel %vm999_vm5, %v5162_v29, 0 }
0x1821   :  { %17749 = vmatmul.mubr.f32.vlgmr.msra.gmra.mrb[14].mxu0 %v5285_v23  ;;  %v21816_v62 = vpack.c.bf16 %v6102_v54, %v6095_v7  ;;  %v21818_v11 = vand.u32 4294901760, %v5197_v52  ;;  %v5315_v12 = vand.u32 4294901760, %v5314_v53  ;;  %v21824_v2 = vand.u32 4294901760, %v5200_v9 }
0x1822   :  { %19479 = vmatpush3.bf16.msra.mxu0 %v19476_v55  ;;  %17751 = vmatprep.mubr.f32.mxu0 %v5295_v34  ;;  %v21822_v13 = vsub.f32 %v5194_v57, %v21813_v19  ;;  %v19484_v40 = vpack.c.bf16 %v21691_v18, %v21688_v16  ;;  %v21836_v55 = vpack.c.bf16 %v21701_v26, %v21698_v25  ;;  %v16112_v18 = vld [vmem:[%s23210_s6] ss:$0 sm:$0xff] }
0x1823   :  { %19481 = vmatprep.subr.bf16.mxu0 %v19480_v31  ;;  %19527 = vmatpush3.bf16.msra.mxu1 %v21816_v62  ;;  %v21828_v3 = vsub.f32 %v5197_v52, %v21818_v11  ;;  %v21839_v27 = vsub.f32 %v5200_v9, %v21824_v2  ;;  %v21856_v53 = vpack.c.bf16 %v21720_v35, %v21717_v32 }
0x1824   :  { %v5323_v7 = vand.u32 4294901760, %v21822_v13  ;;  %19528 = vmatprep.subr.bf16.mxu1 %v20935_v30  ;;  %v19488_v57 = vpack.c.bf16 %v21710_v1, %v21707_v22  ;;  %v21879_v52 = vpack.c.bf16 %v6086_v5, %v6079_v4  ;;  %v21890_v25 = vpack.c.bf16 %v6100_v47, %v6093_v10 }
0x1825   :  { %17752 = vmatmul.mubr.f32.gmra.mrb[16].mxu0 %v5305_v59  ;;  %v5333_v44 = vand.u32 4294901760, %v21828_v3  ;;  %v5343_v23 = vand.u32 4294901760, %v21839_v27  ;;  %v19500_v26 = vpack.c.bf16 %v5361_v0, %v5354_v38  ;;  %v19504_v16 = vpack.c.bf16 %v5375_v6, %v5368_v39 }
0x1826   :  { %17754 = vmatprep.mubr.f32.mxu0 %v5315_v12  ;;  %v5324_v48 = vsub.f32 %v21822_v13, %v5323_v7  ;;  %19483 = vmatpush3.bf16.msra.mxu0 %v19480_v31 }
0x1827   :  { %17880 = vmatmul.mubr.f32.vlgmr.msra.gmra.mrb[18].mxu1 %v20937_v50  ;;  %v5334_v28 = vsub.f32 %v21828_v3, %v5333_v44  ;;  %19485 = vmatprep.subr.bf16.mxu0 %v19484_v40  ;;  %v5344_v34 = vsub.f32 %v21839_v27, %v5343_v23 }
0x1828   :  { %v5325_v29 = vand.u32 4294901760, %v5324_v48  ;;  %19530 = vmatpush3.bf16.msra.mxu1 %v21836_v55  ;;  %17890 = vmatprep.mubr.msk.f32.mxu1 %vm20936_vm1, %v20937_v50 }
0x1829   :  { %v5335_v31 = vand.u32 4294901760, %v5334_v28  ;;  %19531 = vmatprep.subr.bf16.mxu1 %v20935_v30  ;;  %v5345_v54 = vand.u32 4294901760, %v5344_v34 }
0x182a   :  { %17755 = vmatmul.mubr.f32.gmra.mrb[18].mxu0 %v5325_v29 }
0x182b   :  { %17757 = vmatprep.mubr.f32.mxu0 %v5335_v31 }
0x182c   :  { %19533 = vmatpush3.bf16.msra.mxu1 %v21856_v53 }
0x182d   :  { %19534 = vmatprep.subr.bf16.mxu1 %v20935_v30 }
0x182e   :  { %17758 = vmatmul.mubr.f32.gmra.mrb[20].mxu0 %v5345_v54 }
0x182f   :  { %17768 = vmatprep.mubr.f32.mxu0 %v21743_v42  ;;  %17891 = vmatmul.mubr.f32.vlgmr.msra.gmra.mrb[18].mxu1 %v20937_v50 }
0x1830   :  { %19536 = vmatpush3.bf16.msra.mxu1 %v21693_v20  ;;  %17901 = vmatprep.mubr.msk.f32.mxu1 %vm20936_vm1, %v20937_v50 }
0x1831   :  { %19537 = vmatprep.subr.bf16.mxu1 %v20935_v30 }
0x1832   :  { %17769 = vmatmul.mubr.f32.vlgmr.msra.gmra.mrb[14].mxu0 %v21746_v46 }
0x1833   :  { %19487 = vmatpush3.bf16.msra.mxu0 %v19484_v40  ;;  %17771 = vmatprep.mubr.f32.mxu0 %v21750_v56 }
0x1834   :  { %19489 = vmatprep.subr.bf16.mxu0 %v19488_v57  ;;  %19539 = vmatpush3.bf16.msra.mxu1 %v21695_v24 }
0x1835   :  { %19540 = vmatprep.subr.bf16.mxu1 %v20935_v30 }
0x1836   :  { %17772 = vmatmul.mubr.f32.gmra.mrb[16].mxu0 %v21759_v51 }
0x1837   :  { %17774 = vmatprep.mubr.f32.mxu0 %v21768_v45  ;;  %19491 = vmatpush3.bf16.msra.mxu0 %v19488_v57 }
0x1838   :  { %17902 = vmatmul.mubr.f32.vlgmr.msra.gmra.mrb[18].mxu1 %v20937_v50  ;;  %19493 = vmatprep.subr.bf16.mxu0 %v21683_v21 }
0x1839   :  { %19542 = vmatpush3.bf16.msra.mxu1 %v21879_v52  ;;  %17912 = vmatprep.mubr.msk.f32.mxu1 %vm20936_vm1, %v20937_v50 }
0x183a   :  { %17775 = vmatmul.mubr.f32.gmra.mrb[18].mxu0 %v21813_v19  ;;  %19543 = vmatprep.subr.bf16.mxu1 %v20935_v30 }
0x183b   :  { %17777 = vmatprep.mubr.f32.mxu0 %v21818_v11 }
0x183d   :  { %19545 = vmatpush3.bf16.msra.mxu1 %v21890_v25 }
0x183e   :  { %17778 = vmatmul.mubr.f32.gmra.mrb[20].mxu0 %v21824_v2  ;;  %19546 = vmatprep.subr.bf16.mxu1 %v20935_v30 }
0x183f   :  { %17788 = vmatprep.mubr.f32.mxu0 %v21754_v49 }
0x1840   :  { %17913 = vmatmul.mubr.f32.vlgmr.msra.gmra.mrb[18].mxu1 %v20937_v50 }
0x1841   :  { %19548 = vmatpush3.bf16.msra.mxu1 %v21693_v20  ;;  %17923 = vmatprep.mubr.msk.f32.mxu1 %vm20936_vm1, %v20937_v50 }
0x1842   :  { %17789 = vmatmul.mubr.f32.vlgmr.msra.gmra.mrb[14].mxu0 %v21757_v43  ;;  %19549 = vmatprep.subr.bf16.mxu1 %v20935_v30 }
0x1843   :  { %19495 = vmatpush3.bf16.msra.mxu0 %v21683_v21  ;;  %17791 = vmatprep.mubr.f32.mxu0 %v21764_v17 }
0x1844   :  { %19497 = vmatprep.subr.bf16.mxu0 %v21685_v15 }
0x1845   :  { %19551 = vmatpush3.bf16.msra.mxu1 %v21695_v24 }
0x1846   :  { %17792 = vmatmul.mubr.f32.gmra.mrb[16].mxu0 %v21776_v61  ;;  %19552 = vmatprep.subr.bf16.mxu1 %v20935_v30 }
0x1847   :  { %17794 = vmatprep.mubr.f32.mxu0 %v21786_v8  ;;  %19499 = vmatpush3.bf16.msra.mxu0 %v21685_v15 }
0x1848   :  { %17924 = vmatmul.mubr.f32.vlgmr.msra.gmra.mrb[18].mxu1 %v20937_v50  ;;  %19501 = vmatprep.subr.bf16.mxu0 %v19500_v26 }
0x1849   :  { %19554 = vmatpush3.bf16.msra.mxu1 %v21693_v20  ;;  %17934 = vmatprep.mubr.msk.f32.mxu1 %vm20936_vm1, %v20937_v50 }
0x184a   :  { %17795 = vmatmul.mubr.f32.gmra.mrb[18].mxu0 %v21822_v13  ;;  %19555 = vmatprep.subr.bf16.mxu1 %v20935_v30 }
0x184b   :  { %17797 = vmatprep.mubr.f32.mxu0 %v21828_v3 }
0x184d   :  { %19557 = vmatpush3.bf16.msra.mxu1 %v21695_v24 }
0x184e   :  { %17798 = vmatmul.mubr.f32.gmra.mrb[20].mxu0 %v21839_v27  ;;  %19558 = vmatprep.subr.bf16.mxu1 %v20935_v30 }
0x184f   :  { %17808 = vmatprep.mubr.f32.mxu0 %v5273_v60 }
0x1852   :  { %17809 = vmatmul.mubr.f32.vlgmr.msra.gmra.mrb[14].mxu0 %v5283_v33 }
0x1853   :  { %19503 = vmatpush3.bf16.msra.mxu0 %v19500_v26  ;;  %17811 = vmatprep.mubr.f32.mxu0 %v5293_v63 }
0x1854   :  { %19505 = vmatprep.subr.bf16.mxu0 %v19504_v16 }
0x1856   :  { %17812 = vmatmul.mubr.f32.gmra.mrb[16].mxu0 %v5303_v14 }
0x1857   :  { %17814 = vmatprep.mubr.f32.mxu0 %v5313_v41  ;;  %19507 = vmatpush3.bf16.msra.mxu0 %v19504_v16 }
0x1858   :  { %19509 = vmatprep.subr.bf16.mxu0 %v21683_v21 }
0x185a   :  { %17815 = vmatmul.mubr.f32.gmra.mrb[18].mxu0 %v5323_v7 }
0x185b   :  { %17817 = vmatprep.mubr.f32.mxu0 %v5333_v44 }
0x185e   :  { %17818 = vmatmul.mubr.f32.gmra.mrb[20].mxu0 %v5343_v23 }
0x185f   :  { %17828 = vmatprep.mubr.f32.mxu0 %v21743_v42 }
0x1862   :  { %17829 = vmatmul.mubr.f32.vlgmr.msra.gmra.mrb[14].mxu0 %v21746_v46 }
0x1863   :  { %19511 = vmatpush3.bf16.msra.mxu0 %v21683_v21  ;;  %17831 = vmatprep.mubr.f32.mxu0 %v21750_v56 }
0x1864   :  { %19513 = vmatprep.subr.bf16.mxu0 %v21685_v15 }
0x1866   :  { %17832 = vmatmul.mubr.f32.gmra.mrb[16].mxu0 %v21759_v51 }
0x1867   :  { %17834 = vmatprep.mubr.f32.mxu0 %v21768_v45  ;;  %19515 = vmatpush3.bf16.msra.mxu0 %v21685_v15 }
0x1868   :  { %19588 = vmatprep.subr.bf16.mxu0 %v20935_v30 }
0x186a   :  { %17835 = vmatmul.mubr.f32.gmra.mrb[18].mxu0 %v21813_v19 }
0x186b   :  { %17837 = vmatprep.mubr.f32.mxu0 %v21818_v11 }
0x186e   :  { %17838 = vmatmul.mubr.f32.gmra.mrb[20].mxu0 %v21824_v2 }
0x186f   :  { %17848 = vmatprep.mubr.f32.mxu0 %v21743_v42 }
0x1872   :  { %17849 = vmatmul.mubr.f32.vlgmr.msra.gmra.mrb[14].mxu0 %v21746_v46 }
0x1873   :  { %17851 = vmatprep.mubr.f32.mxu0 %v21750_v56  ;;  %19590 = vmatpush3.bf16.msra.mxu0 %v21693_v20 }
0x1874   :  { %19591 = vmatprep.subr.bf16.mxu0 %v20935_v30 }
0x1876   :  { %17852 = vmatmul.mubr.f32.gmra.mrb[16].mxu0 %v21759_v51 }
0x1877   :  { %17854 = vmatprep.mubr.f32.mxu0 %v21768_v45  ;;  %19593 = vmatpush3.bf16.msra.mxu0 %v21695_v24 }
0x1878   :  { %19594 = vmatprep.subr.bf16.mxu0 %v20935_v30 }
0x187a   :  { %17855 = vmatmul.mubr.f32.gmra.mrb[18].mxu0 %v21813_v19 }
0x187b   :  { %17857 = vmatprep.mubr.f32.mxu0 %v21818_v11 }
0x187e   :  { %17858 = vmatmul.mubr.f32.gmra.mrb[20].mxu0 %v21824_v2 }
0x187f   :  { %18000 = vmatprep.mubr.msk.f32.mxu0 %vm20936_vm1, %v20937_v50 }
0x191b   :  { %v6478_v21 = vpop.f32.mrb[18].mxu1 }
0x191c   :  { %v17925_v15 = vpop.f32.mrb[19].mxu1 }
0x1945   :  { %v17850_v38 = vpop.f32.mrb[14].mxu0 }
0x1946   :  { %v21979_v0 = vadd.f32 %v17850_v38, %v16112_v18  ;;  %v5942_v22 = vpop.f32.mrb[15].mxu0 }
0x1947   :  { %v20205_v1 = vadd.f32 %v16112_v18, %v5942_v22 }
0x1949   :  { %v6482_v4 = vadd.f32 %v20205_v1, %v6478_v21  ;;  %v17853_v5 = vpop.f32.mrb[16].mxu0 }
0x194a   :  { %v21981_v32 = vadd.f32 %v17853_v5, %v16112_v18  ;;  %v5954_v35 = vpop.f32.mrb[17].mxu0 }
0x194b   :  { %v6484_v39 = vmul.f32 0.5, %v6482_v4  ;;  %v21983_v6 = vadd.f32 %v16112_v18, %v5954_v35 }
0x194d   :  { %20680 = vtanh.f32 %v6484_v39  ;;  %v17856_v10 = vpop.f32.mrb[18].mxu0 }
0x194e   :  { %v21985_v47 = vadd.f32 %v17856_v10, %v16112_v18  ;;  %v5966_v42 = vpop.f32.mrb[19].mxu0  ;;  %20682 = vtanh.f32 %v6482_v4 }
0x194f   :  { %v21987_v46 = vadd.f32 %v16112_v18, %v5966_v42 }
0x1951   :  { %v17859_v56 = vpop.f32.mrb[20].mxu0 }
0x1952   :  { %v21989_v49 = vadd.f32 %v17859_v56, %v16112_v18  ;;  %v5978_v43 = vpop.f32.mrb[21].mxu0 }
0x1953   :  { %v21991_v51 = vadd.f32 %v16112_v18, %v5978_v43 }
0x1957   :  { %v20681_v17 = vpop.eup %20680 }
0x1958   :  { %v6486_v45 = vmul.f32 0.5, %v20681_v17  ;;  %v20683_v33 = vpop.eup %20682 }
0x195a   :  { %v6487_v60 = vadd.f32 0.5, %v6486_v45 }
0x195c   :  { %v6488_v61 = vsel %vm21304_vm4, %v20683_v33, %v6487_v60 }
0x195d   :  { %6491 = vrot.lane.b32.xlu0 %v6488_v61, %s20938_s3  ;;  %v6489_v14 = vmul.f32 0.0, %v6488_v61 }
0x19cf   :  { %v6492_v63 = vpop.permute.xlu0 %6491 }
0x19d0   :  { %v6494_v8 = vmul.f32 %v6492_v63, %v6488_v61 }
0x19d2   :  { %6496 = vrot.lane.b32.xlu0 %v6494_v8, %s20939_s16 }
0x1a44   :  { %v6497_v41 = vpop.permute.xlu0 %6496 }
0x1a45   :  { %v21997_v19 = vadd.f32 %v6497_v41, %v6489_v14 }
0x1a47   :  { %20684 = vtanh.f32 %v21997_v19 }
0x1a51   :  { %v20685_v59 = vpop.eup %20684 }
0x1a52   :  { %6502 = vrot.lane.b32.xlu1 %v20685_v59, %s20938_s3 }
0x1ac4   :  { %v6503_v11 = vpop.permute.xlu1 %6502 }
0x1ac5   :  { %v6505_v9 = vmul.f32 %v6503_v11, %v6488_v61 }
0x1ac7   :  { %6507 = vrot.lane.b32.xlu1 %v6505_v9, %s20939_s16 }
0x1b39   :  { %v6508_v12 = vpop.permute.xlu1 %6507 }
0x1b3a   :  { %6510 = vst.msk [vmem:[#allocation4] sm:$0xff] %vm999_vm5, %v6508_v12  ;;  %v6512_v13 = vsel %vm999_vm5, %v6508_v12, 0 }
0x1b3b   :  { %v6583_v2 = vand.u32 4294901760, %v6512_v13 }
0x1b3d   :  { %v6584_v3 = vsub.f32 %v6512_v13, %v6583_v2 }
0x1b3f   :  { %v6585_v40 = vand.u32 4294901760, %v6584_v3 }
0x1b41   :  { %v6586_v7 = vsub.f32 %v6584_v3, %v6585_v40 }
0x1b43   :  { %v6587_v27 = vand.u32 4294901760, %v6586_v7 }
0x1b45   :  { %17935 = vmatmul.mubr.f32.vlgmr.msra.gmra.mrb[20].mxu1 %v6587_v27 }
0x1b46   :  { %19560 = vmatpush3.bf16.msra.mxu1 %v21766_v58  ;;  %17945 = vmatprep.mubr.msk.f32.mxu1 %vm20936_vm1, %v20937_v50 }
0x1b47   :  { %19561 = vmatprep.subr.bf16.mxu1 %v20935_v30 }
0x1b4a   :  { %19563 = vmatpush3.bf16.msra.mxu1 %v21816_v62 }
0x1b4b   :  { %19564 = vmatprep.subr.bf16.mxu1 %v20935_v30 }
0x1b4d   :  { %17946 = vmatmul.mubr.f32.vlgmr.msra.gmra.mrb[20].mxu1 %v6583_v2 }
0x1b4e   :  { %19566 = vmatpush3.bf16.msra.mxu1 %v21836_v55  ;;  %17956 = vmatprep.mubr.msk.f32.mxu1 %vm20936_vm1, %v20937_v50 }
0x1b4f   :  { %19567 = vmatprep.subr.bf16.mxu1 %v20935_v30 }
0x1b52   :  { %19569 = vmatpush3.bf16.msra.mxu1 %v21856_v53 }
0x1b53   :  { %19570 = vmatprep.subr.bf16.mxu1 %v20935_v30 }
0x1b55   :  { %17957 = vmatmul.mubr.f32.vlgmr.msra.gmra.mrb[20].mxu1 %v6584_v3 }
0x1b56   :  { %19572 = vmatpush3.bf16.msra.mxu1 %v21693_v20  ;;  %17967 = vmatprep.mubr.msk.f32.mxu1 %vm20936_vm1, %v20937_v50 }
0x1b57   :  { %19573 = vmatprep.subr.bf16.mxu1 %v20935_v30 }
0x1b5a   :  { %19575 = vmatpush3.bf16.msra.mxu1 %v21695_v24 }
0x1b5b   :  { %19576 = vmatprep.subr.bf16.mxu1 %v20935_v30 }
0x1b5d   :  { %17968 = vmatmul.mubr.f32.vlgmr.msra.gmra.mrb[20].mxu1 %v6585_v40 }
0x1b5e   :  { %19578 = vmatpush3.bf16.msra.mxu1 %v21879_v52  ;;  %17978 = vmatprep.mubr.msk.f32.mxu1 %vm20936_vm1, %v20937_v50 }
0x1b5f   :  { %19579 = vmatprep.subr.bf16.mxu1 %v20935_v30 }
0x1b62   :  { %19581 = vmatpush3.bf16.msra.mxu1 %v21890_v25 }
0x1b63   :  { %19582 = vmatprep.subr.bf16.mxu1 %v20935_v30 }
0x1b65   :  { %17979 = vmatmul.mubr.f32.vlgmr.msra.gmra.mrb[20].mxu1 %v6583_v2 }
0x1b66   :  { %19584 = vmatpush3.bf16.msra.mxu1 %v21693_v20  ;;  %17989 = vmatprep.mubr.msk.f32.mxu1 %vm20936_vm1, %v20937_v50 }
0x1b67   :  { %19585 = vmatprep.subr.bf16.mxu1 %v20935_v30 }
0x1b6a   :  { %19587 = vmatpush3.bf16.msra.mxu1 %v21695_v24 }
0x1b6b   :  { %19624 = vmatprep.subr.bf16.mxu1 %v20935_v30 }
0x1b6d   :  { %17990 = vmatmul.mubr.f32.vlgmr.msra.gmra.mrb[20].mxu1 %v6583_v2 }
0x1b6e   :  { %19626 = vmatpush3.bf16.msra.mxu1 %v21693_v20  ;;  %18066 = vmatprep.mubr.msk.f32.mxu1 %vm20936_vm1, %v20937_v50 }
0x1b6f   :  { %19627 = vmatprep.subr.bf16.mxu1 %v20935_v30 }
0x1b72   :  { %19629 = vmatpush3.bf16.msra.mxu1 %v21695_v24 }
0x1b73   :  { %19630 = vmatprep.subr.bf16.mxu1 %v20935_v30 }
0x1c40   :  { %v6995_v44 = vpop.f32.mrb[20].mxu1 }
0x1c41   :  { %v6999_v48 = vadd.f32 %v21979_v0, %v6995_v44  ;;  %v17991_v23 = vpop.f32.mrb[21].mxu1 }
0x1c43   :  { %v7001_v28 = vmul.f32 0.5, %v6999_v48 }
0x1c45   :  { %20686 = vtanh.f32 %v7001_v28 }
0x1c46   :  { %20688 = vtanh.f32 %v6999_v48 }
0x1c4f   :  { %v20687_v29 = vpop.eup %20686 }
0x1c50   :  { %v7003_v34 = vmul.f32 0.5, %v20687_v29  ;;  %v20689_v54 = vpop.eup %20688 }
0x1c52   :  { %v7004_v31 = vadd.f32 0.5, %v7003_v34 }
0x1c54   :  { %v7005_v57 = vsel %vm21304_vm4, %v20689_v54, %v7004_v31 }
0x1c55   :  { %7008 = vrot.lane.b32.xlu0 %v7005_v57, %s20938_s3  ;;  %v7006_v21 = vmul.f32 %v7005_v57, %v21997_v19 }
0x1cc7   :  { %v7009_v26 = vpop.permute.xlu0 %7008 }
0x1cc8   :  { %v7011_v16 = vmul.f32 %v7009_v26, %v7005_v57 }
0x1cca   :  { %7013 = vrot.lane.b32.xlu1 %v7011_v16, %s20939_s16 }
0x1d3c   :  { %v7014_v15 = vpop.permute.xlu1 %7013 }
0x1d3d   :  { %v22046_v18 = vadd.f32 %v7014_v15, %v7006_v21 }
0x1d3f   :  { %20690 = vtanh.f32 %v22046_v18 }
0x1d49   :  { %v20691_v38 = vpop.eup %20690 }
0x1d4a   :  { %7019 = vrot.lane.b32.xlu0 %v20691_v38, %s20938_s3 }
0x1dbc   :  { %v7020_v0 = vpop.permute.xlu0 %7019 }
0x1dbd   :  { %v7022_v22 = vmul.f32 %v7020_v0, %v7005_v57 }
0x1dbf   :  { %7024 = vrot.lane.b32.xlu1 %v7022_v22, %s20939_s16 }
0x1e31   :  { %v7025_v1 = vpop.permute.xlu1 %7024 }
0x1e32   :  { %7028 = vst.msk [vmem:[#allocation4 + $0x8] sm:$0xff] %vm999_vm5, %v7025_v1  ;;  %v7030_v4 = vsel %vm999_vm5, %v7025_v1, 0 }
0x1e33   :  { %v7101_v5 = vand.u32 4294901760, %v7030_v4 }
0x1e35   :  { %v7102_v35 = vsub.f32 %v7030_v4, %v7101_v5 }
0x1e37   :  { %v7103_v39 = vand.u32 4294901760, %v7102_v35 }
0x1e39   :  { %v7104_v10 = vsub.f32 %v7102_v35, %v7103_v39 }
0x1e3b   :  { %v7105_v42 = vand.u32 4294901760, %v7104_v10 }
0x1e3d   :  { %18001 = vmatmul.mubr.f32.vlgmr.msra.gmra.mrb[22].mxu0 %v7105_v42 }
0x1e3e   :  { %19596 = vmatpush3.bf16.msra.mxu0 %v21766_v58  ;;  %18011 = vmatprep.mubr.msk.f32.mxu0 %vm20936_vm1, %v20937_v50 }
0x1e3f   :  { %19597 = vmatprep.subr.bf16.mxu0 %v20935_v30 }
0x1e42   :  { %19599 = vmatpush3.bf16.msra.mxu0 %v21816_v62 }
0x1e43   :  { %19600 = vmatprep.subr.bf16.mxu0 %v20935_v30 }
0x1e45   :  { %18012 = vmatmul.mubr.f32.vlgmr.msra.gmra.mrb[22].mxu0 %v7101_v5 }
0x1e46   :  { %19602 = vmatpush3.bf16.msra.mxu0 %v21836_v55  ;;  %18022 = vmatprep.mubr.msk.f32.mxu0 %vm20936_vm1, %v20937_v50 }
0x1e47   :  { %19603 = vmatprep.subr.bf16.mxu0 %v20935_v30 }
0x1e4a   :  { %19605 = vmatpush3.bf16.msra.mxu0 %v21856_v53 }
0x1e4b   :  { %19606 = vmatprep.subr.bf16.mxu0 %v20935_v30 }
0x1e4d   :  { %18023 = vmatmul.mubr.f32.vlgmr.msra.gmra.mrb[22].mxu0 %v7102_v35 }
0x1e4e   :  { %19608 = vmatpush3.bf16.msra.mxu0 %v21693_v20  ;;  %18033 = vmatprep.mubr.msk.f32.mxu0 %vm20936_vm1, %v20937_v50 }
0x1e4f   :  { %19609 = vmatprep.subr.bf16.mxu0 %v20935_v30 }
0x1e52   :  { %19611 = vmatpush3.bf16.msra.mxu0 %v21695_v24 }
0x1e53   :  { %19612 = vmatprep.subr.bf16.mxu0 %v20935_v30 }
0x1e55   :  { %18034 = vmatmul.mubr.f32.vlgmr.msra.gmra.mrb[22].mxu0 %v7103_v39 }
0x1e56   :  { %19614 = vmatpush3.bf16.msra.mxu0 %v21879_v52  ;;  %18044 = vmatprep.mubr.msk.f32.mxu0 %vm20936_vm1, %v20937_v50 }
0x1e57   :  { %19615 = vmatprep.subr.bf16.mxu0 %v20935_v30 }
0x1e5a   :  { %19617 = vmatpush3.bf16.msra.mxu0 %v21890_v25 }
0x1e5b   :  { %19618 = vmatprep.subr.bf16.mxu0 %v20935_v30 }
0x1e5d   :  { %18045 = vmatmul.mubr.f32.vlgmr.msra.gmra.mrb[22].mxu0 %v7101_v5 }
0x1e5e   :  { %19620 = vmatpush3.bf16.msra.mxu0 %v21693_v20  ;;  %18055 = vmatprep.mubr.msk.f32.mxu0 %vm20936_vm1, %v20937_v50 }
0x1e5f   :  { %19621 = vmatprep.subr.bf16.mxu0 %v20935_v30 }
0x1e62   :  { %19623 = vmatpush3.bf16.msra.mxu0 %v21695_v24 }
0x1e63   :  { %19660 = vmatprep.subr.bf16.mxu0 %v20935_v30 }
0x1e65   :  { %18056 = vmatmul.mubr.f32.vlgmr.msra.gmra.mrb[22].mxu0 %v7101_v5 }
0x1e66   :  { %19662 = vmatpush3.bf16.msra.mxu0 %v21693_v20  ;;  %18132 = vmatprep.mubr.msk.f32.mxu0 %vm20936_vm1, %v20937_v50 }
0x1e67   :  { %19663 = vmatprep.subr.bf16.mxu0 %v20935_v30 }
0x1e6a   :  { %19665 = vmatpush3.bf16.msra.mxu0 %v21695_v24 }
0x1e6b   :  { %19666 = vmatprep.subr.bf16.mxu0 %v20935_v30 }
0x1f38   :  { %v7513_v56 = vpop.f32.mrb[22].mxu0 }
0x1f39   :  { %v7517_v43 = vadd.f32 %v21983_v6, %v7513_v56  ;;  %v18057_v17 = vpop.f32.mrb[23].mxu0 }
0x1f3b   :  { %v7519_v45 = vmul.f32 0.5, %v7517_v43 }
0x1f3d   :  { %20692 = vtanh.f32 %v7519_v45 }
0x1f3e   :  { %20694 = vtanh.f32 %v7517_v43 }
0x1f47   :  { %v20693_v60 = vpop.eup %20692 }
0x1f48   :  { %v7521_v33 = vmul.f32 0.5, %v20693_v60  ;;  %v20695_v63 = vpop.eup %20694 }
0x1f4a   :  { %v7522_v61 = vadd.f32 0.5, %v7521_v33 }
0x1f4c   :  { %v7523_v8 = vsel %vm21304_vm4, %v20695_v63, %v7522_v61 }
0x1f4d   :  { %7526 = vrot.lane.b32.xlu0 %v7523_v8, %s20938_s3  ;;  %v7524_v19 = vmul.f32 %v7523_v8, %v22046_v18 }
0x1fbf   :  { %v7527_v14 = vpop.permute.xlu0 %7526 }
0x1fc0   :  { %v7529_v41 = vmul.f32 %v7527_v14, %v7523_v8 }
0x1fc2   :  { %7531 = vrot.lane.b32.xlu1 %v7529_v41, %s20939_s16 }
0x2034   :  { %v7532_v6 = vpop.permute.xlu1 %7531 }
0x2035   :  { %v22095_v59 = vadd.f32 %v7532_v6, %v7524_v19 }
0x2037   :  { %20696 = vtanh.f32 %v22095_v59 }
0x2041   :  { %v20697_v11 = vpop.eup %20696 }
0x2042   :  { %7537 = vrot.lane.b32.xlu0 %v20697_v11, %s20938_s3 }
0x20b4   :  { %v7538_v9 = vpop.permute.xlu0 %7537 }
0x20b5   :  { %v7540_v12 = vmul.f32 %v7538_v9, %v7523_v8 }
0x20b7   :  { %7542 = vrot.lane.b32.xlu1 %v7540_v12, %s20939_s16 }
0x2129   :  { %v7543_v13 = vpop.permute.xlu1 %7542 }
0x212a   :  { %7546 = vst.msk [vmem:[#allocation4 + $0x10] sm:$0xff] %vm999_vm5, %v7543_v13  ;;  %v7548_v2 = vsel %vm999_vm5, %v7543_v13, 0 }
0x212b   :  { %v7619_v3 = vand.u32 4294901760, %v7548_v2 }
0x212d   :  { %v7620_v40 = vsub.f32 %v7548_v2, %v7619_v3 }
0x212f   :  { %v7621_v7 = vand.u32 4294901760, %v7620_v40 }
0x2131   :  { %v7622_v27 = vsub.f32 %v7620_v40, %v7621_v7 }
0x2133   :  { %v7623_v44 = vand.u32 4294901760, %v7622_v27 }
0x2135   :  { %18067 = vmatmul.mubr.f32.vlgmr.msra.gmra.mrb[22].mxu1 %v7623_v44 }
0x2136   :  { %19632 = vmatpush3.bf16.msra.mxu1 %v21766_v58  ;;  %18077 = vmatprep.mubr.msk.f32.mxu1 %vm20936_vm1, %v20937_v50 }
0x2137   :  { %19633 = vmatprep.subr.bf16.mxu1 %v20935_v30 }
0x213a   :  { %19635 = vmatpush3.bf16.msra.mxu1 %v21816_v62 }
0x213b   :  { %19636 = vmatprep.subr.bf16.mxu1 %v20935_v30 }
0x213d   :  { %18078 = vmatmul.mubr.f32.vlgmr.msra.gmra.mrb[22].mxu1 %v7619_v3 }
0x213e   :  { %19638 = vmatpush3.bf16.msra.mxu1 %v21836_v55  ;;  %18088 = vmatprep.mubr.msk.f32.mxu1 %vm20936_vm1, %v20937_v50 }
0x213f   :  { %19639 = vmatprep.subr.bf16.mxu1 %v20935_v30 }
0x2142   :  { %19641 = vmatpush3.bf16.msra.mxu1 %v21856_v53 }
0x2143   :  { %19642 = vmatprep.subr.bf16.mxu1 %v20935_v30 }
0x2145   :  { %18089 = vmatmul.mubr.f32.vlgmr.msra.gmra.mrb[22].mxu1 %v7620_v40 }
0x2146   :  { %19644 = vmatpush3.bf16.msra.mxu1 %v21693_v20  ;;  %18099 = vmatprep.mubr.msk.f32.mxu1 %vm20936_vm1, %v20937_v50 }
0x2147   :  { %19645 = vmatprep.subr.bf16.mxu1 %v20935_v30 }
0x214a   :  { %19647 = vmatpush3.bf16.msra.mxu1 %v21695_v24 }
0x214b   :  { %19648 = vmatprep.subr.bf16.mxu1 %v20935_v30 }
0x214d   :  { %18100 = vmatmul.mubr.f32.vlgmr.msra.gmra.mrb[22].mxu1 %v7621_v7 }
0x214e   :  { %19650 = vmatpush3.bf16.msra.mxu1 %v21879_v52  ;;  %18110 = vmatprep.mubr.msk.f32.mxu1 %vm20936_vm1, %v20937_v50 }
0x214f   :  { %19651 = vmatprep.subr.bf16.mxu1 %v20935_v30 }
0x2152   :  { %19653 = vmatpush3.bf16.msra.mxu1 %v21890_v25 }
0x2153   :  { %19654 = vmatprep.subr.bf16.mxu1 %v20935_v30 }
0x2155   :  { %18111 = vmatmul.mubr.f32.vlgmr.msra.gmra.mrb[22].mxu1 %v7619_v3 }
0x2156   :  { %19656 = vmatpush3.bf16.msra.mxu1 %v21693_v20  ;;  %18121 = vmatprep.mubr.msk.f32.mxu1 %vm20936_vm1, %v20937_v50 }
0x2157   :  { %19657 = vmatprep.subr.bf16.mxu1 %v20935_v30 }
0x215a   :  { %19659 = vmatpush3.bf16.msra.mxu1 %v21695_v24 }
0x215b   :  { %19696 = vmatprep.subr.bf16.mxu1 %v20935_v30 }
0x215d   :  { %18122 = vmatmul.mubr.f32.vlgmr.msra.gmra.mrb[22].mxu1 %v7619_v3 }
0x215e   :  { %19698 = vmatpush3.bf16.msra.mxu1 %v21693_v20  ;;  %18198 = vmatprep.mubr.msk.f32.mxu1 %vm20936_vm1, %v20937_v50 }
0x215f   :  { %19699 = vmatprep.subr.bf16.mxu1 %v20935_v30 }
0x2162   :  { %19701 = vmatpush3.bf16.msra.mxu1 %v21695_v24 }
0x2163   :  { %19702 = vmatprep.subr.bf16.mxu1 %v20935_v30 }
0x2230   :  { %v8031_v48 = vpop.f32.mrb[22].mxu1 }
0x2231   :  { %v8035_v23 = vadd.f32 %v21981_v32, %v8031_v48  ;;  %v18123_v28 = vpop.f32.mrb[23].mxu1 }
0x2233   :  { %v8037_v29 = vmul.f32 0.5, %v8035_v23 }
0x2235   :  { %20698 = vtanh.f32 %v8037_v29 }
0x2236   :  { %20700 = vtanh.f32 %v8035_v23 }
0x223f   :  { %v20699_v34 = vpop.eup %20698 }
0x2240   :  { %v8039_v31 = vmul.f32 0.5, %v20699_v34  ;;  %v20701_v57 = vpop.eup %20700 }
0x2242   :  { %v8040_v54 = vadd.f32 0.5, %v8039_v31 }
0x2244   :  { %v8041_v26 = vsel %vm21304_vm4, %v20701_v57, %v8040_v54 }
0x2245   :  { %8044 = vrot.lane.b32.xlu0 %v8041_v26, %s20938_s3  ;;  %v8042_v15 = vmul.f32 %v8041_v26, %v22095_v59 }
0x22b7   :  { %v8045_v16 = vpop.permute.xlu0 %8044 }
0x22b8   :  { %v8047_v21 = vmul.f32 %v8045_v16, %v8041_v26 }
0x22ba   :  { %8049 = vrot.lane.b32.xlu1 %v8047_v21, %s20939_s16 }
0x232c   :  { %v8050_v32 = vpop.permute.xlu1 %8049 }
0x232d   :  { %v22144_v18 = vadd.f32 %v8050_v32, %v8042_v15 }
0x232f   :  { %20702 = vtanh.f32 %v22144_v18 }
0x2339   :  { %v20703_v38 = vpop.eup %20702 }
0x233a   :  { %8055 = vrot.lane.b32.xlu0 %v20703_v38, %s20938_s3 }
0x23ac   :  { %v8056_v0 = vpop.permute.xlu0 %8055 }
0x23ad   :  { %v8058_v22 = vmul.f32 %v8056_v0, %v8041_v26 }
0x23af   :  { %8060 = vrot.lane.b32.xlu1 %v8058_v22, %s20939_s16 }
0x2421   :  { %v8061_v1 = vpop.permute.xlu1 %8060 }
0x2422   :  { %8064 = vst.msk [vmem:[#allocation4 + $0x18] sm:$0xff] %vm999_vm5, %v8061_v1  ;;  %v8066_v4 = vsel %vm999_vm5, %v8061_v1, 0 }
0x2423   :  { %v8137_v5 = vand.u32 4294901760, %v8066_v4 }
0x2425   :  { %v8138_v35 = vsub.f32 %v8066_v4, %v8137_v5 }
0x2427   :  { %v8139_v39 = vand.u32 4294901760, %v8138_v35 }
0x2429   :  { %v8140_v10 = vsub.f32 %v8138_v35, %v8139_v39 }
0x242b   :  { %v8141_v42 = vand.u32 4294901760, %v8140_v10 }
0x242d   :  { %18133 = vmatmul.mubr.f32.vlgmr.msra.gmra.mrb[24].mxu0 %v8141_v42 }
0x242e   :  { %19668 = vmatpush3.bf16.msra.mxu0 %v21766_v58  ;;  %18143 = vmatprep.mubr.msk.f32.mxu0 %vm20936_vm1, %v20937_v50 }
0x242f   :  { %19669 = vmatprep.subr.bf16.mxu0 %v20935_v30 }
0x2432   :  { %19671 = vmatpush3.bf16.msra.mxu0 %v21816_v62 }
0x2433   :  { %19672 = vmatprep.subr.bf16.mxu0 %v20935_v30 }
0x2435   :  { %18144 = vmatmul.mubr.f32.vlgmr.msra.gmra.mrb[24].mxu0 %v8137_v5 }
0x2436   :  { %19674 = vmatpush3.bf16.msra.mxu0 %v21836_v55  ;;  %18154 = vmatprep.mubr.msk.f32.mxu0 %vm20936_vm1, %v20937_v50 }
0x2437   :  { %19675 = vmatprep.subr.bf16.mxu0 %v20935_v30 }
0x243a   :  { %19677 = vmatpush3.bf16.msra.mxu0 %v21856_v53 }
0x243b   :  { %19678 = vmatprep.subr.bf16.mxu0 %v20935_v30 }
0x243d   :  { %18155 = vmatmul.mubr.f32.vlgmr.msra.gmra.mrb[24].mxu0 %v8138_v35 }
0x243e   :  { %19680 = vmatpush3.bf16.msra.mxu0 %v21693_v20  ;;  %18165 = vmatprep.mubr.msk.f32.mxu0 %vm20936_vm1, %v20937_v50 }
0x243f   :  { %19681 = vmatprep.subr.bf16.mxu0 %v20935_v30 }
0x2442   :  { %19683 = vmatpush3.bf16.msra.mxu0 %v21695_v24 }
0x2443   :  { %19684 = vmatprep.subr.bf16.mxu0 %v20935_v30 }
0x2445   :  { %18166 = vmatmul.mubr.f32.vlgmr.msra.gmra.mrb[24].mxu0 %v8139_v39 }
0x2446   :  { %19686 = vmatpush3.bf16.msra.mxu0 %v21879_v52  ;;  %18176 = vmatprep.mubr.msk.f32.mxu0 %vm20936_vm1, %v20937_v50 }
0x2447   :  { %19687 = vmatprep.subr.bf16.mxu0 %v20935_v30 }
0x244a   :  { %19689 = vmatpush3.bf16.msra.mxu0 %v21890_v25 }
0x244b   :  { %19690 = vmatprep.subr.bf16.mxu0 %v20935_v30 }
0x244d   :  { %18177 = vmatmul.mubr.f32.vlgmr.msra.gmra.mrb[24].mxu0 %v8137_v5 }
0x244e   :  { %19692 = vmatpush3.bf16.msra.mxu0 %v21693_v20  ;;  %18187 = vmatprep.mubr.msk.f32.mxu0 %vm20936_vm1, %v20937_v50 }
0x244f   :  { %19693 = vmatprep.subr.bf16.mxu0 %v20935_v30 }
0x2452   :  { %19695 = vmatpush3.bf16.msra.mxu0 %v21695_v24 }
0x2453   :  { %19732 = vmatprep.subr.bf16.mxu0 %v20935_v30 }
0x2455   :  { %18188 = vmatmul.mubr.f32.vlgmr.msra.gmra.mrb[24].mxu0 %v8137_v5 }
0x2456   :  { %19734 = vmatpush3.bf16.msra.mxu0 %v21693_v20  ;;  %18264 = vmatprep.mubr.msk.f32.mxu0 %vm20936_vm1, %v20937_v50 }
0x2457   :  { %19735 = vmatprep.subr.bf16.mxu0 %v20935_v30 }
0x245a   :  { %19737 = vmatpush3.bf16.msra.mxu0 %v21695_v24 }
0x245b   :  { %19738 = vmatprep.subr.bf16.mxu0 %v20935_v30 }
0x2528   :  { %v8549_v56 = vpop.f32.mrb[24].mxu0 }
0x2529   :  { %v8553_v43 = vadd.f32 %v21987_v46, %v8549_v56  ;;  %v18189_v17 = vpop.f32.mrb[25].mxu0 }
0x252b   :  { %v8555_v45 = vmul.f32 0.5, %v8553_v43 }
0x252d   :  { %20704 = vtanh.f32 %v8555_v45 }
0x252e   :  { %20706 = vtanh.f32 %v8553_v43 }
0x2537   :  { %v20705_v60 = vpop.eup %20704 }
0x2538   :  { %v8557_v33 = vmul.f32 0.5, %v20705_v60  ;;  %v20707_v63 = vpop.eup %20706 }
0x253a   :  { %v8558_v61 = vadd.f32 0.5, %v8557_v33 }
0x253c   :  { %v8559_v8 = vsel %vm21304_vm4, %v20707_v63, %v8558_v61 }
0x253d   :  { %8562 = vrot.lane.b32.xlu0 %v8559_v8, %s20938_s3  ;;  %v8560_v19 = vmul.f32 %v8559_v8, %v22144_v18 }
0x25af   :  { %v8563_v14 = vpop.permute.xlu0 %8562 }
0x25b0   :  { %v8565_v41 = vmul.f32 %v8563_v14, %v8559_v8 }
0x25b2   :  { %8567 = vrot.lane.b32.xlu1 %v8565_v41, %s20939_s16 }
0x2624   :  { %v8568_v46 = vpop.permute.xlu1 %8567 }
0x2625   :  { %v22193_v6 = vadd.f32 %v8568_v46, %v8560_v19 }
0x2627   :  { %20708 = vtanh.f32 %v22193_v6 }
0x2631   :  { %v20709_v59 = vpop.eup %20708 }
0x2632   :  { %8573 = vrot.lane.b32.xlu0 %v20709_v59, %s20938_s3 }
0x26a4   :  { %v8574_v11 = vpop.permute.xlu0 %8573 }
0x26a5   :  { %v8576_v9 = vmul.f32 %v8574_v11, %v8559_v8 }
0x26a7   :  { %8578 = vrot.lane.b32.xlu1 %v8576_v9, %s20939_s16 }
0x2719   :  { %v8579_v12 = vpop.permute.xlu1 %8578 }
0x271a   :  { %8582 = vst.msk [vmem:[#allocation4 + $0x20] sm:$0xff] %vm999_vm5, %v8579_v12  ;;  %v8584_v13 = vsel %vm999_vm5, %v8579_v12, 0 }
0x271b   :  { %v8655_v2 = vand.u32 4294901760, %v8584_v13 }
0x271d   :  { %v8656_v3 = vsub.f32 %v8584_v13, %v8655_v2 }
0x271f   :  { %v8657_v40 = vand.u32 4294901760, %v8656_v3 }
0x2721   :  { %v8658_v7 = vsub.f32 %v8656_v3, %v8657_v40 }
0x2723   :  { %v8659_v27 = vand.u32 4294901760, %v8658_v7 }
0x2725   :  { %18199 = vmatmul.mubr.f32.vlgmr.msra.gmra.mrb[24].mxu1 %v8659_v27 }
0x2726   :  { %19704 = vmatpush3.bf16.msra.mxu1 %v21766_v58  ;;  %18209 = vmatprep.mubr.msk.f32.mxu1 %vm20936_vm1, %v20937_v50 }
0x2727   :  { %19705 = vmatprep.subr.bf16.mxu1 %v20935_v30 }
0x272a   :  { %19707 = vmatpush3.bf16.msra.mxu1 %v21816_v62 }
0x272b   :  { %19708 = vmatprep.subr.bf16.mxu1 %v20935_v30 }
0x272d   :  { %18210 = vmatmul.mubr.f32.vlgmr.msra.gmra.mrb[24].mxu1 %v8655_v2 }
0x272e   :  { %19710 = vmatpush3.bf16.msra.mxu1 %v21836_v55  ;;  %18220 = vmatprep.mubr.msk.f32.mxu1 %vm20936_vm1, %v20937_v50 }
0x272f   :  { %19711 = vmatprep.subr.bf16.mxu1 %v20935_v30 }
0x2732   :  { %19713 = vmatpush3.bf16.msra.mxu1 %v21856_v53 }
0x2733   :  { %19714 = vmatprep.subr.bf16.mxu1 %v20935_v30 }
0x2735   :  { %18221 = vmatmul.mubr.f32.vlgmr.msra.gmra.mrb[24].mxu1 %v8656_v3 }
0x2736   :  { %19716 = vmatpush3.bf16.msra.mxu1 %v21693_v20  ;;  %18231 = vmatprep.mubr.msk.f32.mxu1 %vm20936_vm1, %v20937_v50 }
0x2737   :  { %19717 = vmatprep.subr.bf16.mxu1 %v20935_v30 }
0x273a   :  { %19719 = vmatpush3.bf16.msra.mxu1 %v21695_v24 }
0x273b   :  { %19720 = vmatprep.subr.bf16.mxu1 %v20935_v30 }
0x273d   :  { %18232 = vmatmul.mubr.f32.vlgmr.msra.gmra.mrb[24].mxu1 %v8657_v40 }
0x273e   :  { %19722 = vmatpush3.bf16.msra.mxu1 %v21879_v52  ;;  %18242 = vmatprep.mubr.msk.f32.mxu1 %vm20936_vm1, %v20937_v50 }
0x273f   :  { %19723 = vmatprep.subr.bf16.mxu1 %v20935_v30 }
0x2742   :  { %19725 = vmatpush3.bf16.msra.mxu1 %v21890_v25 }
0x2743   :  { %19726 = vmatprep.subr.bf16.mxu1 %v20935_v30 }
0x2745   :  { %18243 = vmatmul.mubr.f32.vlgmr.msra.gmra.mrb[24].mxu1 %v8655_v2 }
0x2746   :  { %19728 = vmatpush3.bf16.msra.mxu1 %v21693_v20  ;;  %18253 = vmatprep.mubr.msk.f32.mxu1 %vm20936_vm1, %v20937_v50 }
0x2747   :  { %19729 = vmatprep.subr.bf16.mxu1 %v20935_v30 }
0x274a   :  { %19731 = vmatpush3.bf16.msra.mxu1 %v21695_v24 }
0x274b   :  { %19768 = vmatprep.subr.bf16.mxu1 %v20935_v30 }
0x274d   :  { %18254 = vmatmul.mubr.f32.vlgmr.msra.gmra.mrb[24].mxu1 %v8655_v2 }
0x274e   :  { %19770 = vmatpush3.bf16.msra.mxu1 %v21693_v20  ;;  %18330 = vmatprep.mubr.msk.f32.mxu1 %vm20936_vm1, %v20937_v50 }
0x274f   :  { %19771 = vmatprep.subr.bf16.mxu1 %v20935_v30 }
0x2752   :  { %19773 = vmatpush3.bf16.msra.mxu1 %v21695_v24 }
0x2753   :  { %19774 = vmatprep.subr.bf16.mxu1 %v20935_v30 }
0x2820   :  { %v9067_v44 = vpop.f32.mrb[24].mxu1 }
0x2821   :  { %v9071_v48 = vadd.f32 %v21985_v47, %v9067_v44  ;;  %v18255_v23 = vpop.f32.mrb[25].mxu1 }
0x2823   :  { %v9073_v28 = vmul.f32 0.5, %v9071_v48 }
0x2825   :  { %20710 = vtanh.f32 %v9073_v28 }
0x2826   :  { %20712 = vtanh.f32 %v9071_v48 }
0x282f   :  { %v20711_v29 = vpop.eup %20710 }
0x2830   :  { %v9075_v34 = vmul.f32 0.5, %v20711_v29  ;;  %v20713_v54 = vpop.eup %20712 }
0x2832   :  { %v9076_v31 = vadd.f32 0.5, %v9075_v34 }
0x2834   :  { %v9077_v57 = vsel %vm21304_vm4, %v20713_v54, %v9076_v31 }
0x2835   :  { %9080 = vrot.lane.b32.xlu0 %v9077_v57, %s20938_s3  ;;  %v9078_v21 = vmul.f32 %v9077_v57, %v22193_v6 }
0x28a7   :  { %v9081_v26 = vpop.permute.xlu0 %9080 }
0x28a8   :  { %v9083_v16 = vmul.f32 %v9081_v26, %v9077_v57 }
0x28aa   :  { %9085 = vrot.lane.b32.xlu1 %v9083_v16, %s20939_s16 }
0x291c   :  { %v9086_v47 = vpop.permute.xlu1 %9085 }
0x291d   :  { %v9088_v15 = vadd.f32 %v9086_v47, %v9078_v21 }
0x291f   :  { %20714 = vtanh.f32 %v9088_v15 }
0x2929   :  { %v20715_v32 = vpop.eup %20714 }
0x292a   :  { %9091 = vrot.lane.b32.xlu0 %v20715_v32, %s20938_s3 }
0x299c   :  { %v9092_v18 = vpop.permute.xlu0 %9091 }
0x299d   :  { %v9094_v38 = vmul.f32 %v9092_v18, %v9077_v57 }
0x299f   :  { %9096 = vrot.lane.b32.xlu1 %v9094_v38, %s20939_s16 }
0x2a11   :  { %v9097_v0 = vpop.permute.xlu1 %9096 }
0x2a12   :  { %9100 = vst.msk [vmem:[#allocation4 + $0x28] sm:$0xff] %vm999_vm5, %v9097_v0  ;;  %v9102_v22 = vsel %vm999_vm5, %v9097_v0, 0 }
0x2a13   :  { %v9173_v1 = vand.u32 4294901760, %v9102_v22 }
0x2a15   :  { %v9174_v4 = vsub.f32 %v9102_v22, %v9173_v1 }
0x2a17   :  { %v9175_v5 = vand.u32 4294901760, %v9174_v4 }
0x2a19   :  { %v9176_v35 = vsub.f32 %v9174_v4, %v9175_v5 }
0x2a1b   :  { %v9177_v39 = vand.u32 4294901760, %v9176_v35 }
0x2a1d   :  { %18265 = vmatmul.mubr.f32.vlgmr.msra.gmra.mrb[26].mxu0 %v9177_v39 }
0x2a1e   :  { %19740 = vmatpush3.bf16.msra.mxu0 %v21766_v58  ;;  %18275 = vmatprep.mubr.msk.f32.mxu0 %vm20936_vm1, %v20937_v50 }
0x2a1f   :  { %19741 = vmatprep.subr.bf16.mxu0 %v20935_v30 }
0x2a22   :  { %19743 = vmatpush3.bf16.msra.mxu0 %v21816_v62 }
0x2a23   :  { %19744 = vmatprep.subr.bf16.mxu0 %v20935_v30 }
0x2a25   :  { %18276 = vmatmul.mubr.f32.vlgmr.msra.gmra.mrb[26].mxu0 %v9173_v1 }
0x2a26   :  { %19746 = vmatpush3.bf16.msra.mxu0 %v21836_v55  ;;  %18286 = vmatprep.mubr.msk.f32.mxu0 %vm20936_vm1, %v20937_v50 }
0x2a27   :  { %19747 = vmatprep.subr.bf16.mxu0 %v20935_v30 }
0x2a2a   :  { %19749 = vmatpush3.bf16.msra.mxu0 %v21856_v53 }
0x2a2b   :  { %19750 = vmatprep.subr.bf16.mxu0 %v20935_v30 }
0x2a2d   :  { %18287 = vmatmul.mubr.f32.vlgmr.msra.gmra.mrb[26].mxu0 %v9174_v4 }
0x2a2e   :  { %19752 = vmatpush3.bf16.msra.mxu0 %v21693_v20  ;;  %18297 = vmatprep.mubr.msk.f32.mxu0 %vm20936_vm1, %v20937_v50 }
0x2a2f   :  { %19753 = vmatprep.subr.bf16.mxu0 %v20935_v30 }
0x2a32   :  { %19755 = vmatpush3.bf16.msra.mxu0 %v21695_v24 }
0x2a33   :  { %19756 = vmatprep.subr.bf16.mxu0 %v20935_v30 }
0x2a35   :  { %18298 = vmatmul.mubr.f32.vlgmr.msra.gmra.mrb[26].mxu0 %v9175_v5 }
0x2a36   :  { %19758 = vmatpush3.bf16.msra.mxu0 %v21879_v52  ;;  %18308 = vmatprep.mubr.msk.f32.mxu0 %vm20936_vm1, %v20937_v50 }
0x2a37   :  { %19759 = vmatprep.subr.bf16.mxu0 %v20935_v30 }
0x2a3a   :  { %19761 = vmatpush3.bf16.msra.mxu0 %v21890_v25 }
0x2a3b   :  { %19762 = vmatprep.subr.bf16.mxu0 %v20935_v30 }
0x2a3d   :  { %18309 = vmatmul.mubr.f32.vlgmr.msra.gmra.mrb[26].mxu0 %v9173_v1 }
0x2a3e   :  { %19764 = vmatpush3.bf16.msra.mxu0 %v21693_v20  ;;  %18319 = vmatprep.mubr.msk.f32.mxu0 %vm20936_vm1, %v20937_v50 }
0x2a3f   :  { %19765 = vmatprep.subr.bf16.mxu0 %v20935_v30 }
0x2a42   :  { %19767 = vmatpush3.bf16.msra.mxu0 %v21695_v24 }
0x2a45   :  { %18320 = vmatmul.mubr.f32.vlgmr.msra.gmra.mrb[26].mxu0 %v9173_v1 }
0x2b18   :  { %v9585_v10 = vpop.f32.mrb[26].mxu0 }
0x2b19   :  { %v9589_v42 = vadd.f32 %v21991_v51, %v9585_v10  ;;  %v18321_v56 = vpop.f32.mrb[27].mxu0 }
0x2b1b   :  { %v9591_v43 = vmul.f32 0.5, %v9589_v42 }
0x2b1d   :  { %20716 = vtanh.f32 %v9591_v43 }
0x2b1e   :  { %20718 = vtanh.f32 %v9589_v42 }
0x2b27   :  { %v20717_v17 = vpop.eup %20716 }
0x2b28   :  { %v9593_v45 = vmul.f32 0.5, %v20717_v17  ;;  %v20719_v33 = vpop.eup %20718 }
0x2b2a   :  { %v9594_v60 = vadd.f32 0.5, %v9593_v45 }
0x2b2c   :  { %v9595_v61 = vsel %vm21304_vm4, %v20719_v33, %v9594_v60 }
0x2b2d   :  { %9598 = vrot.lane.b32.xlu0 %v9595_v61, %s20938_s3  ;;  %v9596_v14 = vmul.f32 %v9595_v61, %v9088_v15 }
0x2b9f   :  { %v9599_v63 = vpop.permute.xlu0 %9598 }
0x2ba0   :  { %v9601_v8 = vmul.f32 %v9599_v63, %v9595_v61 }
0x2ba2   :  { %9603 = vrot.lane.b32.xlu1 %v9601_v8, %s20939_s16 }
0x2c14   :  { %v9604_v41 = vpop.permute.xlu1 %9603 }
0x2c15   :  { %v9606_v51 = vadd.f32 %v9604_v41, %v9596_v14 }
0x2c17   :  { %20720 = vtanh.f32 %v9606_v51 }
0x2c21   :  { %v20721_v19 = vpop.eup %20720 }
0x2c22   :  { %9609 = vrot.lane.b32.xlu0 %v20721_v19, %s20938_s3 }
0x2c94   :  { %v9610_v46 = vpop.permute.xlu0 %9609 }
0x2c95   :  { %v9612_v6 = vmul.f32 %v9610_v46, %v9595_v61 }
0x2c97   :  { %9614 = vrot.lane.b32.xlu1 %v9612_v6, %s20939_s16 }
0x2d09   :  { %v9615_v59 = vpop.permute.xlu1 %9614 }
0x2d0a   :  { %9618 = vst.msk [vmem:[#allocation4 + $0x30] sm:$0xff] %vm999_vm5, %v9615_v59  ;;  %v9620_v11 = vsel %vm999_vm5, %v9615_v59, 0 }
0x2d0b   :  { %v9691_v9 = vand.u32 4294901760, %v9620_v11 }
0x2d0d   :  { %v9692_v12 = vsub.f32 %v9620_v11, %v9691_v9 }
0x2d0f   :  { %v9693_v13 = vand.u32 4294901760, %v9692_v12 }
0x2d11   :  { %v9694_v2 = vsub.f32 %v9692_v12, %v9693_v13 }
0x2d13   :  { %v9695_v3 = vand.u32 4294901760, %v9694_v2 }
0x2d15   :  { %18331 = vmatmul.mubr.f32.vlgmr.msra.gmra.mrb[26].mxu1 %v9695_v3 }
0x2d16   :  { %19776 = vmatpush3.bf16.msra.mxu1 %v21766_v58  ;;  %18341 = vmatprep.mubr.msk.f32.mxu1 %vm20936_vm1, %v20937_v50 }
0x2d17   :  { %19777 = vmatprep.subr.bf16.mxu1 %v20935_v30 }
0x2d1a   :  { %19779 = vmatpush3.bf16.msra.mxu1 %v21816_v62 }
0x2d1b   :  { %19780 = vmatprep.subr.bf16.mxu1 %v20935_v30 }
0x2d1d   :  { %18342 = vmatmul.mubr.f32.vlgmr.msra.gmra.mrb[26].mxu1 %v9691_v9 }
0x2d1e   :  { %19782 = vmatpush3.bf16.msra.mxu1 %v21836_v55  ;;  %18352 = vmatprep.mubr.msk.f32.mxu1 %vm20936_vm1, %v20937_v50 }
0x2d1f   :  { %19783 = vmatprep.subr.bf16.mxu1 %v20935_v30 }
0x2d22   :  { %19785 = vmatpush3.bf16.msra.mxu1 %v21856_v53 }
0x2d23   :  { %19786 = vmatprep.subr.bf16.mxu1 %v20935_v30 }
0x2d25   :  { %18353 = vmatmul.mubr.f32.vlgmr.msra.gmra.mrb[26].mxu1 %v9692_v12 }
0x2d26   :  { %19788 = vmatpush3.bf16.msra.mxu1 %v21693_v20  ;;  %18363 = vmatprep.mubr.msk.f32.mxu1 %vm20936_vm1, %v20937_v50 }
0x2d27   :  { %19789 = vmatprep.subr.bf16.mxu1 %v20935_v30 }
0x2d2a   :  { %19791 = vmatpush3.bf16.msra.mxu1 %v21695_v24 }
0x2d2b   :  { %19792 = vmatprep.subr.bf16.mxu1 %v20935_v30 }
0x2d2d   :  { %18364 = vmatmul.mubr.f32.vlgmr.msra.gmra.mrb[26].mxu1 %v9693_v13 }
0x2d2e   :  { %19794 = vmatpush3.bf16.msra.mxu1 %v21879_v52  ;;  %18374 = vmatprep.mubr.msk.f32.mxu1 %vm20936_vm1, %v20937_v50 }
0x2d2f   :  { %19795 = vmatprep.subr.bf16.mxu1 %v20935_v30 }
0x2d32   :  { %19797 = vmatpush3.bf16.msra.mxu1 %v21890_v25 }
0x2d33   :  { %19798 = vmatprep.subr.bf16.mxu1 %v20935_v30 }
0x2d35   :  { %18375 = vmatmul.mubr.f32.vlgmr.msra.gmra.mrb[26].mxu1 %v9691_v9 }
0x2d36   :  { %19800 = vmatpush3.bf16.msra.mxu1 %v21693_v20  ;;  %18385 = vmatprep.mubr.msk.f32.mxu1 %vm20936_vm1, %v20937_v50 }
0x2d37   :  { %19801 = vmatprep.subr.bf16.mxu1 %v20935_v30 }
0x2d3a   :  { %19803 = vmatpush3.bf16.msra.mxu1 %v21695_v24 }
0x2d3d   :  { %18386 = vmatmul.mubr.f32.vlgmr.msra.gmra.mrb[26].mxu1 %v9691_v9 }
0x2e10   :  { %v10103_v58 = vpop.f32.mrb[26].mxu1 }
0x2e11   :  { %v10107_v62 = vadd.f32 %v21989_v49, %v10103_v58  ;;  %v18387_v55 = vpop.f32.mrb[27].mxu1 }
0x2e13   :  { %v10109_v53 = vmul.f32 0.5, %v10107_v62 }
0x2e15   :  { %20722 = vtanh.f32 %v10109_v53 }
0x2e16   :  { %20724 = vtanh.f32 %v10107_v62 }
0x2e1f   :  { %v20723_v52 = vpop.eup %20722 }
0x2e20   :  { %v10111_v25 = vmul.f32 0.5, %v20723_v52  ;;  %v20725_v7 = vpop.eup %20724 }
0x2e22   :  { %v10112_v40 = vadd.f32 0.5, %v10111_v25 }
0x2e24   :  { %v10113_v20 = vsel %vm21304_vm4, %v20725_v7, %v10112_v40 }
0x2e25   :  { %10116 = vrot.lane.b32.xlu0 %v10113_v20, %s20938_s3  ;;  %v10114_v24 = vmul.f32 %v10113_v20, %v9606_v51 }
0x2e97   :  { %v10117_v27 = vpop.permute.xlu0 %10116 }
0x2e98   :  { %v10119_v44 = vmul.f32 %v10117_v27, %v10113_v20 }
0x2e9a   :  { %10121 = vrot.lane.b32.xlu1 %v10119_v44, %s20939_s16 }
0x2f0c   :  { %v10122_v48 = vpop.permute.xlu1 %10121 }
0x2f0d   :  { %v10124_v49 = vadd.f32 %v10122_v48, %v10114_v24 }
0x2f0f   :  { %20726 = vtanh.f32 %v10124_v49 }
0x2f19   :  { %v20727_v23 = vpop.eup %20726 }
0x2f1a   :  { %10127 = vrot.lane.b32.xlu0 %v20727_v23, %s20938_s3 }
0x2f8c   :  { %v10128_v28 = vpop.permute.xlu0 %10127 }
0x2f8d   :  { %v10130_v29 = vmul.f32 %v10128_v28, %v10113_v20 }
0x2f8f   :  { %10132 = vrot.lane.b32.xlu1 %v10130_v29, %s20939_s16 }
0x3001   :  { %v10133_v34 = vpop.permute.xlu1 %10132 }
0x3002   :  { %10136 = vst.msk [vmem:[#allocation4 + $0x38] sm:$0xff] %vm999_vm5, %v10133_v34 }
0x3003   :  { %20924 = dma.done.wait [#allocation10 + $0x2], 512 }
0x3004   :  { %20925 = vsyncadd [#allocation10 + $0x2], 4294966784 }
0x3005   :  { %20926 = dma.done.wait [#allocation10 + $0x3], 512 }
0x3006   :  { %20927 = vsyncadd [#allocation10 + $0x3], 4294966784  ;;  %19852 = vmatprep.subr.bf16.mxu1 %v20935_v30  ;;  %18516 = vmatprep.mubr.msk.f32.mxu1 %vm20936_vm1, %v20937_v50  ;;  %v10149_v31 = vld [vmem:[#allocation7] sm:$0xff]  ;;  %v10150_v54 = vld [vmem:[#allocation7 + $0x8] sm:$0xff] }
0x3007   :  { %v22324_v57 = vld [vmem:[#allocation7 + $0x10] sm:$0xff]  ;;  %v10189_v26 = vand.u32 4294901760, %v10149_v31  ;;  %v10192_v16 = vand.u32 4294901760, %v10150_v54  ;;  %v22326_v21 = vld [vmem:[#allocation7 + $0x18] sm:$0xff]  ;;  %v10153_v15 = vld [vmem:[#allocation8] sm:$0xff] }
0x3008   :  { %v10195_v47 = vand.u32 4294901760, %v22324_v57  ;;  %v10154_v32 = vld [vmem:[#allocation8 + $0x8] sm:$0xff]  ;;  %v10198_v18 = vand.u32 4294901760, %v22326_v21  ;;  %v10984_v38 = vand.u32 4294901760, %v10153_v15  ;;  %v10141_v22 = vld [vmem:[#allocation4] sm:$0xff]  ;;  %v22330_v4 = vld [vmem:[#allocation8 + $0x10] sm:$0xff] }
0x3009   :  { %v10987_v0 = vand.u32 4294901760, %v10154_v32  ;;  %v10142_v1 = vld [vmem:[#allocation4 + $0x8] sm:$0xff]  ;;  %v22332_v5 = vpack.c.bf16 %v10192_v16, %v10189_v26  ;;  %v10165_v35 = vsel %vm999_vm5, %v10141_v22, 0  ;;  %v22336_v10 = vsub.f32 %v10149_v31, %v10189_v26  ;;  %v22338_v42 = vld [vmem:[#allocation8 + $0x18] sm:$0xff]  ;;  %v10143_v56 = vld [vmem:[#allocation4 + $0x10] sm:$0xff] }
0x300a   :  { %v10168_v39 = vsel %vm999_vm5, %v10142_v1, 0  ;;  %v10144_v43 = vld [vmem:[#allocation4 + $0x18] sm:$0xff]  ;;  %v22344_v17 = vpack.c.bf16 %v10198_v18, %v10195_v47  ;;  %v22348_v60 = vand.u32 4294901760, %v10165_v35  ;;  %v22354_v63 = vsub.f32 %v10150_v54, %v10192_v16  ;;  %v10145_v58 = vld [vmem:[#allocation4 + $0x20] sm:$0xff]  ;;  %v10146_v49 = vld [vmem:[#allocation4 + $0x28] sm:$0xff] }
0x300b   :  { %v22346_v45 = vpack.c.bf16 %v10987_v0, %v10984_v38  ;;  %v22350_v33 = vand.u32 4294901760, %v10168_v39  ;;  %19805 = vmatprep.subr.bf16.mxu0 %v22332_v5  ;;  %v10340_v61 = vand.u32 4294901760, %v22336_v10  ;;  %v10990_v8 = vand.u32 4294901760, %v22330_v4 }
0x300c   :  { %v10993_v14 = vand.u32 4294901760, %v22338_v42  ;;  %19807 = vmatpush3.bf16.msra.mxu0 %v22332_v5  ;;  %v22361_v41 = vsub.f32 %v10165_v35, %v22348_v60  ;;  %v10171_v19 = vsel %vm999_vm5, %v10143_v56, 0  ;;  %v10174_v46 = vsel %vm999_vm5, %v10144_v43, 0  ;;  %v10147_v56 = vld [vmem:[#allocation4 + $0x30] sm:$0xff] }
0x300d   :  { %19854 = vmatpush3.bf16.msra.mxu1 %v22346_v45  ;;  %v22364_v51 = vsub.f32 %v10168_v39, %v22350_v33  ;;  %19809 = vmatprep.subr.bf16.mxu0 %v22344_v17  ;;  %v10341_v6 = vsub.f32 %v22336_v10, %v10340_v61  ;;  %v10347_v59 = vand.u32 4294901760, %v22354_v63  ;;  %v22378_v9 = vand.u32 4294901760, %v10171_v19 }
0x300e   :  { %19855 = vmatprep.subr.bf16.mxu1 %v20935_v30  ;;  %v22376_v11 = vpack.c.bf16 %v10993_v14, %v10990_v8  ;;  %v10259_v12 = vand.u32 4294901760, %v22361_v41  ;;  %v22382_v2 = vand.u32 4294901760, %v10174_v46  ;;  %v22384_v3 = vsub.f32 %v10153_v15, %v10984_v38 }
0x300f   :  { %v10269_v13 = vand.u32 4294901760, %v22364_v51  ;;  %v10342_v62 = vand.u32 4294901760, %v10341_v6  ;;  %v10348_v55 = vsub.f32 %v22354_v63, %v10347_v59  ;;  %v22390_v53 = vsub.f32 %v10171_v19, %v22378_v9 }
0x3010   :  { %v22392_v52 = vsub.f32 %v10154_v32, %v10987_v0  ;;  %19811 = vmatpush3.bf16.msra.mxu0 %v22344_v17  ;;  %v10260_v25 = vsub.f32 %v22361_v41, %v10259_v12  ;;  %v22403_v7 = vsub.f32 %v10174_v46, %v22382_v2  ;;  %v11065_v20 = vand.u32 4294901760, %v22384_v3 }
0x3011   :  { %v10270_v40 = vsub.f32 %v22364_v51, %v10269_v13  ;;  %19857 = vmatpush3.bf16.msra.mxu1 %v22376_v11  ;;  %v10349_v27 = vand.u32 4294901760, %v10348_v55  ;;  %v10279_v44 = vand.u32 4294901760, %v22390_v53  ;;  %v10177_v48 = vsel %vm999_vm5, %v10145_v58, 0  ;;  %v10148_v55 = vld [vmem:[#allocation4 + $0x38] sm:$0xff] }
0x3012   :  { %19858 = vmatprep.subr.bf16.mxu1 %v20935_v30  ;;  %v11072_v24 = vand.u32 4294901760, %v22392_v52  ;;  %v10261_v23 = vand.u32 4294901760, %v10260_v25  ;;  %v10289_v29 = vand.u32 4294901760, %v22403_v7  ;;  %v11066_v34 = vsub.f32 %v22384_v3, %v11065_v20 }
0x3013   :  { %v10271_v28 = vand.u32 4294901760, %v10270_v40  ;;  %v19812_v31 = vpack.c.bf16 %v10349_v27, %v10342_v62  ;;  %v10280_v54 = vsub.f32 %v22390_v53, %v10279_v44  ;;  %v22421_v16 = vand.u32 4294901760, %v10177_v48 }
0x3014   :  { %18517 = vmatmul.mubr.f32.vlgmr.msra.gmra.mrb[28].mxu1 %v20937_v50  ;;  %v11073_v26 = vsub.f32 %v22392_v52, %v11072_v24  ;;  %18396 = vmatprep.mubr.f32.mxu0 %v10261_v23  ;;  %v10290_v15 = vsub.f32 %v22403_v7, %v10289_v29  ;;  %v11067_v32 = vand.u32 4294901760, %v11066_v34  ;;  %v10180_v38 = vsel %vm999_vm5, %v10146_v49, 0 }
0x3015   :  { %v22430_v0 = vsub.f32 %v22324_v57, %v10195_v47  ;;  %18527 = vmatprep.mubr.msk.f32.mxu1 %vm20936_vm1, %v20937_v50  ;;  %18397 = vmatmul.mubr.f32.vlgmr.msra.gmra.mrb[28].mxu0 %v10271_v28  ;;  %v10281_v22 = vand.u32 4294901760, %v10280_v54  ;;  %v22435_v35 = vsub.f32 %v10177_v48, %v22421_v16  ;;  %v22437_v39 = vand.u32 4294901760, %v10180_v38 }
0x3016   :  { %19813 = vmatprep.subr.bf16.mxu0 %v19812_v31  ;;  %v11074_v1 = vand.u32 4294901760, %v11073_v26  ;;  %v10291_v43 = vand.u32 4294901760, %v10290_v15  ;;  %v22443_v57 = vsub.f32 %v22326_v21, %v10198_v18  ;;  %v22446_v47 = vsub.f32 %v22330_v4, %v10990_v8 }
0x3017   :  { %19815 = vmatpush3.bf16.msra.mxu0 %v19812_v31  ;;  %v10354_v19 = vand.u32 4294901760, %v22430_v0  ;;  %18399 = vmatprep.mubr.f32.mxu0 %v10281_v22  ;;  %v10299_v6 = vand.u32 4294901760, %v22435_v35  ;;  %v22452_v58 = vsub.f32 %v10180_v38, %v22437_v39  ;;  %v22457_v62 = vsub.f32 %v22338_v42, %v10993_v14 }
0x3018   :  { %v22448_v46 = vpack.c.bf16 %v11074_v1, %v11067_v32  ;;  %v10361_v18 = vand.u32 4294901760, %v22443_v57  ;;  %v11079_v4 = vand.u32 4294901760, %v22446_v47  ;;  %v10183_v8 = vsel %vm999_vm5, %v10147_v56, 0 }
0x3019   :  { %v10355_v21 = vsub.f32 %v22430_v0, %v10354_v19  ;;  %18400 = vmatmul.mubr.f32.gmra.mrb[30].mxu0 %v10291_v43  ;;  %v10300_v25 = vsub.f32 %v22435_v35, %v10299_v6  ;;  %v10309_v42 = vand.u32 4294901760, %v22452_v58  ;;  %v11086_v14 = vand.u32 4294901760, %v22457_v62 }
0x301a   :  { %19860 = vmatpush3.bf16.msra.mxu1 %v22448_v46  ;;  %v22471_v40 = vand.u32 4294901760, %v10183_v8  ;;  %v10362_v48 = vsub.f32 %v22443_v57, %v10361_v18  ;;  %v11080_v49 = vsub.f32 %v22446_v47, %v11079_v4  ;;  %v10186_v23 = vsel %vm999_vm5, %v10148_v55, 0 }
0x301b   :  { %19861 = vmatprep.subr.bf16.mxu1 %v20935_v30  ;;  %v10356_v27 = vand.u32 4294901760, %v10355_v21  ;;  %v10301_v28 = vand.u32 4294901760, %v10300_v25  ;;  %v10310_v34 = vsub.f32 %v22452_v58, %v10309_v42  ;;  %v11087_v31 = vsub.f32 %v22457_v62, %v11086_v14 }
0x301c   :  { %v22488_v54 = vsub.f32 %v10183_v8, %v22471_v40  ;;  %v10363_v26 = vand.u32 4294901760, %v10362_v48  ;;  %v11081_v15 = vand.u32 4294901760, %v11080_v49  ;;  %v22490_v32 = vand.u32 4294901760, %v10186_v23 }
0x301d   :  { %18402 = vmatprep.mubr.f32.mxu0 %v10301_v28  ;;  %v10311_v38 = vand.u32 4294901760, %v10310_v34  ;;  %v11088_v22 = vand.u32 4294901760, %v11087_v31  ;;  %v19820_v55 = vpack.c.bf16 %v22354_v63, %v22336_v10  ;;  %v22507_v48 = vpack.c.bf16 %v22392_v52, %v22384_v3 }
0x301e   :  { %v10319_v1 = vand.u32 4294901760, %v22488_v54  ;;  %v19816_v56 = vpack.c.bf16 %v10363_v26, %v10356_v27  ;;  %v22494_v43 = vsub.f32 %v10186_v23, %v22490_v32  ;;  %v22517_v28 = vpack.c.bf16 %v22457_v62, %v22446_v47 }
0x301f   :  { %18403 = vmatmul.mubr.f32.gmra.mrb[32].mxu0 %v10311_v38  ;;  %v22498_v21 = vpack.c.bf16 %v11088_v22, %v11081_v15  ;;  %v19824_v34 = vpack.c.bf16 %v22443_v57, %v22430_v0  ;;  %v22542_v31 = vpack.c.bf16 %v11072_v24, %v11065_v20  ;;  %v22553_v26 = vpack.c.bf16 %v11086_v14, %v11079_v4 }
0x3020   :  { %v10320_v8 = vsub.f32 %v22488_v54, %v10319_v1  ;;  %19817 = vmatprep.subr.bf16.mxu0 %v19816_v56  ;;  %v10329_v25 = vand.u32 4294901760, %v22494_v43  ;;  %v19836_v3 = vpack.c.bf16 %v10347_v59, %v10340_v61  ;;  %v19840_v10 = vpack.c.bf16 %v10361_v18, %v10354_v19 }
0x3021   :  { %19863 = vmatpush3.bf16.msra.mxu1 %v22498_v21  ;;  %19819 = vmatpush3.bf16.msra.mxu0 %v19816_v56 }
0x3022   :  { %v10321_v27 = vand.u32 4294901760, %v10320_v8  ;;  %19864 = vmatprep.subr.bf16.mxu1 %v20935_v30  ;;  %v10330_v49 = vsub.f32 %v22494_v43, %v10329_v25  ;;  %19821 = vmatprep.subr.bf16.mxu0 %v19820_v55 }
0x3024   :  { %18405 = vmatprep.mubr.f32.mxu0 %v10321_v27  ;;  %18528 = vmatmul.mubr.f32.vlgmr.msra.gmra.mrb[28].mxu1 %v20937_v50  ;;  %v10331_v23 = vand.u32 4294901760, %v10330_v49 }
0x3025   :  { %19866 = vmatpush3.bf16.msra.mxu1 %v22507_v48  ;;  %18538 = vmatprep.mubr.msk.f32.mxu1 %vm20936_vm1, %v20937_v50 }
0x3026   :  { %18406 = vmatmul.mubr.f32.gmra.mrb[34].mxu0 %v10331_v23  ;;  %19867 = vmatprep.subr.bf16.mxu1 %v20935_v30 }
0x3027   :  { %18416 = vmatprep.mubr.f32.mxu0 %v22348_v60 }
0x3029   :  { %19869 = vmatpush3.bf16.msra.mxu1 %v22517_v28 }
0x302a   :  { %18417 = vmatmul.mubr.f32.vlgmr.msra.gmra.mrb[28].mxu0 %v22350_v33  ;;  %19870 = vmatprep.subr.bf16.mxu1 %v20935_v30 }
0x302b   :  { %19823 = vmatpush3.bf16.msra.mxu0 %v19820_v55  ;;  %18419 = vmatprep.mubr.f32.mxu0 %v22378_v9 }
0x302c   :  { %18539 = vmatmul.mubr.f32.vlgmr.msra.gmra.mrb[28].mxu1 %v20937_v50  ;;  %19825 = vmatprep.subr.bf16.mxu0 %v19824_v34 }
0x302d   :  { %19872 = vmatpush3.bf16.msra.mxu1 %v22346_v45  ;;  %18549 = vmatprep.mubr.msk.f32.mxu1 %vm20936_vm1, %v20937_v50 }
0x302e   :  { %18420 = vmatmul.mubr.f32.gmra.mrb[30].mxu0 %v22382_v2  ;;  %19873 = vmatprep.subr.bf16.mxu1 %v20935_v30 }
0x302f   :  { %18422 = vmatprep.mubr.f32.mxu0 %v22421_v16  ;;  %19827 = vmatpush3.bf16.msra.mxu0 %v19824_v34 }
0x3030   :  { %19829 = vmatprep.subr.bf16.mxu0 %v22332_v5 }
0x3031   :  { %19875 = vmatpush3.bf16.msra.mxu1 %v22376_v11 }
0x3032   :  { %18423 = vmatmul.mubr.f32.gmra.mrb[32].mxu0 %v22437_v39  ;;  %19876 = vmatprep.subr.bf16.mxu1 %v20935_v30 }
0x3033   :  { %18425 = vmatprep.mubr.f32.mxu0 %v22471_v40 }
0x3034   :  { %18550 = vmatmul.mubr.f32.vlgmr.msra.gmra.mrb[28].mxu1 %v20937_v50 }
0x3035   :  { %19878 = vmatpush3.bf16.msra.mxu1 %v22542_v31  ;;  %18560 = vmatprep.mubr.msk.f32.mxu1 %vm20936_vm1, %v20937_v50 }
0x3036   :  { %18426 = vmatmul.mubr.f32.gmra.mrb[34].mxu0 %v22490_v32  ;;  %19879 = vmatprep.subr.bf16.mxu1 %v20935_v30 }
0x3037   :  { %18436 = vmatprep.mubr.f32.mxu0 %v22361_v41 }
0x3039   :  { %19881 = vmatpush3.bf16.msra.mxu1 %v22553_v26 }
0x303a   :  { %18437 = vmatmul.mubr.f32.vlgmr.msra.gmra.mrb[28].mxu0 %v22364_v51  ;;  %19882 = vmatprep.subr.bf16.mxu1 %v20935_v30 }
0x303b   :  { %19831 = vmatpush3.bf16.msra.mxu0 %v22332_v5  ;;  %18439 = vmatprep.mubr.f32.mxu0 %v22390_v53 }
0x303c   :  { %18561 = vmatmul.mubr.f32.vlgmr.msra.gmra.mrb[28].mxu1 %v20937_v50  ;;  %19833 = vmatprep.subr.bf16.mxu0 %v22344_v17 }
0x303d   :  { %19884 = vmatpush3.bf16.msra.mxu1 %v22346_v45  ;;  %18571 = vmatprep.mubr.msk.f32.mxu1 %vm20936_vm1, %v20937_v50 }
0x303e   :  { %18440 = vmatmul.mubr.f32.gmra.mrb[30].mxu0 %v22403_v7  ;;  %19885 = vmatprep.subr.bf16.mxu1 %v20935_v30 }
0x303f   :  { %18442 = vmatprep.mubr.f32.mxu0 %v22435_v35  ;;  %19835 = vmatpush3.bf16.msra.mxu0 %v22344_v17 }
0x3040   :  { %19837 = vmatprep.subr.bf16.mxu0 %v19836_v3 }
0x3041   :  { %19887 = vmatpush3.bf16.msra.mxu1 %v22376_v11 }
0x3042   :  { %18443 = vmatmul.mubr.f32.gmra.mrb[32].mxu0 %v22452_v58  ;;  %19888 = vmatprep.subr.bf16.mxu1 %v20935_v30 }
0x3043   :  { %18445 = vmatprep.mubr.f32.mxu0 %v22488_v54 }
0x3044   :  { %18572 = vmatmul.mubr.f32.vlgmr.msra.gmra.mrb[28].mxu1 %v20937_v50 }
0x3045   :  { %19890 = vmatpush3.bf16.msra.mxu1 %v22346_v45  ;;  %18582 = vmatprep.mubr.msk.f32.mxu1 %vm20936_vm1, %v20937_v50 }
0x3046   :  { %18446 = vmatmul.mubr.f32.gmra.mrb[34].mxu0 %v22494_v43  ;;  %19891 = vmatprep.subr.bf16.mxu1 %v20935_v30 }
0x3047   :  { %18456 = vmatprep.mubr.f32.mxu0 %v10259_v12 }
0x3049   :  { %19893 = vmatpush3.bf16.msra.mxu1 %v22376_v11 }
0x304a   :  { %18457 = vmatmul.mubr.f32.vlgmr.msra.gmra.mrb[28].mxu0 %v10269_v13  ;;  %19894 = vmatprep.subr.bf16.mxu1 %v20935_v30 }
0x304b   :  { %19839 = vmatpush3.bf16.msra.mxu0 %v19836_v3  ;;  %18459 = vmatprep.mubr.f32.mxu0 %v10279_v44 }
0x304c   :  { %19841 = vmatprep.subr.bf16.mxu0 %v19840_v10 }
0x304e   :  { %18460 = vmatmul.mubr.f32.gmra.mrb[30].mxu0 %v10289_v29 }
0x304f   :  { %18462 = vmatprep.mubr.f32.mxu0 %v10299_v6  ;;  %19843 = vmatpush3.bf16.msra.mxu0 %v19840_v10 }
0x3050   :  { %19845 = vmatprep.subr.bf16.mxu0 %v22332_v5 }
0x3052   :  { %18463 = vmatmul.mubr.f32.gmra.mrb[32].mxu0 %v10309_v42 }
0x3053   :  { %18465 = vmatprep.mubr.f32.mxu0 %v10319_v1 }
0x3056   :  { %18466 = vmatmul.mubr.f32.gmra.mrb[34].mxu0 %v10329_v25 }
0x3057   :  { %18476 = vmatprep.mubr.f32.mxu0 %v22348_v60 }
0x305a   :  { %18477 = vmatmul.mubr.f32.vlgmr.msra.gmra.mrb[28].mxu0 %v22350_v33 }
0x305b   :  { %19847 = vmatpush3.bf16.msra.mxu0 %v22332_v5  ;;  %18479 = vmatprep.mubr.f32.mxu0 %v22378_v9 }
0x305c   :  { %19849 = vmatprep.subr.bf16.mxu0 %v22344_v17 }
0x305e   :  { %18480 = vmatmul.mubr.f32.gmra.mrb[30].mxu0 %v22382_v2 }
0x305f   :  { %18482 = vmatprep.mubr.f32.mxu0 %v22421_v16  ;;  %19851 = vmatpush3.bf16.msra.mxu0 %v22344_v17 }
0x3060   :  { %19924 = vmatprep.subr.bf16.mxu0 %v20935_v30 }
0x3062   :  { %18483 = vmatmul.mubr.f32.gmra.mrb[32].mxu0 %v22437_v39 }
0x3063   :  { %18485 = vmatprep.mubr.f32.mxu0 %v22471_v40 }
0x3066   :  { %18486 = vmatmul.mubr.f32.gmra.mrb[34].mxu0 %v22490_v32 }
0x3067   :  { %18496 = vmatprep.mubr.f32.mxu0 %v22348_v60  ;;  %v16113_v60 = vld [vmem:[%s23213_s9] ss:$0 sm:$0xff] }
0x306a   :  { %18497 = vmatmul.mubr.f32.vlgmr.msra.gmra.mrb[28].mxu0 %v22350_v33 }
0x306b   :  { %18499 = vmatprep.mubr.f32.mxu0 %v22378_v9  ;;  %19926 = vmatpush3.bf16.msra.mxu0 %v22346_v45 }
0x306c   :  { %19927 = vmatprep.subr.bf16.mxu0 %v20935_v30 }
0x306e   :  { %18500 = vmatmul.mubr.f32.gmra.mrb[30].mxu0 %v22382_v2 }
0x306f   :  { %18502 = vmatprep.mubr.f32.mxu0 %v22421_v16  ;;  %19929 = vmatpush3.bf16.msra.mxu0 %v22376_v11 }
0x3070   :  { %19930 = vmatprep.subr.bf16.mxu0 %v20935_v30 }
0x3072   :  { %18503 = vmatmul.mubr.f32.gmra.mrb[32].mxu0 %v22437_v39 }
0x3073   :  { %18505 = vmatprep.mubr.f32.mxu0 %v22471_v40 }
0x3076   :  { %18506 = vmatmul.mubr.f32.gmra.mrb[34].mxu0 %v22490_v32 }
0x3077   :  { %18648 = vmatprep.mubr.msk.f32.mxu0 %vm20936_vm1, %v20937_v50 }
0x3117   :  { %v11464_v5 = vpop.f32.mrb[28].mxu1 }
0x3118   :  { %v18573_v17 = vpop.f32.mrb[29].mxu1 }
0x313d   :  { %v18498_v33 = vpop.f32.mrb[28].mxu0 }
0x313e   :  { %v22640_v61 = vadd.f32 %v18498_v33, %v16113_v60  ;;  %v10928_v63 = vpop.f32.mrb[29].mxu0 }
0x313f   :  { %v20213_v41 = vadd.f32 %v16113_v60, %v10928_v63 }
0x3141   :  { %v11468_v51 = vadd.f32 %v20213_v41, %v11464_v5  ;;  %v18501_v59 = vpop.f32.mrb[30].mxu0 }
0x3142   :  { %v22642_v9 = vadd.f32 %v18501_v59, %v16113_v60  ;;  %v10940_v12 = vpop.f32.mrb[31].mxu0 }
0x3143   :  { %v11470_v13 = vmul.f32 0.5, %v11468_v51  ;;  %v22644_v2 = vadd.f32 %v16113_v60, %v10940_v12 }
0x3145   :  { %20728 = vtanh.f32 %v11470_v13  ;;  %v18504_v53 = vpop.f32.mrb[32].mxu0 }
0x3146   :  { %v22646_v52 = vadd.f32 %v18504_v53, %v16113_v60  ;;  %v10952_v7 = vpop.f32.mrb[33].mxu0  ;;  %20730 = vtanh.f32 %v11468_v51 }
0x3147   :  { %v22648_v20 = vadd.f32 %v16113_v60, %v10952_v7 }
0x3149   :  { %v18507_v44 = vpop.f32.mrb[34].mxu0 }
0x314a   :  { %v22650_v24 = vadd.f32 %v18507_v44, %v16113_v60  ;;  %v10964_v29 = vpop.f32.mrb[35].mxu0 }
0x314b   :  { %v22652_v16 = vadd.f32 %v16113_v60, %v10964_v29 }
0x314f   :  { %v20729_v0 = vpop.eup %20728 }
0x3150   :  { %v11472_v35 = vmul.f32 0.5, %v20729_v0  ;;  %v20731_v19 = vpop.eup %20730 }
0x3152   :  { %v11473_v39 = vadd.f32 0.5, %v11472_v35 }
0x3154   :  { %v11474_v57 = vsel %vm21304_vm4, %v20731_v19, %v11473_v39 }
0x3155   :  { %11477 = vrot.lane.b32.xlu0 %v11474_v57, %s20938_s3  ;;  %v11475_v58 = vmul.f32 0.0, %v11474_v57 }
0x31c7   :  { %v11478_v47 = vpop.permute.xlu0 %11477 }
0x31c8   :  { %v11480_v6 = vmul.f32 %v11478_v47, %v11474_v57 }
0x31ca   :  { %11482 = vrot.lane.b32.xlu0 %v11480_v6, %s20939_s16 }
0x323c   :  { %v11483_v62 = vpop.permute.xlu0 %11482 }
0x323d   :  { %v22658_v18 = vadd.f32 %v11483_v62, %v11475_v58 }
0x323f   :  { %20732 = vtanh.f32 %v22658_v18 }
0x3249   :  { %v20733_v4 = vpop.eup %20732 }
0x324a   :  { %11488 = vrot.lane.b32.xlu1 %v20733_v4, %s20938_s3 }
0x32bc   :  { %v11489_v42 = vpop.permute.xlu1 %11488 }
0x32bd   :  { %v11491_v14 = vmul.f32 %v11489_v42, %v11474_v57 }
0x32bf   :  { %11493 = vrot.lane.b32.xlu1 %v11491_v14, %s20939_s16 }
0x3331   :  { %v11494_v40 = vpop.permute.xlu1 %11493 }
0x3332   :  { %11496 = vst.msk [vmem:[#allocation3] sm:$0xff] %vm999_vm5, %v11494_v40  ;;  %v11498_v54 = vsel %vm999_vm5, %v11494_v40, 0 }
0x3333   :  { %v11569_v15 = vand.u32 4294901760, %v11498_v54 }
0x3335   :  { %v11570_v32 = vsub.f32 %v11498_v54, %v11569_v15 }
0x3337   :  { %v11571_v38 = vand.u32 4294901760, %v11570_v32 }
0x3339   :  { %v11572_v22 = vsub.f32 %v11570_v32, %v11571_v38 }
0x333b   :  { %v11573_v1 = vand.u32 4294901760, %v11572_v22 }
0x333d   :  { %18583 = vmatmul.mubr.f32.vlgmr.msra.gmra.mrb[30].mxu1 %v11573_v1 }
0x333e   :  { %19896 = vmatpush3.bf16.msra.mxu1 %v22448_v46  ;;  %18593 = vmatprep.mubr.msk.f32.mxu1 %vm20936_vm1, %v20937_v50 }
0x333f   :  { %19897 = vmatprep.subr.bf16.mxu1 %v20935_v30 }
0x3342   :  { %19899 = vmatpush3.bf16.msra.mxu1 %v22498_v21 }
0x3343   :  { %19900 = vmatprep.subr.bf16.mxu1 %v20935_v30 }
0x3345   :  { %18594 = vmatmul.mubr.f32.vlgmr.msra.gmra.mrb[30].mxu1 %v11569_v15 }
0x3346   :  { %19902 = vmatpush3.bf16.msra.mxu1 %v22507_v48  ;;  %18604 = vmatprep.mubr.msk.f32.mxu1 %vm20936_vm1, %v20937_v50 }
0x3347   :  { %19903 = vmatprep.subr.bf16.mxu1 %v20935_v30 }
0x334a   :  { %19905 = vmatpush3.bf16.msra.mxu1 %v22517_v28 }
0x334b   :  { %19906 = vmatprep.subr.bf16.mxu1 %v20935_v30 }
0x334d   :  { %18605 = vmatmul.mubr.f32.vlgmr.msra.gmra.mrb[30].mxu1 %v11570_v32 }
0x334e   :  { %19908 = vmatpush3.bf16.msra.mxu1 %v22346_v45  ;;  %18615 = vmatprep.mubr.msk.f32.mxu1 %vm20936_vm1, %v20937_v50 }
0x334f   :  { %19909 = vmatprep.subr.bf16.mxu1 %v20935_v30 }
0x3352   :  { %19911 = vmatpush3.bf16.msra.mxu1 %v22376_v11 }
0x3353   :  { %19912 = vmatprep.subr.bf16.mxu1 %v20935_v30 }
0x3355   :  { %18616 = vmatmul.mubr.f32.vlgmr.msra.gmra.mrb[30].mxu1 %v11571_v38 }
0x3356   :  { %19914 = vmatpush3.bf16.msra.mxu1 %v22542_v31  ;;  %18626 = vmatprep.mubr.msk.f32.mxu1 %vm20936_vm1, %v20937_v50 }
0x3357   :  { %19915 = vmatprep.subr.bf16.mxu1 %v20935_v30 }
0x335a   :  { %19917 = vmatpush3.bf16.msra.mxu1 %v22553_v26 }
0x335b   :  { %19918 = vmatprep.subr.bf16.mxu1 %v20935_v30 }
0x335d   :  { %18627 = vmatmul.mubr.f32.vlgmr.msra.gmra.mrb[30].mxu1 %v11569_v15 }
0x335e   :  { %19920 = vmatpush3.bf16.msra.mxu1 %v22346_v45  ;;  %18637 = vmatprep.mubr.msk.f32.mxu1 %vm20936_vm1, %v20937_v50 }
0x335f   :  { %19921 = vmatprep.subr.bf16.mxu1 %v20935_v30 }
0x3362   :  { %19923 = vmatpush3.bf16.msra.mxu1 %v22376_v11 }
0x3363   :  { %19960 = vmatprep.subr.bf16.mxu1 %v20935_v30 }
0x3365   :  { %18638 = vmatmul.mubr.f32.vlgmr.msra.gmra.mrb[30].mxu1 %v11569_v15 }
0x3366   :  { %19962 = vmatpush3.bf16.msra.mxu1 %v22346_v45  ;;  %18714 = vmatprep.mubr.msk.f32.mxu1 %vm20936_vm1, %v20937_v50 }
0x3367   :  { %19963 = vmatprep.subr.bf16.mxu1 %v20935_v30 }
0x336a   :  { %19965 = vmatpush3.bf16.msra.mxu1 %v22376_v11 }
0x336b   :  { %19966 = vmatprep.subr.bf16.mxu1 %v20935_v30 }
0x3438   :  { %v11981_v56 = vpop.f32.mrb[30].mxu1 }
0x3439   :  { %v11985_v43 = vadd.f32 %v22640_v61, %v11981_v56  ;;  %v18639_v55 = vpop.f32.mrb[31].mxu1 }
0x343b   :  { %v11987_v8 = vmul.f32 0.5, %v11985_v43 }
0x343d   :  { %20734 = vtanh.f32 %v11987_v8 }
0x343e   :  { %20736 = vtanh.f32 %v11985_v43 }
0x3447   :  { %v20735_v25 = vpop.eup %20734 }
0x3448   :  { %v11989_v27 = vmul.f32 0.5, %v20735_v25  ;;  %v20737_v23 = vpop.eup %20736 }
0x344a   :  { %v11990_v49 = vadd.f32 0.5, %v11989_v27 }
0x344c   :  { %v11991_v34 = vsel %vm21304_vm4, %v20737_v23, %v11990_v49 }
0x344d   :  { %11994 = vrot.lane.b32.xlu0 %v11991_v34, %s20938_s3  ;;  %v11992_v5 = vmul.f32 %v11991_v34, %v22658_v18 }
0x34bf   :  { %v11995_v3 = vpop.permute.xlu0 %11994 }
0x34c0   :  { %v11997_v10 = vmul.f32 %v11995_v3, %v11991_v34 }
0x34c2   :  { %11999 = vrot.lane.b32.xlu1 %v11997_v10, %s20939_s16 }
0x3534   :  { %v12000_v17 = vpop.permute.xlu1 %11999 }
0x3535   :  { %v22707_v60 = vadd.f32 %v12000_v17, %v11992_v5 }
0x3537   :  { %20738 = vtanh.f32 %v22707_v60 }
0x3541   :  { %v20739_v33 = vpop.eup %20738 }
0x3542   :  { %12005 = vrot.lane.b32.xlu0 %v20739_v33, %s20938_s3 }
0x35b4   :  { %v12006_v61 = vpop.permute.xlu0 %12005 }
0x35b5   :  { %v12008_v63 = vmul.f32 %v12006_v61, %v11991_v34 }
0x35b7   :  { %12010 = vrot.lane.b32.xlu1 %v12008_v63, %s20939_s16 }
0x3629   :  { %v12011_v41 = vpop.permute.xlu1 %12010 }
0x362a   :  { %12013 = vst.msk [vmem:[#allocation3 + $0x8] sm:$0xff] %vm999_vm5, %v12011_v41  ;;  %v12015_v51 = vsel %vm999_vm5, %v12011_v41, 0 }
0x362b   :  { %v12086_v59 = vand.u32 4294901760, %v12015_v51 }
0x362d   :  { %v12087_v12 = vsub.f32 %v12015_v51, %v12086_v59 }
0x362f   :  { %v12088_v13 = vand.u32 4294901760, %v12087_v12 }
0x3631   :  { %v12089_v53 = vsub.f32 %v12087_v12, %v12088_v13 }
0x3633   :  { %v12090_v7 = vand.u32 4294901760, %v12089_v53 }
0x3635   :  { %18649 = vmatmul.mubr.f32.vlgmr.msra.gmra.mrb[36].mxu0 %v12090_v7 }
0x3636   :  { %19932 = vmatpush3.bf16.msra.mxu0 %v22448_v46  ;;  %18659 = vmatprep.mubr.msk.f32.mxu0 %vm20936_vm1, %v20937_v50 }
0x3637   :  { %19933 = vmatprep.subr.bf16.mxu0 %v20935_v30 }
0x363a   :  { %19935 = vmatpush3.bf16.msra.mxu0 %v22498_v21 }
0x363b   :  { %19936 = vmatprep.subr.bf16.mxu0 %v20935_v30 }
0x363d   :  { %18660 = vmatmul.mubr.f32.vlgmr.msra.gmra.mrb[36].mxu0 %v12086_v59 }
0x363e   :  { %19938 = vmatpush3.bf16.msra.mxu0 %v22507_v48  ;;  %18670 = vmatprep.mubr.msk.f32.mxu0 %vm20936_vm1, %v20937_v50 }
0x363f   :  { %19939 = vmatprep.subr.bf16.mxu0 %v20935_v30 }
0x3642   :  { %19941 = vmatpush3.bf16.msra.mxu0 %v22517_v28 }
0x3643   :  { %19942 = vmatprep.subr.bf16.mxu0 %v20935_v30 }
0x3645   :  { %18671 = vmatmul.mubr.f32.vlgmr.msra.gmra.mrb[36].mxu0 %v12087_v12 }
0x3646   :  { %19944 = vmatpush3.bf16.msra.mxu0 %v22346_v45  ;;  %18681 = vmatprep.mubr.msk.f32.mxu0 %vm20936_vm1, %v20937_v50 }
0x3647   :  { %19945 = vmatprep.subr.bf16.mxu0 %v20935_v30 }
0x364a   :  { %19947 = vmatpush3.bf16.msra.mxu0 %v22376_v11 }
0x364b   :  { %19948 = vmatprep.subr.bf16.mxu0 %v20935_v30 }
0x364d   :  { %18682 = vmatmul.mubr.f32.vlgmr.msra.gmra.mrb[36].mxu0 %v12088_v13 }
0x364e   :  { %19950 = vmatpush3.bf16.msra.mxu0 %v22542_v31  ;;  %18692 = vmatprep.mubr.msk.f32.mxu0 %vm20936_vm1, %v20937_v50 }
0x364f   :  { %19951 = vmatprep.subr.bf16.mxu0 %v20935_v30 }
0x3652   :  { %19953 = vmatpush3.bf16.msra.mxu0 %v22553_v26 }
0x3653   :  { %19954 = vmatprep.subr.bf16.mxu0 %v20935_v30 }
0x3655   :  { %18693 = vmatmul.mubr.f32.vlgmr.msra.gmra.mrb[36].mxu0 %v12086_v59 }
0x3656   :  { %19956 = vmatpush3.bf16.msra.mxu0 %v22346_v45  ;;  %18703 = vmatprep.mubr.msk.f32.mxu0 %vm20936_vm1, %v20937_v50 }
0x3657   :  { %19957 = vmatprep.subr.bf16.mxu0 %v20935_v30 }
0x365a   :  { %19959 = vmatpush3.bf16.msra.mxu0 %v22376_v11 }
0x365b   :  { %19996 = vmatprep.subr.bf16.mxu0 %v20935_v30 }
0x365d   :  { %18704 = vmatmul.mubr.f32.vlgmr.msra.gmra.mrb[36].mxu0 %v12086_v59 }
0x365e   :  { %19998 = vmatpush3.bf16.msra.mxu0 %v22346_v45  ;;  %18780 = vmatprep.mubr.msk.f32.mxu0 %vm20936_vm1, %v20937_v50 }
0x365f   :  { %19999 = vmatprep.subr.bf16.mxu0 %v20935_v30 }
0x3662   :  { %20001 = vmatpush3.bf16.msra.mxu0 %v22376_v11 }
0x3663   :  { %20002 = vmatprep.subr.bf16.mxu0 %v20935_v30 }
0x3730   :  { %v12498_v44 = vpop.f32.mrb[36].mxu0 }
0x3731   :  { %v12502_v29 = vadd.f32 %v22644_v2, %v12498_v44  ;;  %v18705_v0 = vpop.f32.mrb[37].mxu0 }
0x3733   :  { %v12504_v35 = vmul.f32 0.5, %v12502_v29 }
0x3735   :  { %20740 = vtanh.f32 %v12504_v35 }
0x3736   :  { %20742 = vtanh.f32 %v12502_v29 }
0x373f   :  { %v20741_v39 = vpop.eup %20740 }
0x3740   :  { %v12506_v19 = vmul.f32 0.5, %v20741_v39  ;;  %v20743_v47 = vpop.eup %20742 }
0x3742   :  { %v12507_v57 = vadd.f32 0.5, %v12506_v19 }
0x3744   :  { %v12508_v6 = vsel %vm21304_vm4, %v20743_v47, %v12507_v57 }
0x3745   :  { %12511 = vrot.lane.b32.xlu0 %v12508_v6, %s20938_s3  ;;  %v12509_v18 = vmul.f32 %v12508_v6, %v22707_v60 }
0x37b7   :  { %v12512_v58 = vpop.permute.xlu0 %12511 }
0x37b8   :  { %v12514_v62 = vmul.f32 %v12512_v58, %v12508_v6 }
0x37ba   :  { %12516 = vrot.lane.b32.xlu1 %v12514_v62, %s20939_s16 }
0x382c   :  { %v12517_v2 = vpop.permute.xlu1 %12516 }
0x382d   :  { %v22756_v4 = vadd.f32 %v12517_v2, %v12509_v18 }
0x382f   :  { %20744 = vtanh.f32 %v22756_v4 }
0x3839   :  { %v20745_v42 = vpop.eup %20744 }
0x383a   :  { %12522 = vrot.lane.b32.xlu0 %v20745_v42, %s20938_s3 }
0x38ac   :  { %v12523_v14 = vpop.permute.xlu0 %12522 }
0x38ad   :  { %v12525_v40 = vmul.f32 %v12523_v14, %v12508_v6 }
0x38af   :  { %12527 = vrot.lane.b32.xlu1 %v12525_v40, %s20939_s16 }
0x3921   :  { %v12528_v54 = vpop.permute.xlu1 %12527 }
0x3922   :  { %12530 = vst.msk [vmem:[#allocation3 + $0x10] sm:$0xff] %vm999_vm5, %v12528_v54  ;;  %v12532_v15 = vsel %vm999_vm5, %v12528_v54, 0 }
0x3923   :  { %v12603_v32 = vand.u32 4294901760, %v12532_v15 }
0x3925   :  { %v12604_v38 = vsub.f32 %v12532_v15, %v12603_v32 }
0x3927   :  { %v12605_v22 = vand.u32 4294901760, %v12604_v38 }
0x3929   :  { %v12606_v1 = vsub.f32 %v12604_v38, %v12605_v22 }
0x392b   :  { %v12607_v56 = vand.u32 4294901760, %v12606_v1 }
0x392d   :  { %18715 = vmatmul.mubr.f32.vlgmr.msra.gmra.mrb[32].mxu1 %v12607_v56 }
0x392e   :  { %19968 = vmatpush3.bf16.msra.mxu1 %v22448_v46  ;;  %18725 = vmatprep.mubr.msk.f32.mxu1 %vm20936_vm1, %v20937_v50 }
0x392f   :  { %19969 = vmatprep.subr.bf16.mxu1 %v20935_v30 }
0x3932   :  { %19971 = vmatpush3.bf16.msra.mxu1 %v22498_v21 }
0x3933   :  { %19972 = vmatprep.subr.bf16.mxu1 %v20935_v30 }
0x3935   :  { %18726 = vmatmul.mubr.f32.vlgmr.msra.gmra.mrb[32].mxu1 %v12603_v32 }
0x3936   :  { %19974 = vmatpush3.bf16.msra.mxu1 %v22507_v48  ;;  %18736 = vmatprep.mubr.msk.f32.mxu1 %vm20936_vm1, %v20937_v50 }
0x3937   :  { %19975 = vmatprep.subr.bf16.mxu1 %v20935_v30 }
0x393a   :  { %19977 = vmatpush3.bf16.msra.mxu1 %v22517_v28 }
0x393b   :  { %19978 = vmatprep.subr.bf16.mxu1 %v20935_v30 }
0x393d   :  { %18737 = vmatmul.mubr.f32.vlgmr.msra.gmra.mrb[32].mxu1 %v12604_v38 }
0x393e   :  { %19980 = vmatpush3.bf16.msra.mxu1 %v22346_v45  ;;  %18747 = vmatprep.mubr.msk.f32.mxu1 %vm20936_vm1, %v20937_v50 }
0x393f   :  { %19981 = vmatprep.subr.bf16.mxu1 %v20935_v30 }
0x3942   :  { %19983 = vmatpush3.bf16.msra.mxu1 %v22376_v11 }
0x3943   :  { %19984 = vmatprep.subr.bf16.mxu1 %v20935_v30 }
0x3945   :  { %18748 = vmatmul.mubr.f32.vlgmr.msra.gmra.mrb[32].mxu1 %v12605_v22 }
0x3946   :  { %19986 = vmatpush3.bf16.msra.mxu1 %v22542_v31  ;;  %18758 = vmatprep.mubr.msk.f32.mxu1 %vm20936_vm1, %v20937_v50 }
0x3947   :  { %19987 = vmatprep.subr.bf16.mxu1 %v20935_v30 }
0x394a   :  { %19989 = vmatpush3.bf16.msra.mxu1 %v22553_v26 }
0x394b   :  { %19990 = vmatprep.subr.bf16.mxu1 %v20935_v30 }
0x394d   :  { %18759 = vmatmul.mubr.f32.vlgmr.msra.gmra.mrb[32].mxu1 %v12603_v32 }
0x394e   :  { %19992 = vmatpush3.bf16.msra.mxu1 %v22346_v45  ;;  %18769 = vmatprep.mubr.msk.f32.mxu1 %vm20936_vm1, %v20937_v50 }
0x394f   :  { %19993 = vmatprep.subr.bf16.mxu1 %v20935_v30 }
0x3952   :  { %19995 = vmatpush3.bf16.msra.mxu1 %v22376_v11 }
0x3953   :  { %20032 = vmatprep.subr.bf16.mxu1 %v20935_v30 }
0x3955   :  { %18770 = vmatmul.mubr.f32.vlgmr.msra.gmra.mrb[32].mxu1 %v12603_v32 }
0x3956   :  { %20034 = vmatpush3.bf16.msra.mxu1 %v22346_v45  ;;  %18846 = vmatprep.mubr.msk.f32.mxu1 %vm20936_vm1, %v20937_v50 }
0x3957   :  { %20035 = vmatprep.subr.bf16.mxu1 %v20935_v30 }
0x395a   :  { %20037 = vmatpush3.bf16.msra.mxu1 %v22376_v11 }
0x395b   :  { %20038 = vmatprep.subr.bf16.mxu1 %v20935_v30 }
0x3a28   :  { %v13015_v43 = vpop.f32.mrb[32].mxu1 }
0x3a29   :  { %v13019_v55 = vadd.f32 %v22642_v9, %v13015_v43  ;;  %v18771_v8 = vpop.f32.mrb[33].mxu1 }
0x3a2b   :  { %v13021_v25 = vmul.f32 0.5, %v13019_v55 }
0x3a2d   :  { %20746 = vtanh.f32 %v13021_v25 }
0x3a2e   :  { %20748 = vtanh.f32 %v13019_v55 }
0x3a37   :  { %v20747_v27 = vpop.eup %20746 }
0x3a38   :  { %v13023_v49 = vmul.f32 0.5, %v20747_v27  ;;  %v20749_v34 = vpop.eup %20748 }
0x3a3a   :  { %v13024_v23 = vadd.f32 0.5, %v13023_v49 }
0x3a3c   :  { %v13025_v3 = vsel %vm21304_vm4, %v20749_v34, %v13024_v23 }
0x3a3d   :  { %13028 = vrot.lane.b32.xlu0 %v13025_v3, %s20938_s3  ;;  %v13026_v17 = vmul.f32 %v13025_v3, %v22756_v4 }
0x3aaf   :  { %v13029_v10 = vpop.permute.xlu0 %13028 }
0x3ab0   :  { %v13031_v5 = vmul.f32 %v13029_v10, %v13025_v3 }
0x3ab2   :  { %13033 = vrot.lane.b32.xlu1 %v13031_v5, %s20939_s16 }
0x3b24   :  { %v13034_v9 = vpop.permute.xlu1 %13033 }
0x3b25   :  { %v22805_v60 = vadd.f32 %v13034_v9, %v13026_v17 }
0x3b27   :  { %20750 = vtanh.f32 %v22805_v60 }
0x3b31   :  { %v20751_v33 = vpop.eup %20750 }
0x3b32   :  { %13039 = vrot.lane.b32.xlu0 %v20751_v33, %s20938_s3 }
0x3ba4   :  { %v13040_v61 = vpop.permute.xlu0 %13039 }
0x3ba5   :  { %v13042_v63 = vmul.f32 %v13040_v61, %v13025_v3 }
0x3ba7   :  { %13044 = vrot.lane.b32.xlu1 %v13042_v63, %s20939_s16 }
0x3c19   :  { %v13045_v41 = vpop.permute.xlu1 %13044 }
0x3c1a   :  { %13047 = vst.msk [vmem:[#allocation3 + $0x18] sm:$0xff] %vm999_vm5, %v13045_v41  ;;  %v13049_v51 = vsel %vm999_vm5, %v13045_v41, 0 }
0x3c1b   :  { %v13120_v59 = vand.u32 4294901760, %v13049_v51 }
0x3c1d   :  { %v13121_v12 = vsub.f32 %v13049_v51, %v13120_v59 }
0x3c1f   :  { %v13122_v13 = vand.u32 4294901760, %v13121_v12 }
0x3c21   :  { %v13123_v53 = vsub.f32 %v13121_v12, %v13122_v13 }
0x3c23   :  { %v13124_v7 = vand.u32 4294901760, %v13123_v53 }
0x3c25   :  { %18781 = vmatmul.mubr.f32.vlgmr.msra.gmra.mrb[38].mxu0 %v13124_v7 }
0x3c26   :  { %20004 = vmatpush3.bf16.msra.mxu0 %v22448_v46  ;;  %18791 = vmatprep.mubr.msk.f32.mxu0 %vm20936_vm1, %v20937_v50 }
0x3c27   :  { %20005 = vmatprep.subr.bf16.mxu0 %v20935_v30 }
0x3c2a   :  { %20007 = vmatpush3.bf16.msra.mxu0 %v22498_v21 }
0x3c2b   :  { %20008 = vmatprep.subr.bf16.mxu0 %v20935_v30 }
0x3c2d   :  { %18792 = vmatmul.mubr.f32.vlgmr.msra.gmra.mrb[38].mxu0 %v13120_v59 }
0x3c2e   :  { %20010 = vmatpush3.bf16.msra.mxu0 %v22507_v48  ;;  %18802 = vmatprep.mubr.msk.f32.mxu0 %vm20936_vm1, %v20937_v50 }
0x3c2f   :  { %20011 = vmatprep.subr.bf16.mxu0 %v20935_v30 }
0x3c32   :  { %20013 = vmatpush3.bf16.msra.mxu0 %v22517_v28 }
0x3c33   :  { %20014 = vmatprep.subr.bf16.mxu0 %v20935_v30 }
0x3c35   :  { %18803 = vmatmul.mubr.f32.vlgmr.msra.gmra.mrb[38].mxu0 %v13121_v12 }
0x3c36   :  { %20016 = vmatpush3.bf16.msra.mxu0 %v22346_v45  ;;  %18813 = vmatprep.mubr.msk.f32.mxu0 %vm20936_vm1, %v20937_v50 }
0x3c37   :  { %20017 = vmatprep.subr.bf16.mxu0 %v20935_v30 }
0x3c3a   :  { %20019 = vmatpush3.bf16.msra.mxu0 %v22376_v11 }
0x3c3b   :  { %20020 = vmatprep.subr.bf16.mxu0 %v20935_v30 }
0x3c3d   :  { %18814 = vmatmul.mubr.f32.vlgmr.msra.gmra.mrb[38].mxu0 %v13122_v13 }
0x3c3e   :  { %20022 = vmatpush3.bf16.msra.mxu0 %v22542_v31  ;;  %18824 = vmatprep.mubr.msk.f32.mxu0 %vm20936_vm1, %v20937_v50 }
0x3c3f   :  { %20023 = vmatprep.subr.bf16.mxu0 %v20935_v30 }
0x3c42   :  { %20025 = vmatpush3.bf16.msra.mxu0 %v22553_v26 }
0x3c43   :  { %20026 = vmatprep.subr.bf16.mxu0 %v20935_v30 }
0x3c45   :  { %18825 = vmatmul.mubr.f32.vlgmr.msra.gmra.mrb[38].mxu0 %v13120_v59 }
0x3c46   :  { %20028 = vmatpush3.bf16.msra.mxu0 %v22346_v45  ;;  %18835 = vmatprep.mubr.msk.f32.mxu0 %vm20936_vm1, %v20937_v50 }
0x3c47   :  { %20029 = vmatprep.subr.bf16.mxu0 %v20935_v30 }
0x3c4a   :  { %20031 = vmatpush3.bf16.msra.mxu0 %v22376_v11 }
0x3c4b   :  { %20068 = vmatprep.subr.bf16.mxu0 %v20935_v30 }
0x3c4d   :  { %18836 = vmatmul.mubr.f32.vlgmr.msra.gmra.mrb[38].mxu0 %v13120_v59 }
0x3c4e   :  { %20070 = vmatpush3.bf16.msra.mxu0 %v22346_v45  ;;  %18912 = vmatprep.mubr.msk.f32.mxu0 %vm20936_vm1, %v20937_v50 }
0x3c4f   :  { %20071 = vmatprep.subr.bf16.mxu0 %v20935_v30 }
0x3c52   :  { %20073 = vmatpush3.bf16.msra.mxu0 %v22376_v11 }
0x3c53   :  { %20074 = vmatprep.subr.bf16.mxu0 %v20935_v30 }
0x3d20   :  { %v13532_v44 = vpop.f32.mrb[38].mxu0 }
0x3d21   :  { %v13536_v29 = vadd.f32 %v22648_v20, %v13532_v44  ;;  %v18837_v0 = vpop.f32.mrb[39].mxu0 }
0x3d23   :  { %v13538_v35 = vmul.f32 0.5, %v13536_v29 }
0x3d25   :  { %20752 = vtanh.f32 %v13538_v35 }
0x3d26   :  { %20754 = vtanh.f32 %v13536_v29 }
0x3d2f   :  { %v20753_v39 = vpop.eup %20752 }
0x3d30   :  { %v13540_v19 = vmul.f32 0.5, %v20753_v39  ;;  %v20755_v47 = vpop.eup %20754 }
0x3d32   :  { %v13541_v57 = vadd.f32 0.5, %v13540_v19 }
0x3d34   :  { %v13542_v6 = vsel %vm21304_vm4, %v20755_v47, %v13541_v57 }
0x3d35   :  { %13545 = vrot.lane.b32.xlu0 %v13542_v6, %s20938_s3  ;;  %v13543_v18 = vmul.f32 %v13542_v6, %v22805_v60 }
0x3da7   :  { %v13546_v58 = vpop.permute.xlu0 %13545 }
0x3da8   :  { %v13548_v62 = vmul.f32 %v13546_v58, %v13542_v6 }
0x3daa   :  { %13550 = vrot.lane.b32.xlu1 %v13548_v62, %s20939_s16 }
0x3e1c   :  { %v13551_v20 = vpop.permute.xlu1 %13550 }
0x3e1d   :  { %v22854_v2 = vadd.f32 %v13551_v20, %v13543_v18 }
0x3e1f   :  { %20756 = vtanh.f32 %v22854_v2 }
0x3e29   :  { %v20757_v4 = vpop.eup %20756 }
0x3e2a   :  { %13556 = vrot.lane.b32.xlu0 %v20757_v4, %s20938_s3 }
0x3e9c   :  { %v13557_v42 = vpop.permute.xlu0 %13556 }
0x3e9d   :  { %v13559_v14 = vmul.f32 %v13557_v42, %v13542_v6 }
0x3e9f   :  { %13561 = vrot.lane.b32.xlu1 %v13559_v14, %s20939_s16 }
0x3f11   :  { %v13562_v40 = vpop.permute.xlu1 %13561 }
0x3f12   :  { %13564 = vst.msk [vmem:[#allocation3 + $0x20] sm:$0xff] %vm999_vm5, %v13562_v40  ;;  %v13566_v54 = vsel %vm999_vm5, %v13562_v40, 0 }
0x3f13   :  { %v13637_v15 = vand.u32 4294901760, %v13566_v54 }
0x3f15   :  { %v13638_v32 = vsub.f32 %v13566_v54, %v13637_v15 }
0x3f17   :  { %v13639_v38 = vand.u32 4294901760, %v13638_v32 }
0x3f19   :  { %v13640_v22 = vsub.f32 %v13638_v32, %v13639_v38 }
0x3f1b   :  { %v13641_v1 = vand.u32 4294901760, %v13640_v22 }
0x3f1d   :  { %18847 = vmatmul.mubr.f32.vlgmr.msra.gmra.mrb[34].mxu1 %v13641_v1 }
0x3f1e   :  { %20040 = vmatpush3.bf16.msra.mxu1 %v22448_v46  ;;  %18857 = vmatprep.mubr.msk.f32.mxu1 %vm20936_vm1, %v20937_v50 }
0x3f1f   :  { %20041 = vmatprep.subr.bf16.mxu1 %v20935_v30 }
0x3f22   :  { %20043 = vmatpush3.bf16.msra.mxu1 %v22498_v21 }
0x3f23   :  { %20044 = vmatprep.subr.bf16.mxu1 %v20935_v30 }
0x3f25   :  { %18858 = vmatmul.mubr.f32.vlgmr.msra.gmra.mrb[34].mxu1 %v13637_v15 }
0x3f26   :  { %20046 = vmatpush3.bf16.msra.mxu1 %v22507_v48  ;;  %18868 = vmatprep.mubr.msk.f32.mxu1 %vm20936_vm1, %v20937_v50 }
0x3f27   :  { %20047 = vmatprep.subr.bf16.mxu1 %v20935_v30 }
0x3f2a   :  { %20049 = vmatpush3.bf16.msra.mxu1 %v22517_v28 }
0x3f2b   :  { %20050 = vmatprep.subr.bf16.mxu1 %v20935_v30 }
0x3f2d   :  { %18869 = vmatmul.mubr.f32.vlgmr.msra.gmra.mrb[34].mxu1 %v13638_v32 }
0x3f2e   :  { %20052 = vmatpush3.bf16.msra.mxu1 %v22346_v45  ;;  %18879 = vmatprep.mubr.msk.f32.mxu1 %vm20936_vm1, %v20937_v50 }
0x3f2f   :  { %20053 = vmatprep.subr.bf16.mxu1 %v20935_v30 }
0x3f32   :  { %20055 = vmatpush3.bf16.msra.mxu1 %v22376_v11 }
0x3f33   :  { %20056 = vmatprep.subr.bf16.mxu1 %v20935_v30 }
0x3f35   :  { %18880 = vmatmul.mubr.f32.vlgmr.msra.gmra.mrb[34].mxu1 %v13639_v38 }
0x3f36   :  { %20058 = vmatpush3.bf16.msra.mxu1 %v22542_v31  ;;  %18890 = vmatprep.mubr.msk.f32.mxu1 %vm20936_vm1, %v20937_v50 }
0x3f37   :  { %20059 = vmatprep.subr.bf16.mxu1 %v20935_v30 }
0x3f3a   :  { %20061 = vmatpush3.bf16.msra.mxu1 %v22553_v26 }
0x3f3b   :  { %20062 = vmatprep.subr.bf16.mxu1 %v20935_v30 }
0x3f3d   :  { %18891 = vmatmul.mubr.f32.vlgmr.msra.gmra.mrb[34].mxu1 %v13637_v15 }
0x3f3e   :  { %20064 = vmatpush3.bf16.msra.mxu1 %v22346_v45  ;;  %18901 = vmatprep.mubr.msk.f32.mxu1 %vm20936_vm1, %v20937_v50 }
0x3f3f   :  { %20065 = vmatprep.subr.bf16.mxu1 %v20935_v30 }
0x3f42   :  { %20067 = vmatpush3.bf16.msra.mxu1 %v22376_v11 }
0x3f43   :  { %20104 = vmatprep.subr.bf16.mxu1 %v20935_v30 }
0x3f45   :  { %18902 = vmatmul.mubr.f32.vlgmr.msra.gmra.mrb[34].mxu1 %v13637_v15 }
0x3f46   :  { %20106 = vmatpush3.bf16.msra.mxu1 %v22346_v45  ;;  %18978 = vmatprep.mubr.msk.f32.mxu1 %vm20936_vm1, %v20937_v50 }
0x3f47   :  { %20107 = vmatprep.subr.bf16.mxu1 %v20935_v30 }
0x3f4a   :  { %20109 = vmatpush3.bf16.msra.mxu1 %v22376_v11 }
0x3f4b   :  { %20110 = vmatprep.subr.bf16.mxu1 %v20935_v30 }
0x4018   :  { %v14049_v56 = vpop.f32.mrb[34].mxu1 }
0x4019   :  { %v14053_v43 = vadd.f32 %v22646_v52, %v14049_v56  ;;  %v18903_v55 = vpop.f32.mrb[35].mxu1 }
0x401b   :  { %v14055_v8 = vmul.f32 0.5, %v14053_v43 }
0x401d   :  { %20758 = vtanh.f32 %v14055_v8 }
0x401e   :  { %20760 = vtanh.f32 %v14053_v43 }
0x4027   :  { %v20759_v25 = vpop.eup %20758 }
0x4028   :  { %v14057_v27 = vmul.f32 0.5, %v20759_v25  ;;  %v20761_v23 = vpop.eup %20760 }
0x402a   :  { %v14058_v49 = vadd.f32 0.5, %v14057_v27 }
0x402c   :  { %v14059_v34 = vsel %vm21304_vm4, %v20761_v23, %v14058_v49 }
0x402d   :  { %14062 = vrot.lane.b32.xlu0 %v14059_v34, %s20938_s3  ;;  %v14060_v5 = vmul.f32 %v14059_v34, %v22854_v2 }
0x409f   :  { %v14063_v3 = vpop.permute.xlu0 %14062 }
0x40a0   :  { %v14065_v10 = vmul.f32 %v14063_v3, %v14059_v34 }
0x40a2   :  { %14067 = vrot.lane.b32.xlu1 %v14065_v10, %s20939_s16 }
0x4114   :  { %v14068_v52 = vpop.permute.xlu1 %14067 }
0x4115   :  { %v14070_v17 = vadd.f32 %v14068_v52, %v14060_v5 }
0x4117   :  { %20762 = vtanh.f32 %v14070_v17 }
0x4121   :  { %v20763_v9 = vpop.eup %20762 }
0x4122   :  { %14073 = vrot.lane.b32.xlu0 %v20763_v9, %s20938_s3 }
0x4194   :  { %v14074_v60 = vpop.permute.xlu0 %14073 }
0x4195   :  { %v14076_v33 = vmul.f32 %v14074_v60, %v14059_v34 }
0x4197   :  { %14078 = vrot.lane.b32.xlu1 %v14076_v33, %s20939_s16 }
0x4209   :  { %v14079_v61 = vpop.permute.xlu1 %14078 }
0x420a   :  { %14081 = vst.msk [vmem:[#allocation3 + $0x28] sm:$0xff] %vm999_vm5, %v14079_v61  ;;  %v14083_v63 = vsel %vm999_vm5, %v14079_v61, 0 }
0x420b   :  { %v14154_v41 = vand.u32 4294901760, %v14083_v63 }
0x420d   :  { %v14155_v51 = vsub.f32 %v14083_v63, %v14154_v41 }
0x420f   :  { %v14156_v59 = vand.u32 4294901760, %v14155_v51 }
0x4211   :  { %v14157_v12 = vsub.f32 %v14155_v51, %v14156_v59 }
0x4213   :  { %v14158_v13 = vand.u32 4294901760, %v14157_v12 }
0x4215   :  { %18913 = vmatmul.mubr.f32.vlgmr.msra.gmra.mrb[40].mxu0 %v14158_v13 }
0x4216   :  { %20076 = vmatpush3.bf16.msra.mxu0 %v22448_v46  ;;  %18923 = vmatprep.mubr.msk.f32.mxu0 %vm20936_vm1, %v20937_v50 }
0x4217   :  { %20077 = vmatprep.subr.bf16.mxu0 %v20935_v30 }
0x421a   :  { %20079 = vmatpush3.bf16.msra.mxu0 %v22498_v21 }
0x421b   :  { %20080 = vmatprep.subr.bf16.mxu0 %v20935_v30 }
0x421d   :  { %18924 = vmatmul.mubr.f32.vlgmr.msra.gmra.mrb[40].mxu0 %v14154_v41 }
0x421e   :  { %20082 = vmatpush3.bf16.msra.mxu0 %v22507_v48  ;;  %18934 = vmatprep.mubr.msk.f32.mxu0 %vm20936_vm1, %v20937_v50 }
0x421f   :  { %20083 = vmatprep.subr.bf16.mxu0 %v20935_v30 }
0x4222   :  { %20085 = vmatpush3.bf16.msra.mxu0 %v22517_v28 }
0x4223   :  { %20086 = vmatprep.subr.bf16.mxu0 %v20935_v30 }
0x4225   :  { %18935 = vmatmul.mubr.f32.vlgmr.msra.gmra.mrb[40].mxu0 %v14155_v51 }
0x4226   :  { %20088 = vmatpush3.bf16.msra.mxu0 %v22346_v45  ;;  %18945 = vmatprep.mubr.msk.f32.mxu0 %vm20936_vm1, %v20937_v50 }
0x4227   :  { %20089 = vmatprep.subr.bf16.mxu0 %v20935_v30 }
0x422a   :  { %20091 = vmatpush3.bf16.msra.mxu0 %v22376_v11 }
0x422b   :  { %20092 = vmatprep.subr.bf16.mxu0 %v20935_v30 }
0x422d   :  { %18946 = vmatmul.mubr.f32.vlgmr.msra.gmra.mrb[40].mxu0 %v14156_v59 }
0x422e   :  { %20094 = vmatpush3.bf16.msra.mxu0 %v22542_v31  ;;  %18956 = vmatprep.mubr.msk.f32.mxu0 %vm20936_vm1, %v20937_v50 }
0x422f   :  { %20095 = vmatprep.subr.bf16.mxu0 %v20935_v30 }
0x4232   :  { %20097 = vmatpush3.bf16.msra.mxu0 %v22553_v26 }
0x4233   :  { %20098 = vmatprep.subr.bf16.mxu0 %v20935_v30 }
0x4235   :  { %18957 = vmatmul.mubr.f32.vlgmr.msra.gmra.mrb[40].mxu0 %v14154_v41 }
0x4236   :  { %20100 = vmatpush3.bf16.msra.mxu0 %v22346_v45  ;;  %18967 = vmatprep.mubr.msk.f32.mxu0 %vm20936_vm1, %v20937_v50 }
0x4237   :  { %20101 = vmatprep.subr.bf16.mxu0 %v20935_v30 }
0x423a   :  { %20103 = vmatpush3.bf16.msra.mxu0 %v22376_v11 }
0x423d   :  { %18968 = vmatmul.mubr.f32.vlgmr.msra.gmra.mrb[40].mxu0 %v14154_v41 }
0x4310   :  { %v14566_v53 = vpop.f32.mrb[40].mxu0 }
0x4311   :  { %v14570_v7 = vadd.f32 %v22652_v16, %v14566_v53  ;;  %v18969_v44 = vpop.f32.mrb[41].mxu0 }
0x4313   :  { %v14572_v29 = vmul.f32 0.5, %v14570_v7 }
0x4315   :  { %20764 = vtanh.f32 %v14572_v29 }
0x4316   :  { %20766 = vtanh.f32 %v14570_v7 }
0x431f   :  { %v20765_v0 = vpop.eup %20764 }
0x4320   :  { %v14574_v35 = vmul.f32 0.5, %v20765_v0  ;;  %v20767_v19 = vpop.eup %20766 }
0x4322   :  { %v14575_v39 = vadd.f32 0.5, %v14574_v35 }
0x4324   :  { %v14576_v57 = vsel %vm21304_vm4, %v20767_v19, %v14575_v39 }
0x4325   :  { %14579 = vrot.lane.b32.xlu0 %v14576_v57, %s20938_s3  ;;  %v14577_v58 = vmul.f32 %v14576_v57, %v14070_v17 }
0x4397   :  { %v14580_v47 = vpop.permute.xlu0 %14579 }
0x4398   :  { %v14582_v6 = vmul.f32 %v14580_v47, %v14576_v57 }
0x439a   :  { %14584 = vrot.lane.b32.xlu1 %v14582_v6, %s20939_s16 }
0x440c   :  { %v14585_v62 = vpop.permute.xlu1 %14584 }
0x440d   :  { %v14587_v16 = vadd.f32 %v14585_v62, %v14577_v58 }
0x440f   :  { %20768 = vtanh.f32 %v14587_v16 }
0x4419   :  { %v20769_v18 = vpop.eup %20768 }
0x441a   :  { %14590 = vrot.lane.b32.xlu0 %v20769_v18, %s20938_s3 }
0x448c   :  { %v14591_v20 = vpop.permute.xlu0 %14590 }
0x448d   :  { %v14593_v2 = vmul.f32 %v14591_v20, %v14576_v57 }
0x448f   :  { %14595 = vrot.lane.b32.xlu1 %v14593_v2, %s20939_s16 }
0x4501   :  { %v14596_v4 = vpop.permute.xlu1 %14595 }
0x4502   :  { %14598 = vst.msk [vmem:[#allocation3 + $0x30] sm:$0xff] %vm999_vm5, %v14596_v4  ;;  %v14600_v42 = vsel %vm999_vm5, %v14596_v4, 0 }
0x4503   :  { %v14671_v14 = vand.u32 4294901760, %v14600_v42 }
0x4505   :  { %v14672_v40 = vsub.f32 %v14600_v42, %v14671_v14 }
0x4507   :  { %v14673_v54 = vand.u32 4294901760, %v14672_v40 }
0x4509   :  { %v14674_v15 = vsub.f32 %v14672_v40, %v14673_v54 }
0x450b   :  { %v14675_v32 = vand.u32 4294901760, %v14674_v15 }
0x450d   :  { %18979 = vmatmul.mubr.f32.vlgmr.msra.gmra.mrb[36].mxu1 %v14675_v32 }
0x450e   :  { %20112 = vmatpush3.bf16.msra.mxu1 %v22448_v46  ;;  %18989 = vmatprep.mubr.msk.f32.mxu1 %vm20936_vm1, %v20937_v50 }
0x450f   :  { %20113 = vmatprep.subr.bf16.mxu1 %v20935_v30 }
0x4512   :  { %20115 = vmatpush3.bf16.msra.mxu1 %v22498_v21 }
0x4513   :  { %20116 = vmatprep.subr.bf16.mxu1 %v20935_v30 }
0x4515   :  { %18990 = vmatmul.mubr.f32.vlgmr.msra.gmra.mrb[36].mxu1 %v14671_v14 }
0x4516   :  { %20118 = vmatpush3.bf16.msra.mxu1 %v22507_v48  ;;  %19000 = vmatprep.mubr.msk.f32.mxu1 %vm20936_vm1, %v20937_v50 }
0x4517   :  { %20119 = vmatprep.subr.bf16.mxu1 %v20935_v30 }
0x451a   :  { %20121 = vmatpush3.bf16.msra.mxu1 %v22517_v28 }
0x451b   :  { %20122 = vmatprep.subr.bf16.mxu1 %v20935_v30 }
0x451d   :  { %19001 = vmatmul.mubr.f32.vlgmr.msra.gmra.mrb[36].mxu1 %v14672_v40 }
0x451e   :  { %20124 = vmatpush3.bf16.msra.mxu1 %v22346_v45  ;;  %19011 = vmatprep.mubr.msk.f32.mxu1 %vm20936_vm1, %v20937_v50 }
0x451f   :  { %20125 = vmatprep.subr.bf16.mxu1 %v20935_v30 }
0x4522   :  { %20127 = vmatpush3.bf16.msra.mxu1 %v22376_v11 }
0x4523   :  { %20128 = vmatprep.subr.bf16.mxu1 %v20935_v30 }
0x4525   :  { %19012 = vmatmul.mubr.f32.vlgmr.msra.gmra.mrb[36].mxu1 %v14673_v54 }
0x4526   :  { %20130 = vmatpush3.bf16.msra.mxu1 %v22542_v31  ;;  %19022 = vmatprep.mubr.msk.f32.mxu1 %vm20936_vm1, %v20937_v50 }
0x4527   :  { %20131 = vmatprep.subr.bf16.mxu1 %v20935_v30 }
0x452a   :  { %20133 = vmatpush3.bf16.msra.mxu1 %v22553_v26 }
0x452b   :  { %20134 = vmatprep.subr.bf16.mxu1 %v20935_v30 }
0x452d   :  { %19023 = vmatmul.mubr.f32.vlgmr.msra.gmra.mrb[36].mxu1 %v14671_v14 }
0x452e   :  { %20136 = vmatpush3.bf16.msra.mxu1 %v22346_v45  ;;  %19033 = vmatprep.mubr.msk.f32.mxu1 %vm20936_vm1, %v20937_v50 }
0x452f   :  { %20137 = vmatprep.subr.bf16.mxu1 %v20935_v30 }
0x4532   :  { %20139 = vmatpush3.bf16.msra.mxu1 %v22376_v11 }
0x4535   :  { %19034 = vmatmul.mubr.f32.vlgmr.msra.gmra.mrb[36].mxu1 %v14671_v14 }
0x4608   :  { %v15083_v46 = vpop.f32.mrb[36].mxu1 }
0x4609   :  { %v15087_v21 = vadd.f32 %v22650_v24, %v15083_v46  ;;  %v19035_v48 = vpop.f32.mrb[37].mxu1 }
0x460b   :  { %v15089_v28 = vmul.f32 0.5, %v15087_v21 }
0x460d   :  { %20770 = vtanh.f32 %v15089_v28 }
0x460e   :  { %20772 = vtanh.f32 %v15087_v21 }
0x4617   :  { %v20771_v31 = vpop.eup %20770 }
0x4618   :  { %v15091_v26 = vmul.f32 0.5, %v20771_v31  ;;  %v20773_v22 = vpop.eup %20772 }
0x461a   :  { %v15092_v38 = vadd.f32 0.5, %v15091_v26 }
0x461c   :  { %v15093_v45 = vsel %vm21304_vm4, %v20773_v22, %v15092_v38 }
0x461d   :  { %15096 = vrot.lane.b32.xlu0 %v15093_v45, %s20938_s3  ;;  %v15094_v11 = vmul.f32 %v15093_v45, %v14587_v16 }
0x468f   :  { %v15097_v30 = vpop.permute.xlu0 %15096 }
0x4690   :  { %v15099_v50 = vmul.f32 %v15097_v30, %v15093_v45 }
0x4692   :  { %15101 = vrot.lane.b32.xlu1 %v15099_v50, %s20939_s16 }
0x4704   :  { %v15102_v1 = vpop.permute.xlu1 %15101 }
0x4705   :  { %v15104_v24 = vadd.f32 %v15102_v1, %v15094_v11 }
0x4707   :  { %20774 = vtanh.f32 %v15104_v24 }
0x4711   :  { %v20775_v56 = vpop.eup %20774 }
0x4712   :  { %15107 = vrot.lane.b32.xlu0 %v20775_v56, %s20938_s3 }
0x4784   :  { %v15108_v43 = vpop.permute.xlu0 %15107 }
0x4785   :  { %v15110_v55 = vmul.f32 %v15108_v43, %v15093_v45 }
0x4787   :  { %15112 = vrot.lane.b32.xlu1 %v15110_v55, %s20939_s16 }
0x47f9   :  { %v15113_v8 = vpop.permute.xlu1 %15112 }
0x47fa   :  { %15115 = vst.msk [vmem:[#allocation3 + $0x38] sm:$0xff] %vm999_vm5, %v15113_v8 }
0x47fb   :  { %20928 = dma.done.wait [#allocation10 + $0x4], 512 }
0x47fc   :  { %20929 = vsyncadd [#allocation10 + $0x4], 4294966784  ;;  %v15126_v37 = vld [vmem:[#allocation9] sm:$0xff]  ;;  %v15127_v25 = vld [vmem:[#allocation9 + $0x8] sm:$0xff]  ;;  %vm15947_vm6 = vcmp.lt.s32.totalorder %v21300_v36, 10 }
0x47fd   :  { %v15128_v27 = vld [vmem:[#allocation9 + $0x10] sm:$0xff]  ;;  %v15162_v49 = vand.u32 4294901760, %v15126_v37  ;;  %v15165_v23 = vand.u32 4294901760, %v15127_v25  ;;  %v15129_v34 = vld [vmem:[#allocation9 + $0x18] sm:$0xff]  ;;  %v15118_v10 = vld [vmem:[#allocation3] sm:$0xff] }
0x47fe   :  { %v15168_v3 = vand.u32 4294901760, %v15128_v27  ;;  %v15119_v5 = vld [vmem:[#allocation3 + $0x8] sm:$0xff]  ;;  %v15171_v52 = vand.u32 4294901760, %v15129_v34  ;;  %v15138_v17 = vsel %vm999_vm5, %v15118_v10, 0  ;;  %v15120_v60 = vld [vmem:[#allocation3 + $0x10] sm:$0xff]  ;;  %v15121_v33 = vld [vmem:[#allocation3 + $0x18] sm:$0xff] }
0x47ff   :  { %v15141_v9 = vsel %vm999_vm5, %v15119_v5, 0  ;;  %v22984_v61 = vpack.c.bf16 %v15165_v23, %v15162_v49  ;;  %v22986_v63 = vand.u32 4294901760, %v15138_v17  ;;  %v22990_v51 = vsub.f32 %v15126_v37, %v15162_v49  ;;  %v15122_v59 = vld [vmem:[#allocation3 + $0x20] sm:$0xff]  ;;  %v15123_v12 = vld [vmem:[#allocation3 + $0x28] sm:$0xff]  ;;  %v15124_v28 = vld [vmem:[#allocation3 + $0x30] sm:$0xff] }
0x4800   :  { %v22988_v41 = vand.u32 4294901760, %v15141_v9  ;;  %v22992_v13 = vpack.c.bf16 %v15171_v52, %v15168_v3  ;;  %v22994_v53 = vsub.f32 %v15127_v25, %v15165_v23  ;;  %v15144_v7 = vsel %vm999_vm5, %v15120_v60, 0 }
0x4801   :  { %v15147_v44 = vsel %vm999_vm5, %v15121_v33, 0  ;;  %20141 = vmatprep.subr.bf16.mxu0 %v22984_v61  ;;  %v23000_v29 = vsub.f32 %v15138_v17, %v22986_v63  ;;  %v15313_v35 = vand.u32 4294901760, %v22990_v51  ;;  %v23006_v39 = vand.u32 4294901760, %v15144_v7  ;;  %v15125_v1 = vld [vmem:[#allocation3 + $0x38] sm:$0xff] }
0x4802   :  { %v23003_v0 = vsub.f32 %v15141_v9, %v22988_v41  ;;  %20143 = vmatpush3.bf16.msra.mxu0 %v22984_v61  ;;  %v15320_v19 = vand.u32 4294901760, %v22994_v53  ;;  %v23010_v57 = vand.u32 4294901760, %v15147_v44  ;;  %v15150_v47 = vsel %vm999_vm5, %v15122_v59, 0 }
0x4803   :  { %v15153_v6 = vsel %vm999_vm5, %v15123_v12, 0  ;;  %20145 = vmatprep.subr.bf16.mxu0 %v22992_v13  ;;  %v15232_v58 = vand.u32 4294901760, %v23000_v29  ;;  %v15314_v16 = vsub.f32 %v22990_v51, %v15313_v35  ;;  %v23021_v18 = vsub.f32 %v15144_v7, %v23006_v39 }
0x4804   :  { %v15242_v62 = vand.u32 4294901760, %v23003_v0  ;;  %v15321_v20 = vsub.f32 %v22994_v53, %v15320_v19  ;;  %v23027_v2 = vsub.f32 %v15147_v44, %v23010_v57  ;;  %v23029_v4 = vand.u32 4294901760, %v15150_v47 }
0x4805   :  { %v23031_v42 = vand.u32 4294901760, %v15153_v6  ;;  %v15233_v14 = vsub.f32 %v23000_v29, %v15232_v58  ;;  %v15315_v54 = vand.u32 4294901760, %v15314_v16  ;;  %v15252_v15 = vand.u32 4294901760, %v23021_v18 }
0x4806   :  { %v15243_v40 = vsub.f32 %v23003_v0, %v15242_v62  ;;  %20147 = vmatpush3.bf16.msra.mxu0 %v22992_v13  ;;  %v15322_v32 = vand.u32 4294901760, %v15321_v20  ;;  %v15262_v46 = vand.u32 4294901760, %v23027_v2  ;;  %v23043_v21 = vsub.f32 %v15150_v47, %v23029_v4 }
0x4807   :  { %v23046_v48 = vsub.f32 %v15153_v6, %v23031_v42  ;;  %v15234_v31 = vand.u32 4294901760, %v15233_v14  ;;  %v15253_v38 = vsub.f32 %v23021_v18, %v15252_v15  ;;  %v23051_v22 = vsub.f32 %v15128_v27, %v15168_v3 }
0x4808   :  { %v15244_v26 = vand.u32 4294901760, %v15243_v40  ;;  %v20148_v45 = vpack.c.bf16 %v15322_v32, %v15315_v54  ;;  %v15263_v30 = vsub.f32 %v23027_v2, %v15262_v46  ;;  %v15272_v50 = vand.u32 4294901760, %v23043_v21 }
0x4809   :  { %v15282_v11 = vand.u32 4294901760, %v23046_v48  ;;  %19044 = vmatprep.mubr.f32.mxu0 %v15234_v31  ;;  %v15254_v24 = vand.u32 4294901760, %v15253_v38  ;;  %v15327_v56 = vand.u32 4294901760, %v23051_v22  ;;  %v23059_v43 = vsub.f32 %v15129_v34, %v15171_v52 }
0x480a   :  { %v15156_v55 = vsel %vm999_vm5, %v15124_v28, 0  ;;  %19045 = vmatmul.mubr.f32.vlgmr.msra.gmra.mrb[42].mxu0 %v15244_v26  ;;  %20149 = vmatprep.subr.bf16.mxu0 %v20148_v45  ;;  %v15264_v8 = vand.u32 4294901760, %v15263_v30  ;;  %v15273_v37 = vsub.f32 %v23043_v21, %v15272_v50  ;;  %v15159_v34 = vsel %vm999_vm5, %v15125_v1, 0 }
0x480b   :  { %v15283_v25 = vsub.f32 %v23046_v48, %v15282_v11  ;;  %v23068_v27 = vand.u32 4294901760, %v15156_v55  ;;  %20151 = vmatpush3.bf16.msra.mxu0 %v20148_v45  ;;  %19047 = vmatprep.mubr.f32.mxu0 %v15254_v24  ;;  %v15328_v49 = vsub.f32 %v23051_v22, %v15327_v56  ;;  %v15334_v23 = vand.u32 4294901760, %v23059_v43 }
0x480c   :  { %v15274_v3 = vand.u32 4294901760, %v15273_v37  ;;  %v23076_v5 = vand.u32 4294901760, %v15159_v34  ;;  %v20156_v47 = vpack.c.bf16 %v22994_v53, %v22990_v51  ;;  %v20160_v14 = vpack.c.bf16 %v23059_v43, %v23051_v22 }
0x480d   :  { %v15291_v10 = vsub.f32 %v15156_v55, %v23068_v27  ;;  %v15329_v52 = vand.u32 4294901760, %v15328_v49  ;;  %v15335_v17 = vsub.f32 %v23059_v43, %v15334_v23  ;;  %v15284_v9 = vand.u32 4294901760, %v15283_v25 }
0x480e   :  { %19048 = vmatmul.mubr.f32.gmra.mrb[44].mxu0 %v15264_v8  ;;  %v15301_v33 = vsub.f32 %v15159_v34, %v23076_v5  ;;  %v20172_v40 = vpack.c.bf16 %v15320_v19, %v15313_v35  ;;  %v20176_v51 = vpack.c.bf16 %v15334_v23, %v15327_v56 }
0x480f   :  { %v15292_v60 = vand.u32 4294901760, %v15291_v10  ;;  %19050 = vmatprep.mubr.f32.mxu0 %v15274_v3  ;;  %v15336_v59 = vand.u32 4294901760, %v15335_v17 }
0x4810   :  { %v15302_v7 = vand.u32 4294901760, %v15301_v33 }
0x4811   :  { %v15293_v12 = vsub.f32 %v15291_v10, %v15292_v60  ;;  %v20152_v44 = vpack.c.bf16 %v15336_v59, %v15329_v52 }
0x4812   :  { %19051 = vmatmul.mubr.f32.gmra.mrb[46].mxu0 %v15284_v9  ;;  %v15303_v16 = vsub.f32 %v15301_v33, %v15302_v7 }
0x4813   :  { %v15294_v6 = vand.u32 4294901760, %v15293_v12  ;;  %20153 = vmatprep.subr.bf16.mxu0 %v20152_v44 }
0x4814   :  { %20155 = vmatpush3.bf16.msra.mxu0 %v20152_v44  ;;  %v15304_v20 = vand.u32 4294901760, %v15303_v16 }
0x4815   :  { %19053 = vmatprep.mubr.f32.mxu0 %v15294_v6  ;;  %20157 = vmatprep.subr.bf16.mxu0 %v20156_v47 }
0x4816   :  { %19054 = vmatmul.mubr.f32.gmra.mrb[48].mxu0 %v15304_v20 }
0x4817   :  { %19064 = vmatprep.mubr.f32.mxu0 %v22986_v63 }
0x481a   :  { %19065 = vmatmul.mubr.f32.vlgmr.msra.gmra.mrb[42].mxu0 %v22988_v41 }
0x481b   :  { %20159 = vmatpush3.bf16.msra.mxu0 %v20156_v47  ;;  %19067 = vmatprep.mubr.f32.mxu0 %v23006_v39 }
0x481c   :  { %20161 = vmatprep.subr.bf16.mxu0 %v20160_v14 }
0x481e   :  { %19068 = vmatmul.mubr.f32.gmra.mrb[44].mxu0 %v23010_v57 }
0x481f   :  { %19070 = vmatprep.mubr.f32.mxu0 %v23029_v4  ;;  %20163 = vmatpush3.bf16.msra.mxu0 %v20160_v14 }
0x4820   :  { %20165 = vmatprep.subr.bf16.mxu0 %v22984_v61 }
0x4822   :  { %19071 = vmatmul.mubr.f32.gmra.mrb[46].mxu0 %v23031_v42 }
0x4823   :  { %19073 = vmatprep.mubr.f32.mxu0 %v23068_v27 }
0x4826   :  { %19074 = vmatmul.mubr.f32.gmra.mrb[48].mxu0 %v23076_v5 }
0x4827   :  { %19084 = vmatprep.mubr.f32.mxu0 %v23000_v29 }
0x482a   :  { %19085 = vmatmul.mubr.f32.vlgmr.msra.gmra.mrb[42].mxu0 %v23003_v0 }
0x482b   :  { %20167 = vmatpush3.bf16.msra.mxu0 %v22984_v61  ;;  %19087 = vmatprep.mubr.f32.mxu0 %v23021_v18 }
0x482c   :  { %20169 = vmatprep.subr.bf16.mxu0 %v22992_v13 }
0x482e   :  { %19088 = vmatmul.mubr.f32.gmra.mrb[44].mxu0 %v23027_v2 }
0x482f   :  { %19090 = vmatprep.mubr.f32.mxu0 %v23043_v21  ;;  %20171 = vmatpush3.bf16.msra.mxu0 %v22992_v13 }
0x4830   :  { %20173 = vmatprep.subr.bf16.mxu0 %v20172_v40 }
0x4832   :  { %19091 = vmatmul.mubr.f32.gmra.mrb[46].mxu0 %v23046_v48 }
0x4833   :  { %19093 = vmatprep.mubr.f32.mxu0 %v15291_v10 }
0x4836   :  { %19094 = vmatmul.mubr.f32.gmra.mrb[48].mxu0 %v15301_v33 }
0x4837   :  { %19104 = vmatprep.mubr.f32.mxu0 %v15232_v58 }
0x483a   :  { %19105 = vmatmul.mubr.f32.vlgmr.msra.gmra.mrb[42].mxu0 %v15242_v62 }
0x483b   :  { %20175 = vmatpush3.bf16.msra.mxu0 %v20172_v40  ;;  %19107 = vmatprep.mubr.f32.mxu0 %v15252_v15 }
0x483c   :  { %20177 = vmatprep.subr.bf16.mxu0 %v20176_v51 }
0x483e   :  { %19108 = vmatmul.mubr.f32.gmra.mrb[44].mxu0 %v15262_v46 }
0x483f   :  { %19110 = vmatprep.mubr.f32.mxu0 %v15272_v50  ;;  %20179 = vmatpush3.bf16.msra.mxu0 %v20176_v51 }
0x4840   :  { %20181 = vmatprep.subr.bf16.mxu0 %v22984_v61 }
0x4842   :  { %19111 = vmatmul.mubr.f32.gmra.mrb[46].mxu0 %v15282_v11 }
0x4843   :  { %19113 = vmatprep.mubr.f32.mxu0 %v15292_v60 }
0x4846   :  { %19114 = vmatmul.mubr.f32.gmra.mrb[48].mxu0 %v15302_v7 }
0x4847   :  { %19124 = vmatprep.mubr.f32.mxu0 %v22986_v63 }
0x484a   :  { %19125 = vmatmul.mubr.f32.vlgmr.msra.gmra.mrb[42].mxu0 %v22988_v41 }
0x484b   :  { %20183 = vmatpush3.bf16.msra.mxu0 %v22984_v61  ;;  %19127 = vmatprep.mubr.f32.mxu0 %v23006_v39  ;;  %v16114_v61 = vld [vmem:[%s23215_s11] ss:$0 sm:$0xff]  ;;  %s20943_s11 = smov [#allocation14]  }
0x484c   :  { %20185 = vmatprep.subr.bf16.mxu0 %v22992_v13  ;;  %s16052_s16 = sshll.u32 %s20943_s11, 4  ;;  %s16053_s16 = int_to_ptr.vmem [resolvable:$true] %s16052_s16 }
0x484d   :  { %s20896_s28 = scalar_lea.vmem %s16053_s16, 128  ;;  %p20901_p5 = scmp.lt.s32.totalorder %s16053_s16, %s16053_s16 }
0x484e   :  { %19128 = vmatmul.mubr.f32.gmra.mrb[44].mxu0 %v23010_v57  ;;  %p20897_p4 = scmp.ne.s32.totalorder %s16053_s16, %s20896_s28  ;;  %p20902_p6 = scmp.lt.s32.totalorder %s20896_s28, %s20896_s28 }
0x484f   :  { %19130 = vmatprep.mubr.f32.mxu0 %v23029_v4  ;;  %20187 = vmatpush3.bf16.msra.mxu0 %v22992_v13 }
0x4850   :  { %p20903_p7 = por %p20902_p6, %p20901_p5 }
0x4852   :  { %19131 = vmatmul.mubr.f32.gmra.mrb[46].mxu0 %v23031_v42  ;;  %p20904_p8 = pnand %p20903_p7, %p20897_p4 }
0x4853   :  { %19133 = vmatprep.mubr.f32.mxu0 %v23068_v27 }
0x4856   :  { %19134 = vmatmul.mubr.f32.gmra.mrb[48].mxu0 %v23076_v5 }
0x4857   :  { %19144 = vmatprep.mubr.f32.mxu0 %v22986_v63 }
0x485a   :  { %19145 = vmatmul.mubr.f32.vlgmr.msra.gmra.mrb[42].mxu0 %v22988_v41 }
0x485b   :  { %19147 = vmatprep.mubr.f32.mxu0 %v23006_v39 }
0x485e   :  { %19148 = vmatmul.mubr.f32.gmra.mrb[44].mxu0 %v23010_v57 }
0x485f   :  { %19150 = vmatprep.mubr.f32.mxu0 %v23029_v4 }
0x4862   :  { %19151 = vmatmul.mubr.f32.gmra.mrb[46].mxu0 %v23031_v42 }
0x4863   :  { %19153 = vmatprep.mubr.f32.mxu0 %v23068_v27 }
0x4866   :  { %19154 = vmatmul.mubr.f32.gmra.mrb[48].mxu0 %v23076_v5 }
0x492d   :  { %v19146_v13 = vpop.f32.mrb[42].mxu0 }
0x492e   :  { %v15901_v63 = vpop.f32.mrb[43].mxu0  ;;  %v20220_v53 = vadd.f32 %v19146_v13, %v16114_v61 }
0x492f   :  { %v20221_v41 = vadd.f32 %v16114_v61, %v15901_v63 }
0x4930   :  { %v15949_v62 = vsel %vm15947_vm6, %v20220_v53, -1e+30 }
0x4931   :  { %v19149_v29 = vpop.f32.mrb[44].mxu0  ;;  %v15948_v0 = vsel %vm15947_vm6, %v20221_v41, -1e+30 }
0x4932   :  { %v15913_v35 = vpop.f32.mrb[45].mxu0  ;;  %15956 = vmax.xlane.f32.xlu0 %v15948_v0  ;;  %v20222_v19 = vadd.f32 %v19149_v29, %v16114_v61 }
0x4933   :  { %v20223_v39 = vadd.f32 %v16114_v61, %v15913_v35 }
0x4934   :  { %v15951_v54 = vsel %vm15947_vm6, %v20222_v19, -1e+30 }
0x4935   :  { %v19152_v57 = vpop.f32.mrb[46].mxu0  ;;  %v15950_v58 = vsel %vm15947_vm6, %v20223_v39, -1e+30 }
0x4936   :  { %v15925_v18 = vpop.f32.mrb[47].mxu0  ;;  %15960 = vmax.xlane.f32.xlu1 %v15950_v58  ;;  %15958 = vmax.xlane.f32.xlu0 %v15949_v62  ;;  %v20224_v4 = vadd.f32 %v19152_v57, %v16114_v61 }
0x4937   :  { %v20225_v2 = vadd.f32 %v16114_v61, %v15925_v18 }
0x4938   :  { %v15953_v48 = vsel %vm15947_vm6, %v20224_v4, -1e+30 }
0x4939   :  { %v19155_v42 = vpop.f32.mrb[48].mxu0  ;;  %v15952_v15 = vsel %vm15947_vm6, %v20225_v2, -1e+30 }
0x493a   :  { %v15937_v32 = vpop.f32.mrb[49].mxu0  ;;  %15962 = vmax.xlane.f32.xlu1 %v15951_v54  ;;  %15964 = vmax.xlane.f32.xlu0 %v15952_v15  ;;  %v20226_v21 = vadd.f32 %v19155_v42, %v16114_v61 }
0x493b   :  { %v20227_v46 = vadd.f32 %v16114_v61, %v15937_v32 }
0x493c   :  { %v15955_v31 = vsel %vm15947_vm6, %v20226_v21, -1e+30 }
0x493d   :  { %v15954_v28 = vsel %vm15947_vm6, %v20227_v46, -1e+30 }
0x493e   :  { %15966 = vmax.xlane.f32.xlu1 %v15953_v48  ;;  %15968 = vmax.xlane.f32.xlu0 %v15954_v28 }
0x4942   :  { %15970 = vmax.xlane.f32.xlu1 %v15955_v31 }
0x49bf   :  { %v15957_v26 = vpop.xlane.xlu0 %15956 }
0x49c0   :  { %v23160_v38 = vsub.f32 %v15948_v0, %v15957_v26 }
0x49c2   :  { %v15980_v22 = vmul.f32 1.442695, %v23160_v38 }
0x49c3   :  { %v15961_v45 = vpop.xlane.xlu1 %15960  ;;  %v15959_v30 = vpop.xlane.xlu0 %15958 }
0x49c4   :  { %20776 = vpow2.f32 %v15980_v22  ;;  %v23163_v50 = vsub.f32 %v15950_v58, %v15961_v45  ;;  %v23165_v11 = vsub.f32 %v15949_v62, %v15959_v30 }
0x49c6   :  { %v15984_v1 = vmul.f32 1.442695, %v23163_v50  ;;  %v15982_v24 = vmul.f32 1.442695, %v23165_v11 }
0x49c7   :  { %v15963_v56 = vpop.xlane.xlu1 %15962  ;;  %v15965_v36 = vpop.xlane.xlu0 %15964 }
0x49c8   :  { %20778 = vpow2.f32 %v15984_v1  ;;  %v23169_v43 = vsub.f32 %v15951_v54, %v15963_v56  ;;  %v23171_v55 = vsub.f32 %v15952_v15, %v15965_v36 }
0x49c9   :  { %20780 = vpow2.f32 %v15982_v24 }
0x49ca   :  { %v15986_v8 = vmul.f32 1.442695, %v23169_v43  ;;  %v15988_v37 = vmul.f32 1.442695, %v23171_v55 }
0x49cb   :  { %v15967_v25 = vpop.xlane.xlu1 %15966  ;;  %v15969_v27 = vpop.xlane.xlu0 %15968 }
0x49cc   :  { %20782 = vpow2.f32 %v15986_v8  ;;  %v23175_v49 = vsub.f32 %v15953_v48, %v15967_v25  ;;  %v23177_v23 = vsub.f32 %v15954_v28, %v15969_v27 }
0x49cd   :  { %20784 = vpow2.f32 %v15988_v37 }
0x49ce   :  { %v20777_v34 = vpop.eup %20776  ;;  %v15990_v3 = vmul.f32 1.442695, %v23175_v49  ;;  %v15992_v10 = vmul.f32 1.442695, %v23177_v23 }
0x49cf   :  { %v15971_v5 = vpop.xlane.xlu1 %15970  ;;  %15996 = vadd.xlane.f32.xlu0 %v20777_v34 }
0x49d0   :  { %20786 = vpow2.f32 %v15990_v3  ;;  %v23181_v52 = vsub.f32 %v15955_v31, %v15971_v5 }
0x49d1   :  { %20788 = vpow2.f32 %v15992_v10 }
0x49d2   :  { %v20779_v17 = vpop.eup %20778  ;;  %v15994_v9 = vmul.f32 1.442695, %v23181_v52 }
0x49d3   :  { %v20781_v60 = vpop.eup %20780  ;;  %16000 = vadd.xlane.f32.xlu0 %v20779_v17 }
0x49d4   :  { %20790 = vpow2.f32 %v15994_v9  ;;  %15998 = vadd.xlane.f32.xlu1 %v20781_v60 }
0x49d6   :  { %v20783_v33 = vpop.eup %20782 }
0x49d7   :  { %v20785_v59 = vpop.eup %20784 }
0x49d8   :  { %16002 = vadd.xlane.f32.xlu1 %v20783_v33  ;;  %16004 = vadd.xlane.f32.xlu0 %v20785_v59 }
0x49da   :  { %v20787_v12 = vpop.eup %20786 }
0x49db   :  { %v20789_v7 = vpop.eup %20788 }
0x49dc   :  { %16006 = vadd.xlane.f32.xlu1 %v20787_v12  ;;  %16008 = vadd.xlane.f32.xlu0 %v20789_v7 }
0x49de   :  { %v20791_v44 = vpop.eup %20790 }
0x49e0   :  { %16010 = vadd.xlane.f32.xlu1 %v20791_v44 }
0x4a5c   :  { %v15997_v47 = vpop.xlane.xlu0 %15996 }
0x4a5d   :  { %20792 = vlog2.f32 %v15997_v47 }
0x4a60   :  { %v16001_v6 = vpop.xlane.xlu0 %16000 }
0x4a61   :  { %v15999_v16 = vpop.xlane.xlu1 %15998  ;;  %20794 = vlog2.f32 %v16001_v6 }
0x4a62   :  { %20796 = vlog2.f32 %v15999_v16 }
0x4a65   :  { %v16003_v20 = vpop.xlane.xlu1 %16002  ;;  %v16005_v14 = vpop.xlane.xlu0 %16004 }
0x4a66   :  { %20798 = vlog2.f32 %v16003_v20 }
0x4a67   :  { %20800 = vlog2.f32 %v16005_v14  ;;  %v20793_v40 = vpop.eup %20792 }
0x4a68   :  { %v16013_v63 = vmul.f32 0.6931472, %v20793_v40 }
0x4a69   :  { %v16007_v51 = vpop.xlane.xlu1 %16006  ;;  %v16009_v61 = vpop.xlane.xlu0 %16008 }
0x4a6a   :  { %20802 = vlog2.f32 %v16007_v51  ;;  %v16028_v35 = vsub.f32 %v23160_v38, %v16013_v63 }
0x4a6b   :  { %v20795_v13 = vpop.eup %20794  ;;  %20804 = vlog2.f32 %v16009_v61 }
0x4a6c   :  { %v20797_v41 = vpop.eup %20796  ;;  %v16017_v29 = vmul.f32 0.6931472, %v20795_v13 }
0x4a6d   :  { %v16015_v53 = vmul.f32 0.6931472, %v20797_v41  ;;  %v16011_v0 = vpop.xlane.xlu1 %16010 }
0x4a6e   :  { %20806 = vlog2.f32 %v16011_v0  ;;  %v16030_v62 = vsub.f32 %v23163_v50, %v16017_v29 }
0x4a6f   :  { %v16029_v39 = vsub.f32 %v23165_v11, %v16015_v53 }
0x4a70   :  { %v20799_v19 = vpop.eup %20798 }
0x4a71   :  { %v20801_v57 = vpop.eup %20800  ;;  %v16036_v58 = vadd.f32 %v16029_v39, %v16028_v35  ;;  %v16019_v18 = vmul.f32 0.6931472, %v20799_v19 }
0x4a72   :  { %v16021_v2 = vmul.f32 0.6931472, %v20801_v57 }
0x4a73   :  { %v16037_v4 = vadd.f32 %v16036_v58, %v16030_v62  ;;  %v16031_v42 = vsub.f32 %v23169_v43, %v16019_v18 }
0x4a74   :  { %v20803_v54 = vpop.eup %20802  ;;  %v16032_v46 = vsub.f32 %v23171_v55, %v16021_v2 }
0x4a75   :  { %v20805_v15 = vpop.eup %20804  ;;  %v16038_v32 = vadd.f32 %v16037_v4, %v16031_v42  ;;  %v16023_v21 = vmul.f32 0.6931472, %v20803_v54 }
0x4a76   :  { %v16025_v48 = vmul.f32 0.6931472, %v20805_v15 }
0x4a77   :  { %v16039_v28 = vadd.f32 %v16038_v32, %v16032_v46  ;;  %v16033_v31 = vsub.f32 %v23175_v49, %v16023_v21 }
0x4a78   :  { %v20807_v26 = vpop.eup %20806  ;;  %v16034_v22 = vsub.f32 %v23177_v23, %v16025_v48 }
0x4a79   :  { %v16040_v38 = vadd.f32 %v16039_v28, %v16033_v31  ;;  %v16027_v45 = vmul.f32 0.6931472, %v20807_v26 }
0x4a7b   :  { %v16035_v30 = vsub.f32 %v23181_v52, %v16027_v45  ;;  %v16041_v50 = vadd.f32 %v16040_v38, %v16034_v22 }
0x4a7d   :  { %v16042_v11 = vadd.f32 %v16041_v50, %v16035_v30 }
0x4a7f   :  { %v16044_v1 = vmul.f32 0.125, %v16042_v11 }
0x4a81   :  { %16045 = vst [vmem:[#allocation14] sm:$0xff] %v16044_v1 }
0x4a82   :  { %20907 = shalt.err (!%p20904_p8)
}
0x4a83   :  { %s20908_s13 = scalar_lea.hbm %s23216_s12, 128 }
0x4a84   :  { %p20909_p9 = scmp.ne.s32.totalorder %s23216_s12, %s20908_s13  ;;  %p20912_p10 = scmp.lt.u32.totalorder %s20908_s13, %s23216_s12 }
0x4a86   :  { %p20914_p11 = pnand %p20912_p10, %p20909_p9 }
0x4a88   :  { %20917 = shalt.err (!%p20914_p11)
}
0x4a89   :  { %16055 = dma.vmem_to_hbm [thread:$0]  %s16053_s16, 128, %s23216_s12, [#allocation13]  }
0x4a8a   :  { %20930 = dma.done.wait [#allocation13], 128  }
0x4a8b   :  { %20931 = vsyncadd [#allocation13], 4294967168 }
0x4a8c   :  { %16059 = vsyncpa [#allocation12], 1 }
0x4a8d   :  { %16060 = vsyncpa [#allocation13], 1 }
0x4a8e   :  { %16061 = vsyncmov [#allocation10] }
0x4a91   :  { %s16062_s18 = vpop.sfrf %16061 }
0x4a92   :  { %p16115_p12 = scmp.ne.s32.totalorder %s16062_s18, 0 }
0x4a94   :  { %16066 = shalt.err (%p16115_p12)  }
0x4a95   :  { %16068 = vsyncmov [#allocation10 + $0x1] }
0x4a98   :  { %s16069_s5 = vpop.sfrf %16068 }
0x4a99   :  { %p16116_p13 = scmp.ne.s32.totalorder %s16069_s5, 0 }
0x4a9b   :  { %16073 = shalt.err (%p16116_p13)  }
0x4a9c   :  { %16075 = vsyncmov [#allocation10 + $0x2] }
0x4a9f   :  { %s16076_s20 = vpop.sfrf %16075 }
0x4aa0   :  { %p16117_p0 = scmp.ne.s32.totalorder %s16076_s20, 0 }
0x4aa2   :  { %16080 = shalt.err (%p16117_p0)  }
0x4aa3   :  { %16082 = vsyncmov [#allocation10 + $0x3] }
0x4aa6   :  { %s16083_s21 = vpop.sfrf %16082 }
0x4aa7   :  { %p16118_p1 = scmp.ne.s32.totalorder %s16083_s21, 0 }
0x4aa9   :  { %16087 = shalt.err (%p16118_p1)  }
0x4aaa   :  { %16089 = vsyncmov [#allocation10 + $0x4] }
0x4aad   :  { %s16090_s12 = vpop.sfrf %16089 }
0x4aae   :  { %p16119_p2 = scmp.ne.s32.totalorder %s16090_s12, 0 }
0x4ab0   :  { %16094 = shalt.err (%p16119_p2)  }

</bundles_post_ra>
